<compile_context>
chip_gen: v6e
topology: v6e:2x2x1
jax: 0.10.0
libtpu: 0.0.40
codegen_flags: <defaults>
</compile_context>

<pallas_src>
import functools

import jax
import jax.numpy as jnp
from jax.experimental import pallas as pl
from jax.experimental.pallas import tpu as pltpu


# --------------------------------------------------------------------------- #
# In-kernel helpers (operate on (C, H*W) flattened CHW activations)
# --------------------------------------------------------------------------- #
def _taps9(x, masks, W, HW):
    """Build the 9 zero-padded 3x3 conv taps of a flattened image.

    x: (C, H*W).  Returns a list of 9 arrays (C, H*W), ordered (ky, kx)
    row-major, with  tap[(dy+1)*3+(dx+1)][c, y*W+x] = x[c, (y+dy)*W + (x+dx)]
    when (y+dy, x+dx) is inside the image and 0 otherwise (SAME padding).
    """
    left_ok, right_ok = masks          # (1, HW) bool: x-1 valid / x+1 valid
    C = x.shape[0]
    taps = []
    for dy in (-1, 0, 1):
        for dx in (-1, 0, 1):
            off = dy * W + dx
            if off > 0:
                s = jnp.concatenate(
                    [x[:, off:], jnp.zeros((C, off), x.dtype)], axis=1)
            elif off < 0:
                s = jnp.concatenate(
                    [jnp.zeros((C, -off), x.dtype), x[:, :HW + off]], axis=1)
            else:
                s = x
            # fix the horizontal wrap across row boundaries
            if dx == -1:
                s = jnp.where(left_ok, s, 0.0)
            elif dx == 1:
                s = jnp.where(right_ok, s, 0.0)
            taps.append(s)
    return taps


def _conv_from_taps(tap_groups, w_ref, b_ref=None):
    """One fat MXU matmul: (cout, 9*cin_total) x (9*cin_total, H*W).

    tap_groups: list (in torch.cat channel order) of 9-tap lists.
    w_ref columns are ordered (ky, kx, concatenated-cin) — see _prep_w.
    """
    rows = []
    for t in range(9):                 # (ky, kx) outer ...
        for g in tap_groups:           # ... concatenated sources inner
            rows.append(g[t])
    k_mat = jnp.concatenate(rows, axis=0).astype(w_ref.dtype)
    acc = jnp.dot(w_ref[...], k_mat, preferred_element_type=jnp.float32)
    if b_ref is not None:
        acc = acc + b_ref[...]         # (cout, 1) broadcasts along lanes
    return acc


def _lrelu(a, slope):
    return jnp.where(a >= 0, a, a * slope)


# --------------------------------------------------------------------------- #
# Kernel A: UpBlock conv3x3 (2C -> 4C, bias) at half resolution
# --------------------------------------------------------------------------- #
def _up_conv_kernel(x2_ref, w_ref, b_ref, o_ref, *, H2, W2):
    HW2 = H2 * W2
    col = jax.lax.broadcasted_iota(jnp.int32, (1, HW2), 1) % W2
    masks = (col > 0, col < W2 - 1)

    x2 = x2_ref[0].astype(jnp.float32)                 # (2C, H2*W2)
    taps = _taps9(x2, masks, W2, HW2)
    acc = _conv_from_taps([taps], w_ref, b_ref)        # (4C, H2*W2)
    o_ref[0] = acc.astype(o_ref.dtype)


# --------------------------------------------------------------------------- #
# Kernel B: fused DoubleConv + ResidualDenseBlock
# --------------------------------------------------------------------------- #
def _fused_dc_rdb_kernel(x1_ref, up_ref,
                         w_dc1_ref, w_dc2_ref,
                         w_r1_ref, b_r1_ref, w_r2_ref, b_r2_ref,
                         w_r3_ref, b_r3_ref, w_r4_ref, b_r4_ref,
                         w_r5_ref, b_r5_ref,
                         o_ref, *, H, W):
    HW = H * W
    col = jax.lax.broadcasted_iota(jnp.int32, (1, HW), 1) % W
    masks = (col > 0, col < W - 1)     # hoisted: shared by every conv below

    def taps(x):
        return _taps9(x, masks, W, HW)

    x1 = x1_ref[0].astype(jnp.float32)                 # (C, HW)
    up = up_ref[0].astype(jnp.float32)                 # (C, HW)

    # --- DoubleConv(2C -> C): cat([x1, up]) handled by tap-group ordering ---
    d1 = _lrelu(_conv_from_taps([taps(x1), taps(up)], w_dc1_ref), 0.1)
    x0 = _lrelu(_conv_from_taps([taps(d1)], w_dc2_ref), 0.1)

    # --- ResidualDenseBlock(num_feat=C, num_grow_ch=C) -----------------------
    t0 = taps(x0)
    r1 = _lrelu(_conv_from_taps([t0], w_r1_ref, b_r1_ref), 0.2)
    t1 = taps(r1)
    r2 = _lrelu(_conv_from_taps([t0, t1], w_r2_ref, b_r2_ref), 0.2)
    t2 = taps(r2)
    r3 = _lrelu(_conv_from_taps([t0, t1, t2], w_r3_ref, b_r3_ref), 0.2)
    t3 = taps(r3)
    r4 = _lrelu(_conv_from_taps([t0, t1, t2, t3], w_r4_ref, b_r4_ref), 0.2)
    t4 = taps(r4)
    r5 = _conv_from_taps([t0, t1, t2, t3, t4], w_r5_ref, b_r5_ref)

    o_ref[0] = (r5 * 0.2 + x0).astype(o_ref.dtype)     # fused residual


# --------------------------------------------------------------------------- #
# Host-side wrapper
# --------------------------------------------------------------------------- #
def _prep_w(w):
    """PyTorch OIHW (cout, cin, 3, 3) -> (cout, 9*cin) with column order
    (ky, kx, cin) matching the tap stacking used in the kernels."""
    cout, cin = w.shape[0], w.shape[1]
    return jnp.transpose(w, (0, 2, 3, 1)).reshape(cout, 9 * cin)


def upsample_dense_block(x1, x2, params, *, mm_dtype=jnp.float32):
    """Forward pass of UpsampleDenseBlock.  NCHW in, NCHW out.

    x1: (N, C, H, W)         skip connection at full resolution
    x2: (N, 2C, H/2, W/2)    low-resolution features
    mm_dtype: matmul operand dtype (jnp.bfloat16 recommended on v6e/v7x;
              accumulation is always fp32).
    """
    N, C, H, W = x1.shape
    N2, C2, H2, W2 = x2.shape
    assert N2 == N and C2 == 2 * C and H == 2 * H2 and W == 2 * W2
    HW, HW2 = H * W, H2 * W2

    # ---------------- Kernel A: UpBlock conv at half resolution --------------
    w_up = _prep_w(params["up_w"]).astype(mm_dtype)
    b_up = params["up_b"].reshape(-1, 1).astype(jnp.float32)
    up_kernel = functools.partial(_up_conv_kernel, H2=H2, W2=W2)
    u = pl.pallas_call(
        up_kernel,
        out_shape=jax.ShapeDtypeStruct((N, 4 * C, HW2), x1.dtype),
        grid=(N,),
        in_specs=[
            pl.BlockSpec((1, C2, HW2), lambda n: (n, 0, 0)),
            pl.BlockSpec(w_up.shape, lambda n: (0, 0)),
            pl.BlockSpec(b_up.shape, lambda n: (0, 0)),
        ],
        out_specs=pl.BlockSpec((1, 4 * C, HW2), lambda n: (n, 0, 0)),
        compiler_params=pltpu.CompilerParams(dimension_semantics=("parallel",)),
    )(x2.reshape(N, C2, HW2), w_up, b_up)

    # PixelShuffle(2): (N, 4C, H2, W2) -> (N, C, H, W).  Pure layout permute,
    # done in XLA between the two Pallas calls (cheapest/most robust place).
    u = (u.reshape(N, C, 2, 2, H2, W2)
           .transpose(0, 1, 4, 2, 5, 3)
           .reshape(N, C, HW))

    # ---------------- Kernel B: fused DoubleConv + RDB ------------------------
    def w_(name):
        return _prep_w(params[name]).astype(mm_dtype)

    def b_(name):
        return params[name].reshape(-1, 1).astype(jnp.float32)

    args = [
        x1.reshape(N, C, HW), u,
        w_("dc_c1_w"), w_("dc_c2_w"),
        w_("rdb_c1_w"), b_("rdb_c1_b"),
        w_("rdb_c2_w"), b_("rdb_c2_b"),
        w_("rdb_c3_w"), b_("rdb_c3_b"),
        w_("rdb_c4_w"), b_("rdb_c4_b"),
        w_("rdb_c5_w"), b_("rdb_c5_b"),
    ]
    in_specs = [
        pl.BlockSpec((1, C, HW), lambda n: (n, 0, 0)),
        pl.BlockSpec((1, C, HW), lambda n: (n, 0, 0)),
    ]
    for a in args[2:]:
        in_specs.append(pl.BlockSpec(a.shape, lambda n: (0, 0)))

    fused = functools.partial(_fused_dc_rdb_kernel, H=H, W=W)
    out = pl.pallas_call(
        fused,
        out_shape=jax.ShapeDtypeStruct((N, C, HW), x1.dtype),
        grid=(N,),
        in_specs=in_specs,
        out_specs=pl.BlockSpec((1, C, HW), lambda n: (n, 0, 0)),
        compiler_params=pltpu.CompilerParams(dimension_semantics=("parallel",)),
    )(*args)

    return out.reshape(N, C, H, W)


# --------------------------------------------------------------------------- #
# Deterministic synthetic parameters (shapes match the PyTorch module)
# --------------------------------------------------------------------------- #
def init_params(key, num_feat):
    C = G = num_feat

    def w(k, cout, cin, scale=0.1):
        return jax.random.normal(k, (cout, cin, 3, 3), jnp.float32) * scale  # OIHW

    def b(k, cout):
        return jax.random.normal(k, (cout,), jnp.float32) * 0.01

    ks = jax.random.split(key, 14)
    return {
        # UpBlock: Conv2d(2C -> 4C, k=3, pad=1, bias=True) + PixelShuffle(2)
        "up_w": w(ks[0], 4 * C, 2 * C), "up_b": b(ks[1], 4 * C),
        # DoubleConv(2C -> C): bias-free convs, LeakyReLU(0.1)
        "dc_c1_w": w(ks[2], C, 2 * C), "dc_c2_w": w(ks[3], C, C),
        # ResidualDenseBlock(num_feat=C, num_grow_ch=C), LeakyReLU(0.2)
        "rdb_c1_w": w(ks[4], G, C),          "rdb_c1_b": b(ks[5], G),
        "rdb_c2_w": w(ks[6], G, C + G),      "rdb_c2_b": b(ks[7], G),
        "rdb_c3_w": w(ks[8], G, C + 2 * G),  "rdb_c3_b": b(ks[9], G),
        "rdb_c4_w": w(ks[10], G, C + 3 * G), "rdb_c4_b": b(ks[11], G),
        "rdb_c5_w": w(ks[12], C, C + 4 * G), "rdb_c5_b": b(ks[13], C),
    }


if __name__ == "__main__":
    key = jax.random.PRNGKey(0)
    k1, k2, kp = jax.random.split(key, 3)

    num_feat = 4
    N, H, W = 2, 16, 16
    x1 = jax.random.normal(k1, (N, num_feat, H, W), jnp.float32)          # NCHW
    x2 = jax.random.normal(k2, (N, 2 * num_feat, H // 2, W // 2), jnp.float32)
    params = init_params(kp, num_feat)

    fwd = jax.jit(upsample_dense_block)
    out = fwd(x1, x2, params)
    jax.block_until_ready(out)

    assert out.shape == (N, num_feat, H, W), out.shape
    print("KERNEL_OK")
</pallas_src>

<mosaic_0001>
module attributes {stable_mosaic.version = 11 : i64} {
  func.func @_up_conv_kernel(%arg0: i32, %arg1: memref<1x8x64xf32, #tpu.memory_space<vmem>>, %arg2: memref<16x72xf32, #tpu.memory_space<vmem>>, %arg3: memref<16x1xf32, #tpu.memory_space<vmem>>, %arg4: memref<1x16x64xf32, #tpu.memory_space<vmem>>) attributes {dimension_semantics = [#tpu.dimension_semantics<parallel>], iteration_bounds = array<i64: 2>, scalar_prefetch = 0 : i64, scratch_operands = 0 : i64, tpu.core_type = #tpu.core_type<tc>, window_params = [{transform_indices = @transform_0, window_bounds = array<i64: 1, 8, 64>}, {pipeline_mode = #tpu.pipeline_mode<synchronous>, transform_indices = @transform_1, window_bounds = array<i64: 16, 72>}, {pipeline_mode = #tpu.pipeline_mode<synchronous>, transform_indices = @transform_2, window_bounds = array<i64: 16, 1>}, {transform_indices = @transform_3, window_bounds = array<i64: 1, 16, 64>}]} {
    %0 = tpu.iota {dimensions = array<i32: 1>} : vector<1x64xi32>
    %c8_i32 = arith.constant 8 : i32
    %c0_i32 = arith.constant 0 : i32
    %1 = arith.cmpi eq, %c8_i32, %c0_i32 : i32
    %c1_i32 = arith.constant 1 : i32
    %2 = arith.select %1, %c1_i32, %c8_i32 : i32
    %3 = vector.broadcast %2 : i32 to vector<1x64xi32>
    %4 = arith.remsi %0, %3 : vector<1x64xi32>
    %c0_i32_0 = arith.constant 0 : i32
    %5 = vector.broadcast %c0_i32_0 : i32 to vector<1x64xi32>
    %6 = arith.cmpi ne, %4, %5 : vector<1x64xi32>
    %c0_i32_1 = arith.constant 0 : i32
    %7 = vector.broadcast %c0_i32_1 : i32 to vector<1x64xi32>
    %8 = arith.cmpi slt, %4, %7 : vector<1x64xi32>
    %c0_i32_2 = arith.constant 0 : i32
    %9 = arith.cmpi slt, %2, %c0_i32_2 : i32
    %10 = vector.broadcast %9 : i1 to vector<1x64xi1>
    %11 = vector.broadcast %10 : vector<1x64xi1> to vector<1x64xi1>
    %12 = arith.xori %8, %11 : vector<1x64xi1>
    %13 = arith.andi %12, %6 : vector<1x64xi1>
    %14 = vector.broadcast %2 : i32 to vector<1x64xi32>
    %15 = arith.addi %4, %14 : vector<1x64xi32>
    %16 = arith.select %13, %15, %4 : vector<1x64xi1>, vector<1x64xi32>
    %c0_i32_3 = arith.constant 0 : i32
    %17 = vector.broadcast %c0_i32_3 : i32 to vector<1x64xi32>
    %18 = arith.cmpi sgt, %16, %17 : vector<1x64xi32>
    %c7_i32 = arith.constant 7 : i32
    %19 = vector.broadcast %c7_i32 : i32 to vector<1x64xi32>
    %20 = arith.cmpi slt, %16, %19 : vector<1x64xi32>
    %c0 = arith.constant 0 : index
    %c0_4 = arith.constant 0 : index
    %c0_5 = arith.constant 0 : index
    %21 = vector.load %arg1[%c0, %c0_4, %c0_5] : memref<1x8x64xf32, #tpu.memory_space<vmem>>, vector<1x8x64xf32>
    %22 = vector.shape_cast %21 : vector<1x8x64xf32> to vector<8x64xf32>
    %cst = arith.constant 0.000000e+00 : f32
    %23 = vector.broadcast %cst : f32 to vector<8x9xf32>
    %24 = vector.extract_strided_slice %22 {offsets = [0, 0], sizes = [8, 55], strides = [1, 1]} : vector<8x64xf32> to vector<8x55xf32>
    %25 = tpu.concatenate %23, %24 in 1 : vector<8x9xf32>, vector<8x55xf32> -> vector<8x64xf32>
    %cst_6 = arith.constant 0.000000e+00 : f32
    %26 = vector.shape_cast %18 : vector<1x64xi1> to vector<1x64xi1>
    %27 = vector.broadcast %26 : vector<1x64xi1> to vector<8x64xi1>
    %28 = vector.broadcast %cst_6 : f32 to vector<8x64xf32>
    %29 = arith.select %27, %25, %28 : vector<8x64xi1>, vector<8x64xf32>
    %cst_7 = arith.constant 0.000000e+00 : f32
    %30 = vector.broadcast %cst_7 : f32 to vector<8x8xf32>
    %31 = vector.extract_strided_slice %22 {offsets = [0, 0], sizes = [8, 56], strides = [1, 1]} : vector<8x64xf32> to vector<8x56xf32>
    %32 = tpu.concatenate %30, %31 in 1 : vector<8x8xf32>, vector<8x56xf32> -> vector<8x64xf32>
    %cst_8 = arith.constant 0.000000e+00 : f32
    %33 = vector.broadcast %cst_8 : f32 to vector<8x7xf32>
    %34 = vector.extract_strided_slice %22 {offsets = [0, 0], sizes = [8, 57], strides = [1, 1]} : vector<8x64xf32> to vector<8x57xf32>
    %35 = tpu.concatenate %33, %34 in 1 : vector<8x7xf32>, vector<8x57xf32> -> vector<8x64xf32>
    %cst_9 = arith.constant 0.000000e+00 : f32
    %36 = vector.shape_cast %20 : vector<1x64xi1> to vector<1x64xi1>
    %37 = vector.broadcast %36 : vector<1x64xi1> to vector<8x64xi1>
    %38 = vector.broadcast %cst_9 : f32 to vector<8x64xf32>
    %39 = arith.select %37, %35, %38 : vector<8x64xi1>, vector<8x64xf32>
    %cst_10 = arith.constant 0.000000e+00 : f32
    %40 = vector.broadcast %cst_10 : f32 to vector<8x1xf32>
    %41 = vector.extract_strided_slice %22 {offsets = [0, 0], sizes = [8, 63], strides = [1, 1]} : vector<8x64xf32> to vector<8x63xf32>
    %42 = tpu.concatenate %40, %41 in 1 : vector<8x1xf32>, vector<8x63xf32> -> vector<8x64xf32>
    %cst_11 = arith.constant 0.000000e+00 : f32
    %43 = vector.shape_cast %18 : vector<1x64xi1> to vector<1x64xi1>
    %44 = vector.broadcast %43 : vector<1x64xi1> to vector<8x64xi1>
    %45 = vector.broadcast %cst_11 : f32 to vector<8x64xf32>
    %46 = arith.select %44, %42, %45 : vector<8x64xi1>, vector<8x64xf32>
    %47 = vector.extract_strided_slice %22 {offsets = [0, 1], sizes = [8, 63], strides = [1, 1]} : vector<8x64xf32> to vector<8x63xf32>
    %cst_12 = arith.constant 0.000000e+00 : f32
    %48 = vector.broadcast %cst_12 : f32 to vector<8x1xf32>
    %49 = tpu.concatenate %47, %48 in 1 : vector<8x63xf32>, vector<8x1xf32> -> vector<8x64xf32>
    %cst_13 = arith.constant 0.000000e+00 : f32
    %50 = vector.shape_cast %20 : vector<1x64xi1> to vector<1x64xi1>
    %51 = vector.broadcast %50 : vector<1x64xi1> to vector<8x64xi1>
    %52 = vector.broadcast %cst_13 : f32 to vector<8x64xf32>
    %53 = arith.select %51, %49, %52 : vector<8x64xi1>, vector<8x64xf32>
    %54 = vector.extract_strided_slice %22 {offsets = [0, 7], sizes = [8, 57], strides = [1, 1]} : vector<8x64xf32> to vector<8x57xf32>
    %cst_14 = arith.constant 0.000000e+00 : f32
    %55 = vector.broadcast %cst_14 : f32 to vector<8x7xf32>
    %56 = tpu.concatenate %54, %55 in 1 : vector<8x57xf32>, vector<8x7xf32> -> vector<8x64xf32>
    %cst_15 = arith.constant 0.000000e+00 : f32
    %57 = vector.shape_cast %18 : vector<1x64xi1> to vector<1x64xi1>
    %58 = vector.broadcast %57 : vector<1x64xi1> to vector<8x64xi1>
    %59 = vector.broadcast %cst_15 : f32 to vector<8x64xf32>
    %60 = arith.select %58, %56, %59 : vector<8x64xi1>, vector<8x64xf32>
    %61 = vector.extract_strided_slice %22 {offsets = [0, 8], sizes = [8, 56], strides = [1, 1]} : vector<8x64xf32> to vector<8x56xf32>
    %cst_16 = arith.constant 0.000000e+00 : f32
    %62 = vector.broadcast %cst_16 : f32 to vector<8x8xf32>
    %63 = tpu.concatenate %61, %62 in 1 : vector<8x56xf32>, vector<8x8xf32> -> vector<8x64xf32>
    %64 = vector.extract_strided_slice %22 {offsets = [0, 9], sizes = [8, 55], strides = [1, 1]} : vector<8x64xf32> to vector<8x55xf32>
    %cst_17 = arith.constant 0.000000e+00 : f32
    %65 = vector.broadcast %cst_17 : f32 to vector<8x9xf32>
    %66 = tpu.concatenate %64, %65 in 1 : vector<8x55xf32>, vector<8x9xf32> -> vector<8x64xf32>
    %cst_18 = arith.constant 0.000000e+00 : f32
    %67 = vector.shape_cast %20 : vector<1x64xi1> to vector<1x64xi1>
    %68 = vector.broadcast %67 : vector<1x64xi1> to vector<8x64xi1>
    %69 = vector.broadcast %cst_18 : f32 to vector<8x64xf32>
    %70 = arith.select %68, %66, %69 : vector<8x64xi1>, vector<8x64xf32>
    %71 = tpu.concatenate %29, %32, %39, %46, %22, %53, %60, %63, %70 in 0 : vector<8x64xf32>, vector<8x64xf32>, vector<8x64xf32>, vector<8x64xf32>, vector<8x64xf32>, vector<8x64xf32>, vector<8x64xf32>, vector<8x64xf32>, vector<8x64xf32> -> vector<72x64xf32>
    %c0_19 = arith.constant 0 : index
    %c0_20 = arith.constant 0 : index
    %72 = vector.load %arg2[%c0_19, %c0_20] : memref<16x72xf32, #tpu.memory_space<vmem>>, vector<16x72xf32>
    %cst_21 = arith.constant dense<0.000000e+00> : vector<16x64xf32>
    %73 = tpu.matmul %72, %71, %cst_21 {dimension_numbers = #tpu.dot_dimension_numbers<[1], [0], [0], [1], [0, 0, 1, 1], [], []>} : vector<16x72xf32>, vector<72x64xf32>, vector<16x64xf32> -> vector<16x64xf32>
    %c0_22 = arith.constant 0 : index
    %c0_23 = arith.constant 0 : index
    %74 = vector.load %arg3[%c0_22, %c0_23] : memref<16x1xf32, #tpu.memory_space<vmem>>, vector<16x1xf32>
    %75 = vector.broadcast %74 : vector<16x1xf32> to vector<16x64xf32>
    %76 = arith.addf %73, %75 : vector<16x64xf32>
    %c0_24 = arith.constant 0 : index
    %c0_25 = arith.constant 0 : index
    %c0_26 = arith.constant 0 : index
    %77 = vector.load %arg4[%c0_24, %c0_25, %c0_26] : memref<1x16x64xf32, #tpu.memory_space<vmem>>, vector<1x16x64xf32>
    %78 = vector.shape_cast %77 : vector<1x16x64xf32> to vector<16x64xf32>
    %79 = vector.shape_cast %76 : vector<16x64xf32> to vector<1x16x64xf32>
    tpu.vector_store %arg4[%c0_24, %c0_25, %c0_26], %79 {strides = array<i32>} : memref<1x16x64xf32, #tpu.memory_space<vmem>>, vector<1x16x64xf32>,
    return
  }
  func.func @transform_0(%arg0: i32) -> (i32, i32, i32) {
    %c0_i32 = arith.constant 0 : i32
    %c0_i32_0 = arith.constant 0 : i32
    %c0_i32_1 = arith.constant 0 : i32
    return %arg0, %c0_i32, %c0_i32_0 : i32, i32, i32
  }
  func.func @transform_1(%arg0: i32) -> (i32, i32) {
    %c0_i32 = arith.constant 0 : i32
    %c0_i32_0 = arith.constant 0 : i32
    %c0_i32_1 = arith.constant 0 : i32
    return %c0_i32, %c0_i32_0 : i32, i32
  }
  func.func @transform_2(%arg0: i32) -> (i32, i32) {
    %c0_i32 = arith.constant 0 : i32
    %c0_i32_0 = arith.constant 0 : i32
    %c0_i32_1 = arith.constant 0 : i32
    return %c0_i32, %c0_i32_0 : i32, i32
  }
  func.func @transform_3(%arg0: i32) -> (i32, i32, i32) {
    %c0_i32 = arith.constant 0 : i32
    %c0_i32_0 = arith.constant 0 : i32
    %c0_i32_1 = arith.constant 0 : i32
    return %arg0, %c0_i32, %c0_i32_0 : i32, i32, i32
  }
}

module attributes {stable_mosaic.version = 11 : i64} {
  func.func @_fused_dc_rdb_kernel(%arg0: i32, %arg1: memref<1x4x256xf32, #tpu.memory_space<vmem>>, %arg2: memref<1x4x256xf32, #tpu.memory_space<vmem>>, %arg3: memref<4x72xf32, #tpu.memory_space<vmem>>, %arg4: memref<4x36xf32, #tpu.memory_space<vmem>>, %arg5: memref<4x36xf32, #tpu.memory_space<vmem>>, %arg6: memref<4x1xf32, #tpu.memory_space<vmem>>, %arg7: memref<4x72xf32, #tpu.memory_space<vmem>>, %arg8: memref<4x1xf32, #tpu.memory_space<vmem>>, %arg9: memref<4x108xf32, #tpu.memory_space<vmem>>, %arg10: memref<4x1xf32, #tpu.memory_space<vmem>>, %arg11: memref<4x144xf32, #tpu.memory_space<vmem>>, %arg12: memref<4x1xf32, #tpu.memory_space<vmem>>, %arg13: memref<4x180xf32, #tpu.memory_space<vmem>>, %arg14: memref<4x1xf32, #tpu.memory_space<vmem>>, %arg15: memref<1x4x256xf32, #tpu.memory_space<vmem>>) attributes {dimension_semantics = [#tpu.dimension_semantics<parallel>], iteration_bounds = array<i64: 2>, scalar_prefetch = 0 : i64, scratch_operands = 0 : i64, tpu.core_type = #tpu.core_type<tc>, window_params = [{transform_indices = @transform_0, window_bounds = array<i64: 1, 4, 256>}, {transform_indices = @transform_1, window_bounds = array<i64: 1, 4, 256>}, {pipeline_mode = #tpu.pipeline_mode<synchronous>, transform_indices = @transform_2, window_bounds = array<i64: 4, 72>}, {pipeline_mode = #tpu.pipeline_mode<synchronous>, transform_indices = @transform_3, window_bounds = array<i64: 4, 36>}, {pipeline_mode = #tpu.pipeline_mode<synchronous>, transform_indices = @transform_4, window_bounds = array<i64: 4, 36>}, {pipeline_mode = #tpu.pipeline_mode<synchronous>, transform_indices = @transform_5, window_bounds = array<i64: 4, 1>}, {pipeline_mode = #tpu.pipeline_mode<synchronous>, transform_indices = @transform_6, window_bounds = array<i64: 4, 72>}, {pipeline_mode = #tpu.pipeline_mode<synchronous>, transform_indices = @transform_7, window_bounds = array<i64: 4, 1>}, {pipeline_mode = #tpu.pipeline_mode<synchronous>, transform_indices = @transform_8, window_bounds = array<i64: 4, 108>}, {pipeline_mode = #tpu.pipeline_mode<synchronous>, transform_indices = @transform_9, window_bounds = array<i64: 4, 1>}, {pipeline_mode = #tpu.pipeline_mode<synchronous>, transform_indices = @transform_10, window_bounds = array<i64: 4, 144>}, {pipeline_mode = #tpu.pipeline_mode<synchronous>, transform_indices = @transform_11, window_bounds = array<i64: 4, 1>}, {pipeline_mode = #tpu.pipeline_mode<synchronous>, transform_indices = @transform_12, window_bounds = array<i64: 4, 180>}, {pipeline_mode = #tpu.pipeline_mode<synchronous>, transform_indices = @transform_13, window_bounds = array<i64: 4, 1>}, {transform_indices = @transform_14, window_bounds = array<i64: 1, 4, 256>}]} {
    %0 = tpu.iota {dimensions = array<i32: 1>} : vector<1x256xi32>
    %c16_i32 = arith.constant 16 : i32
    %c0_i32 = arith.constant 0 : i32
    %1 = arith.cmpi eq, %c16_i32, %c0_i32 : i32
    %c1_i32 = arith.constant 1 : i32
    %2 = arith.select %1, %c1_i32, %c16_i32 : i32
    %3 = vector.broadcast %2 : i32 to vector<1x256xi32>
    %4 = arith.remsi %0, %3 : vector<1x256xi32>
    %c0_i32_0 = arith.constant 0 : i32
    %5 = vector.broadcast %c0_i32_0 : i32 to vector<1x256xi32>
    %6 = arith.cmpi ne, %4, %5 : vector<1x256xi32>
    %c0_i32_1 = arith.constant 0 : i32
    %7 = vector.broadcast %c0_i32_1 : i32 to vector<1x256xi32>
    %8 = arith.cmpi slt, %4, %7 : vector<1x256xi32>
    %c0_i32_2 = arith.constant 0 : i32
    %9 = arith.cmpi slt, %2, %c0_i32_2 : i32
    %10 = vector.broadcast %9 : i1 to vector<1x256xi1>
    %11 = vector.broadcast %10 : vector<1x256xi1> to vector<1x256xi1>
    %12 = arith.xori %8, %11 : vector<1x256xi1>
    %13 = arith.andi %12, %6 : vector<1x256xi1>
    %14 = vector.broadcast %2 : i32 to vector<1x256xi32>
    %15 = arith.addi %4, %14 : vector<1x256xi32>
    %16 = arith.select %13, %15, %4 : vector<1x256xi1>, vector<1x256xi32>
    %c0_i32_3 = arith.constant 0 : i32
    %17 = vector.broadcast %c0_i32_3 : i32 to vector<1x256xi32>
    %18 = arith.cmpi sgt, %16, %17 : vector<1x256xi32>
    %c15_i32 = arith.constant 15 : i32
    %19 = vector.broadcast %c15_i32 : i32 to vector<1x256xi32>
    %20 = arith.cmpi slt, %16, %19 : vector<1x256xi32>
    %c0 = arith.constant 0 : index
    %c0_4 = arith.constant 0 : index
    %c0_5 = arith.constant 0 : index
    %21 = vector.load %arg1[%c0, %c0_4, %c0_5] : memref<1x4x256xf32, #tpu.memory_space<vmem>>, vector<1x4x256xf32>
    %22 = vector.shape_cast %21 : vector<1x4x256xf32> to vector<4x256xf32>
    %c0_6 = arith.constant 0 : index
    %c0_7 = arith.constant 0 : index
    %c0_8 = arith.constant 0 : index
    %23 = vector.load %arg2[%c0_6, %c0_7, %c0_8] : memref<1x4x256xf32, #tpu.memory_space<vmem>>, vector<1x4x256xf32>
    %24 = vector.shape_cast %23 : vector<1x4x256xf32> to vector<4x256xf32>
    %cst = arith.constant 0.000000e+00 : f32
    %25 = vector.broadcast %cst : f32 to vector<4x17xf32>
    %26 = vector.extract_strided_slice %22 {offsets = [0, 0], sizes = [4, 239], strides = [1, 1]} : vector<4x256xf32> to vector<4x239xf32>
    %27 = tpu.concatenate %25, %26 in 1 : vector<4x17xf32>, vector<4x239xf32> -> vector<4x256xf32>
    %cst_9 = arith.constant 0.000000e+00 : f32
    %28 = vector.shape_cast %18 : vector<1x256xi1> to vector<1x256xi1>
    %29 = vector.broadcast %28 : vector<1x256xi1> to vector<4x256xi1>
    %30 = vector.broadcast %cst_9 : f32 to vector<4x256xf32>
    %31 = arith.select %29, %27, %30 : vector<4x256xi1>, vector<4x256xf32>
    %cst_10 = arith.constant 0.000000e+00 : f32
    %32 = vector.broadcast %cst_10 : f32 to vector<4x16xf32>
    %33 = vector.extract_strided_slice %22 {offsets = [0, 0], sizes = [4, 240], strides = [1, 1]} : vector<4x256xf32> to vector<4x240xf32>
    %34 = tpu.concatenate %32, %33 in 1 : vector<4x16xf32>, vector<4x240xf32> -> vector<4x256xf32>
    %cst_11 = arith.constant 0.000000e+00 : f32
    %35 = vector.broadcast %cst_11 : f32 to vector<4x15xf32>
    %36 = vector.extract_strided_slice %22 {offsets = [0, 0], sizes = [4, 241], strides = [1, 1]} : vector<4x256xf32> to vector<4x241xf32>
    %37 = tpu.concatenate %35, %36 in 1 : vector<4x15xf32>, vector<4x241xf32> -> vector<4x256xf32>
    %cst_12 = arith.constant 0.000000e+00 : f32
    %38 = vector.shape_cast %20 : vector<1x256xi1> to vector<1x256xi1>
    %39 = vector.broadcast %38 : vector<1x256xi1> to vector<4x256xi1>
    %40 = vector.broadcast %cst_12 : f32 to vector<4x256xf32>
    %41 = arith.select %39, %37, %40 : vector<4x256xi1>, vector<4x256xf32>
    %cst_13 = arith.constant 0.000000e+00 : f32
    %42 = vector.broadcast %cst_13 : f32 to vector<4x1xf32>
    %43 = vector.extract_strided_slice %22 {offsets = [0, 0], sizes = [4, 255], strides = [1, 1]} : vector<4x256xf32> to vector<4x255xf32>
    %44 = tpu.concatenate %42, %43 in 1 : vector<4x1xf32>, vector<4x255xf32> -> vector<4x256xf32>
    %cst_14 = arith.constant 0.000000e+00 : f32
    %45 = vector.shape_cast %18 : vector<1x256xi1> to vector<1x256xi1>
    %46 = vector.broadcast %45 : vector<1x256xi1> to vector<4x256xi1>
    %47 = vector.broadcast %cst_14 : f32 to vector<4x256xf32>
    %48 = arith.select %46, %44, %47 : vector<4x256xi1>, vector<4x256xf32>
    %49 = vector.extract_strided_slice %22 {offsets = [0, 1], sizes = [4, 255], strides = [1, 1]} : vector<4x256xf32> to vector<4x255xf32>
    %cst_15 = arith.constant 0.000000e+00 : f32
    %50 = vector.broadcast %cst_15 : f32 to vector<4x1xf32>
    %51 = tpu.concatenate %49, %50 in 1 : vector<4x255xf32>, vector<4x1xf32> -> vector<4x256xf32>
    %cst_16 = arith.constant 0.000000e+00 : f32
    %52 = vector.shape_cast %20 : vector<1x256xi1> to vector<1x256xi1>
    %53 = vector.broadcast %52 : vector<1x256xi1> to vector<4x256xi1>
    %54 = vector.broadcast %cst_16 : f32 to vector<4x256xf32>
    %55 = arith.select %53, %51, %54 : vector<4x256xi1>, vector<4x256xf32>
    %56 = vector.extract_strided_slice %22 {offsets = [0, 15], sizes = [4, 241], strides = [1, 1]} : vector<4x256xf32> to vector<4x241xf32>
    %cst_17 = arith.constant 0.000000e+00 : f32
    %57 = vector.broadcast %cst_17 : f32 to vector<4x15xf32>
    %58 = tpu.concatenate %56, %57 in 1 : vector<4x241xf32>, vector<4x15xf32> -> vector<4x256xf32>
    %cst_18 = arith.constant 0.000000e+00 : f32
    %59 = vector.shape_cast %18 : vector<1x256xi1> to vector<1x256xi1>
    %60 = vector.broadcast %59 : vector<1x256xi1> to vector<4x256xi1>
    %61 = vector.broadcast %cst_18 : f32 to vector<4x256xf32>
    %62 = arith.select %60, %58, %61 : vector<4x256xi1>, vector<4x256xf32>
    %63 = vector.extract_strided_slice %22 {offsets = [0, 16], sizes = [4, 240], strides = [1, 1]} : vector<4x256xf32> to vector<4x240xf32>
    %cst_19 = arith.constant 0.000000e+00 : f32
    %64 = vector.broadcast %cst_19 : f32 to vector<4x16xf32>
    %65 = tpu.concatenate %63, %64 in 1 : vector<4x240xf32>, vector<4x16xf32> -> vector<4x256xf32>
    %66 = vector.extract_strided_slice %22 {offsets = [0, 17], sizes = [4, 239], strides = [1, 1]} : vector<4x256xf32> to vector<4x239xf32>
    %cst_20 = arith.constant 0.000000e+00 : f32
    %67 = vector.broadcast %cst_20 : f32 to vector<4x17xf32>
    %68 = tpu.concatenate %66, %67 in 1 : vector<4x239xf32>, vector<4x17xf32> -> vector<4x256xf32>
    %cst_21 = arith.constant 0.000000e+00 : f32
    %69 = vector.shape_cast %20 : vector<1x256xi1> to vector<1x256xi1>
    %70 = vector.broadcast %69 : vector<1x256xi1> to vector<4x256xi1>
    %71 = vector.broadcast %cst_21 : f32 to vector<4x256xf32>
    %72 = arith.select %70, %68, %71 : vector<4x256xi1>, vector<4x256xf32>
    %cst_22 = arith.constant 0.000000e+00 : f32
    %73 = vector.broadcast %cst_22 : f32 to vector<4x17xf32>
    %74 = vector.extract_strided_slice %24 {offsets = [0, 0], sizes = [4, 239], strides = [1, 1]} : vector<4x256xf32> to vector<4x239xf32>
    %75 = tpu.concatenate %73, %74 in 1 : vector<4x17xf32>, vector<4x239xf32> -> vector<4x256xf32>
    %cst_23 = arith.constant 0.000000e+00 : f32
    %76 = vector.shape_cast %18 : vector<1x256xi1> to vector<1x256xi1>
    %77 = vector.broadcast %76 : vector<1x256xi1> to vector<4x256xi1>
    %78 = vector.broadcast %cst_23 : f32 to vector<4x256xf32>
    %79 = arith.select %77, %75, %78 : vector<4x256xi1>, vector<4x256xf32>
    %cst_24 = arith.constant 0.000000e+00 : f32
    %80 = vector.broadcast %cst_24 : f32 to vector<4x16xf32>
    %81 = vector.extract_strided_slice %24 {offsets = [0, 0], sizes = [4, 240], strides = [1, 1]} : vector<4x256xf32> to vector<4x240xf32>
    %82 = tpu.concatenate %80, %81 in 1 : vector<4x16xf32>, vector<4x240xf32> -> vector<4x256xf32>
    %cst_25 = arith.constant 0.000000e+00 : f32
    %83 = vector.broadcast %cst_25 : f32 to vector<4x15xf32>
    %84 = vector.extract_strided_slice %24 {offsets = [0, 0], sizes = [4, 241], strides = [1, 1]} : vector<4x256xf32> to vector<4x241xf32>
    %85 = tpu.concatenate %83, %84 in 1 : vector<4x15xf32>, vector<4x241xf32> -> vector<4x256xf32>
    %cst_26 = arith.constant 0.000000e+00 : f32
    %86 = vector.shape_cast %20 : vector<1x256xi1> to vector<1x256xi1>
    %87 = vector.broadcast %86 : vector<1x256xi1> to vector<4x256xi1>
    %88 = vector.broadcast %cst_26 : f32 to vector<4x256xf32>
    %89 = arith.select %87, %85, %88 : vector<4x256xi1>, vector<4x256xf32>
    %cst_27 = arith.constant 0.000000e+00 : f32
    %90 = vector.broadcast %cst_27 : f32 to vector<4x1xf32>
    %91 = vector.extract_strided_slice %24 {offsets = [0, 0], sizes = [4, 255], strides = [1, 1]} : vector<4x256xf32> to vector<4x255xf32>
    %92 = tpu.concatenate %90, %91 in 1 : vector<4x1xf32>, vector<4x255xf32> -> vector<4x256xf32>
    %cst_28 = arith.constant 0.000000e+00 : f32
    %93 = vector.shape_cast %18 : vector<1x256xi1> to vector<1x256xi1>
    %94 = vector.broadcast %93 : vector<1x256xi1> to vector<4x256xi1>
    %95 = vector.broadcast %cst_28 : f32 to vector<4x256xf32>
    %96 = arith.select %94, %92, %95 : vector<4x256xi1>, vector<4x256xf32>
    %97 = vector.extract_strided_slice %24 {offsets = [0, 1], sizes = [4, 255], strides = [1, 1]} : vector<4x256xf32> to vector<4x255xf32>
    %cst_29 = arith.constant 0.000000e+00 : f32
    %98 = vector.broadcast %cst_29 : f32 to vector<4x1xf32>
    %99 = tpu.concatenate %97, %98 in 1 : vector<4x255xf32>, vector<4x1xf32> -> vector<4x256xf32>
    %cst_30 = arith.constant 0.000000e+00 : f32
    %100 = vector.shape_cast %20 : vector<1x256xi1> to vector<1x256xi1>
    %101 = vector.broadcast %100 : vector<1x256xi1> to vector<4x256xi1>
    %102 = vector.broadcast %cst_30 : f32 to vector<4x256xf32>
    %103 = arith.select %101, %99, %102 : vector<4x256xi1>, vector<4x256xf32>
    %104 = vector.extract_strided_slice %24 {offsets = [0, 15], sizes = [4, 241], strides = [1, 1]} : vector<4x256xf32> to vector<4x241xf32>
    %cst_31 = arith.constant 0.000000e+00 : f32
    %105 = vector.broadcast %cst_31 : f32 to vector<4x15xf32>
    %106 = tpu.concatenate %104, %105 in 1 : vector<4x241xf32>, vector<4x15xf32> -> vector<4x256xf32>
    %cst_32 = arith.constant 0.000000e+00 : f32
    %107 = vector.shape_cast %18 : vector<1x256xi1> to vector<1x256xi1>
    %108 = vector.broadcast %107 : vector<1x256xi1> to vector<4x256xi1>
    %109 = vector.broadcast %cst_32 : f32 to vector<4x256xf32>
    %110 = arith.select %108, %106, %109 : vector<4x256xi1>, vector<4x256xf32>
    %111 = vector.extract_strided_slice %24 {offsets = [0, 16], sizes = [4, 240], strides = [1, 1]} : vector<4x256xf32> to vector<4x240xf32>
    %cst_33 = arith.constant 0.000000e+00 : f32
    %112 = vector.broadcast %cst_33 : f32 to vector<4x16xf32>
    %113 = tpu.concatenate %111, %112 in 1 : vector<4x240xf32>, vector<4x16xf32> -> vector<4x256xf32>
    %114 = vector.extract_strided_slice %24 {offsets = [0, 17], sizes = [4, 239], strides = [1, 1]} : vector<4x256xf32> to vector<4x239xf32>
    %cst_34 = arith.constant 0.000000e+00 : f32
    %115 = vector.broadcast %cst_34 : f32 to vector<4x17xf32>
    %116 = tpu.concatenate %114, %115 in 1 : vector<4x239xf32>, vector<4x17xf32> -> vector<4x256xf32>
    %cst_35 = arith.constant 0.000000e+00 : f32
    %117 = vector.shape_cast %20 : vector<1x256xi1> to vector<1x256xi1>
    %118 = vector.broadcast %117 : vector<1x256xi1> to vector<4x256xi1>
    %119 = vector.broadcast %cst_35 : f32 to vector<4x256xf32>
    %120 = arith.select %118, %116, %119 : vector<4x256xi1>, vector<4x256xf32>
    %121 = tpu.concatenate %31, %79, %34, %82, %41, %89, %48, %96, %22, %24, %55, %103, %62, %110, %65, %113 in 0 : vector<4x256xf32>, vector<4x256xf32>, vector<4x256xf32>, vector<4x256xf32>, vector<4x256xf32>, vector<4x256xf32>, vector<4x256xf32>, vector<4x256xf32>, vector<4x256xf32>, vector<4x256xf32>, vector<4x256xf32>, vector<4x256xf32>, vector<4x256xf32>, vector<4x256xf32>, vector<4x256xf32>, vector<4x256xf32> -> vector<64x256xf32>
    %122 = tpu.concatenate %72, %120 in 0 : vector<4x256xf32>, vector<4x256xf32> -> vector<8x256xf32>
    %123 = tpu.concatenate %121, %122 in 0 : vector<64x256xf32>, vector<8x256xf32> -> vector<72x256xf32>
    %c0_36 = arith.constant 0 : index
    %c0_37 = arith.constant 0 : index
    %124 = vector.load %arg3[%c0_36, %c0_37] : memref<4x72xf32, #tpu.memory_space<vmem>>, vector<4x72xf32>
    %cst_38 = arith.constant dense<0.000000e+00> : vector<4x256xf32>
    %125 = tpu.matmul %124, %123, %cst_38 {dimension_numbers = #tpu.dot_dimension_numbers<[1], [0], [0], [1], [0, 0, 1, 1], [], []>} : vector<4x72xf32>, vector<72x256xf32>, vector<4x256xf32> -> vector<4x256xf32>
    %cst_39 = arith.constant 0.000000e+00 : f32
    %126 = vector.broadcast %cst_39 : f32 to vector<4x256xf32>
    %127 = arith.cmpf oge, %125, %126 : vector<4x256xf32>
    %cst_40 = arith.constant 1.000000e-01 : f32
    %128 = vector.broadcast %cst_40 : f32 to vector<4x256xf32>
    %129 = arith.mulf %125, %128 : vector<4x256xf32>
    %130 = arith.select %127, %125, %129 : vector<4x256xi1>, vector<4x256xf32>
    %cst_41 = arith.constant 0.000000e+00 : f32
    %131 = vector.broadcast %cst_41 : f32 to vector<4x17xf32>
    %132 = vector.extract_strided_slice %130 {offsets = [0, 0], sizes = [4, 239], strides = [1, 1]} : vector<4x256xf32> to vector<4x239xf32>
    %133 = tpu.concatenate %131, %132 in 1 : vector<4x17xf32>, vector<4x239xf32> -> vector<4x256xf32>
    %cst_42 = arith.constant 0.000000e+00 : f32
    %134 = vector.shape_cast %18 : vector<1x256xi1> to vector<1x256xi1>
    %135 = vector.broadcast %134 : vector<1x256xi1> to vector<4x256xi1>
    %136 = vector.broadcast %cst_42 : f32 to vector<4x256xf32>
    %137 = arith.select %135, %133, %136 : vector<4x256xi1>, vector<4x256xf32>
    %cst_43 = arith.constant 0.000000e+00 : f32
    %138 = vector.broadcast %cst_43 : f32 to vector<4x16xf32>
    %139 = vector.extract_strided_slice %130 {offsets = [0, 0], sizes = [4, 240], strides = [1, 1]} : vector<4x256xf32> to vector<4x240xf32>
    %140 = tpu.concatenate %138, %139 in 1 : vector<4x16xf32>, vector<4x240xf32> -> vector<4x256xf32>
    %cst_44 = arith.constant 0.000000e+00 : f32
    %141 = vector.broadcast %cst_44 : f32 to vector<4x15xf32>
    %142 = vector.extract_strided_slice %130 {offsets = [0, 0], sizes = [4, 241], strides = [1, 1]} : vector<4x256xf32> to vector<4x241xf32>
    %143 = tpu.concatenate %141, %142 in 1 : vector<4x15xf32>, vector<4x241xf32> -> vector<4x256xf32>
    %cst_45 = arith.constant 0.000000e+00 : f32
    %144 = vector.shape_cast %20 : vector<1x256xi1> to vector<1x256xi1>
    %145 = vector.broadcast %144 : vector<1x256xi1> to vector<4x256xi1>
    %146 = vector.broadcast %cst_45 : f32 to vector<4x256xf32>
    %147 = arith.select %145, %143, %146 : vector<4x256xi1>, vector<4x256xf32>
    %cst_46 = arith.constant 0.000000e+00 : f32
    %148 = vector.broadcast %cst_46 : f32 to vector<4x1xf32>
    %149 = vector.extract_strided_slice %130 {offsets = [0, 0], sizes = [4, 255], strides = [1, 1]} : vector<4x256xf32> to vector<4x255xf32>
    %150 = tpu.concatenate %148, %149 in 1 : vector<4x1xf32>, vector<4x255xf32> -> vector<4x256xf32>
    %cst_47 = arith.constant 0.000000e+00 : f32
    %151 = vector.shape_cast %18 : vector<1x256xi1> to vector<1x256xi1>
    %152 = vector.broadcast %151 : vector<1x256xi1> to vector<4x256xi1>
    %153 = vector.broadcast %cst_47 : f32 to vector<4x256xf32>
    %154 = arith.select %152, %150, %153 : vector<4x256xi1>, vector<4x256xf32>
    %155 = vector.extract_strided_slice %130 {offsets = [0, 1], sizes = [4, 255], strides = [1, 1]} : vector<4x256xf32> to vector<4x255xf32>
    %cst_48 = arith.constant 0.000000e+00 : f32
    %156 = vector.broadcast %cst_48 : f32 to vector<4x1xf32>
    %157 = tpu.concatenate %155, %156 in 1 : vector<4x255xf32>, vector<4x1xf32> -> vector<4x256xf32>
    %cst_49 = arith.constant 0.000000e+00 : f32
    %158 = vector.shape_cast %20 : vector<1x256xi1> to vector<1x256xi1>
    %159 = vector.broadcast %158 : vector<1x256xi1> to vector<4x256xi1>
    %160 = vector.broadcast %cst_49 : f32 to vector<4x256xf32>
    %161 = arith.select %159, %157, %160 : vector<4x256xi1>, vector<4x256xf32>
    %162 = vector.extract_strided_slice %130 {offsets = [0, 15], sizes = [4, 241], strides = [1, 1]} : vector<4x256xf32> to vector<4x241xf32>
    %cst_50 = arith.constant 0.000000e+00 : f32
    %163 = vector.broadcast %cst_50 : f32 to vector<4x15xf32>
    %164 = tpu.concatenate %162, %163 in 1 : vector<4x241xf32>, vector<4x15xf32> -> vector<4x256xf32>
    %cst_51 = arith.constant 0.000000e+00 : f32
    %165 = vector.shape_cast %18 : vector<1x256xi1> to vector<1x256xi1>
    %166 = vector.broadcast %165 : vector<1x256xi1> to vector<4x256xi1>
    %167 = vector.broadcast %cst_51 : f32 to vector<4x256xf32>
    %168 = arith.select %166, %164, %167 : vector<4x256xi1>, vector<4x256xf32>
    %169 = vector.extract_strided_slice %130 {offsets = [0, 16], sizes = [4, 240], strides = [1, 1]} : vector<4x256xf32> to vector<4x240xf32>
    %cst_52 = arith.constant 0.000000e+00 : f32
    %170 = vector.broadcast %cst_52 : f32 to vector<4x16xf32>
    %171 = tpu.concatenate %169, %170 in 1 : vector<4x240xf32>, vector<4x16xf32> -> vector<4x256xf32>
    %172 = vector.extract_strided_slice %130 {offsets = [0, 17], sizes = [4, 239], strides = [1, 1]} : vector<4x256xf32> to vector<4x239xf32>
    %cst_53 = arith.constant 0.000000e+00 : f32
    %173 = vector.broadcast %cst_53 : f32 to vector<4x17xf32>
    %174 = tpu.concatenate %172, %173 in 1 : vector<4x239xf32>, vector<4x17xf32> -> vector<4x256xf32>
    %cst_54 = arith.constant 0.000000e+00 : f32
    %175 = vector.shape_cast %20 : vector<1x256xi1> to vector<1x256xi1>
    %176 = vector.broadcast %175 : vector<1x256xi1> to vector<4x256xi1>
    %177 = vector.broadcast %cst_54 : f32 to vector<4x256xf32>
    %178 = arith.select %176, %174, %177 : vector<4x256xi1>, vector<4x256xf32>
    %179 = tpu.concatenate %137, %140, %147, %154, %130, %161, %168, %171, %178 in 0 : vector<4x256xf32>, vector<4x256xf32>, vector<4x256xf32>, vector<4x256xf32>, vector<4x256xf32>, vector<4x256xf32>, vector<4x256xf32>, vector<4x256xf32>, vector<4x256xf32> -> vector<36x256xf32>
    %c0_55 = arith.constant 0 : index
    %c0_56 = arith.constant 0 : index
    %180 = vector.load %arg4[%c0_55, %c0_56] : memref<4x36xf32, #tpu.memory_space<vmem>>, vector<4x36xf32>
    %cst_57 = arith.constant dense<0.000000e+00> : vector<4x256xf32>
    %181 = tpu.matmul %180, %179, %cst_57 {dimension_numbers = #tpu.dot_dimension_numbers<[1], [0], [0], [1], [0, 0, 1, 1], [], []>} : vector<4x36xf32>, vector<36x256xf32>, vector<4x256xf32> -> vector<4x256xf32>
    %cst_58 = arith.constant 0.000000e+00 : f32
    %182 = vector.broadcast %cst_58 : f32 to vector<4x256xf32>
    %183 = arith.cmpf oge, %181, %182 : vector<4x256xf32>
    %cst_59 = arith.constant 1.000000e-01 : f32
    %184 = vector.broadcast %cst_59 : f32 to vector<4x256xf32>
    %185 = arith.mulf %181, %184 : vector<4x256xf32>
    %186 = arith.select %183, %181, %185 : vector<4x256xi1>, vector<4x256xf32>
    %cst_60 = arith.constant 0.000000e+00 : f32
    %187 = vector.broadcast %cst_60 : f32 to vector<4x17xf32>
    %188 = vector.extract_strided_slice %186 {offsets = [0, 0], sizes = [4, 239], strides = [1, 1]} : vector<4x256xf32> to vector<4x239xf32>
    %189 = tpu.concatenate %187, %188 in 1 : vector<4x17xf32>, vector<4x239xf32> -> vector<4x256xf32>
    %cst_61 = arith.constant 0.000000e+00 : f32
    %190 = vector.shape_cast %18 : vector<1x256xi1> to vector<1x256xi1>
    %191 = vector.broadcast %190 : vector<1x256xi1> to vector<4x256xi1>
    %192 = vector.broadcast %cst_61 : f32 to vector<4x256xf32>
    %193 = arith.select %191, %189, %192 : vector<4x256xi1>, vector<4x256xf32>
    %cst_62 = arith.constant 0.000000e+00 : f32
    %194 = vector.broadcast %cst_62 : f32 to vector<4x16xf32>
    %195 = vector.extract_strided_slice %186 {offsets = [0, 0], sizes = [4, 240], strides = [1, 1]} : vector<4x256xf32> to vector<4x240xf32>
    %196 = tpu.concatenate %194, %195 in 1 : vector<4x16xf32>, vector<4x240xf32> -> vector<4x256xf32>
    %cst_63 = arith.constant 0.000000e+00 : f32
    %197 = vector.broadcast %cst_63 : f32 to vector<4x15xf32>
    %198 = vector.extract_strided_slice %186 {offsets = [0, 0], sizes = [4, 241], strides = [1, 1]} : vector<4x256xf32> to vector<4x241xf32>
    %199 = tpu.concatenate %197, %198 in 1 : vector<4x15xf32>, vector<4x241xf32> -> vector<4x256xf32>
    %cst_64 = arith.constant 0.000000e+00 : f32
    %200 = vector.shape_cast %20 : vector<1x256xi1> to vector<1x256xi1>
    %201 = vector.broadcast %200 : vector<1x256xi1> to vector<4x256xi1>
    %202 = vector.broadcast %cst_64 : f32 to vector<4x256xf32>
    %203 = arith.select %201, %199, %202 : vector<4x256xi1>, vector<4x256xf32>
    %cst_65 = arith.constant 0.000000e+00 : f32
    %204 = vector.broadcast %cst_65 : f32 to vector<4x1xf32>
    %205 = vector.extract_strided_slice %186 {offsets = [0, 0], sizes = [4, 255], strides = [1, 1]} : vector<4x256xf32> to vector<4x255xf32>
    %206 = tpu.concatenate %204, %205 in 1 : vector<4x1xf32>, vector<4x255xf32> -> vector<4x256xf32>
    %cst_66 = arith.constant 0.000000e+00 : f32
    %207 = vector.shape_cast %18 : vector<1x256xi1> to vector<1x256xi1>
    %208 = vector.broadcast %207 : vector<1x256xi1> to vector<4x256xi1>
    %209 = vector.broadcast %cst_66 : f32 to vector<4x256xf32>
    %210 = arith.select %208, %206, %209 : vector<4x256xi1>, vector<4x256xf32>
    %211 = vector.extract_strided_slice %186 {offsets = [0, 1], sizes = [4, 255], strides = [1, 1]} : vector<4x256xf32> to vector<4x255xf32>
    %cst_67 = arith.constant 0.000000e+00 : f32
    %212 = vector.broadcast %cst_67 : f32 to vector<4x1xf32>
    %213 = tpu.concatenate %211, %212 in 1 : vector<4x255xf32>, vector<4x1xf32> -> vector<4x256xf32>
    %cst_68 = arith.constant 0.000000e+00 : f32
    %214 = vector.shape_cast %20 : vector<1x256xi1> to vector<1x256xi1>
    %215 = vector.broadcast %214 : vector<1x256xi1> to vector<4x256xi1>
    %216 = vector.broadcast %cst_68 : f32 to vector<4x256xf32>
    %217 = arith.select %215, %213, %216 : vector<4x256xi1>, vector<4x256xf32>
    %218 = vector.extract_strided_slice %186 {offsets = [0, 15], sizes = [4, 241], strides = [1, 1]} : vector<4x256xf32> to vector<4x241xf32>
    %cst_69 = arith.constant 0.000000e+00 : f32
    %219 = vector.broadcast %cst_69 : f32 to vector<4x15xf32>
    %220 = tpu.concatenate %218, %219 in 1 : vector<4x241xf32>, vector<4x15xf32> -> vector<4x256xf32>
    %cst_70 = arith.constant 0.000000e+00 : f32
    %221 = vector.shape_cast %18 : vector<1x256xi1> to vector<1x256xi1>
    %222 = vector.broadcast %221 : vector<1x256xi1> to vector<4x256xi1>
    %223 = vector.broadcast %cst_70 : f32 to vector<4x256xf32>
    %224 = arith.select %222, %220, %223 : vector<4x256xi1>, vector<4x256xf32>
    %225 = vector.extract_strided_slice %186 {offsets = [0, 16], sizes = [4, 240], strides = [1, 1]} : vector<4x256xf32> to vector<4x240xf32>
    %cst_71 = arith.constant 0.000000e+00 : f32
    %226 = vector.broadcast %cst_71 : f32 to vector<4x16xf32>
    %227 = tpu.concatenate %225, %226 in 1 : vector<4x240xf32>, vector<4x16xf32> -> vector<4x256xf32>
    %228 = vector.extract_strided_slice %186 {offsets = [0, 17], sizes = [4, 239], strides = [1, 1]} : vector<4x256xf32> to vector<4x239xf32>
    %cst_72 = arith.constant 0.000000e+00 : f32
    %229 = vector.broadcast %cst_72 : f32 to vector<4x17xf32>
    %230 = tpu.concatenate %228, %229 in 1 : vector<4x239xf32>, vector<4x17xf32> -> vector<4x256xf32>
    %cst_73 = arith.constant 0.000000e+00 : f32
    %231 = vector.shape_cast %20 : vector<1x256xi1> to vector<1x256xi1>
    %232 = vector.broadcast %231 : vector<1x256xi1> to vector<4x256xi1>
    %233 = vector.broadcast %cst_73 : f32 to vector<4x256xf32>
    %234 = arith.select %232, %230, %233 : vector<4x256xi1>, vector<4x256xf32>
    %235 = tpu.concatenate %193, %196, %203, %210, %186, %217, %224, %227, %234 in 0 : vector<4x256xf32>, vector<4x256xf32>, vector<4x256xf32>, vector<4x256xf32>, vector<4x256xf32>, vector<4x256xf32>, vector<4x256xf32>, vector<4x256xf32>, vector<4x256xf32> -> vector<36x256xf32>
    %c0_74 = arith.constant 0 : index
    %c0_75 = arith.constant 0 : index
    %236 = vector.load %arg5[%c0_74, %c0_75] : memref<4x36xf32, #tpu.memory_space<vmem>>, vector<4x36xf32>
    %cst_76 = arith.constant dense<0.000000e+00> : vector<4x256xf32>
    %237 = tpu.matmul %236, %235, %cst_76 {dimension_numbers = #tpu.dot_dimension_numbers<[1], [0], [0], [1], [0, 0, 1, 1], [], []>} : vector<4x36xf32>, vector<36x256xf32>, vector<4x256xf32> -> vector<4x256xf32>
    %c0_77 = arith.constant 0 : index
    %c0_78 = arith.constant 0 : index
    %238 = vector.load %arg6[%c0_77, %c0_78] : memref<4x1xf32, #tpu.memory_space<vmem>>, vector<4x1xf32>
    %239 = vector.broadcast %238 : vector<4x1xf32> to vector<4x256xf32>
    %240 = arith.addf %237, %239 : vector<4x256xf32>
    %cst_79 = arith.constant 0.000000e+00 : f32
    %241 = vector.broadcast %cst_79 : f32 to vector<4x256xf32>
    %242 = arith.cmpf oge, %240, %241 : vector<4x256xf32>
    %cst_80 = arith.constant 2.000000e-01 : f32
    %243 = vector.broadcast %cst_80 : f32 to vector<4x256xf32>
    %244 = arith.mulf %240, %243 : vector<4x256xf32>
    %245 = arith.select %242, %240, %244 : vector<4x256xi1>, vector<4x256xf32>
    %cst_81 = arith.constant 0.000000e+00 : f32
    %246 = vector.broadcast %cst_81 : f32 to vector<4x17xf32>
    %247 = vector.extract_strided_slice %245 {offsets = [0, 0], sizes = [4, 239], strides = [1, 1]} : vector<4x256xf32> to vector<4x239xf32>
    %248 = tpu.concatenate %246, %247 in 1 : vector<4x17xf32>, vector<4x239xf32> -> vector<4x256xf32>
    %cst_82 = arith.constant 0.000000e+00 : f32
    %249 = vector.shape_cast %18 : vector<1x256xi1> to vector<1x256xi1>
    %250 = vector.broadcast %249 : vector<1x256xi1> to vector<4x256xi1>
    %251 = vector.broadcast %cst_82 : f32 to vector<4x256xf32>
    %252 = arith.select %250, %248, %251 : vector<4x256xi1>, vector<4x256xf32>
    %cst_83 = arith.constant 0.000000e+00 : f32
    %253 = vector.broadcast %cst_83 : f32 to vector<4x16xf32>
    %254 = vector.extract_strided_slice %245 {offsets = [0, 0], sizes = [4, 240], strides = [1, 1]} : vector<4x256xf32> to vector<4x240xf32>
    %255 = tpu.concatenate %253, %254 in 1 : vector<4x16xf32>, vector<4x240xf32> -> vector<4x256xf32>
    %cst_84 = arith.constant 0.000000e+00 : f32
    %256 = vector.broadcast %cst_84 : f32 to vector<4x15xf32>
    %257 = vector.extract_strided_slice %245 {offsets = [0, 0], sizes = [4, 241], strides = [1, 1]} : vector<4x256xf32> to vector<4x241xf32>
    %258 = tpu.concatenate %256, %257 in 1 : vector<4x15xf32>, vector<4x241xf32> -> vector<4x256xf32>
    %cst_85 = arith.constant 0.000000e+00 : f32
    %259 = vector.shape_cast %20 : vector<1x256xi1> to vector<1x256xi1>
    %260 = vector.broadcast %259 : vector<1x256xi1> to vector<4x256xi1>
    %261 = vector.broadcast %cst_85 : f32 to vector<4x256xf32>
    %262 = arith.select %260, %258, %261 : vector<4x256xi1>, vector<4x256xf32>
    %cst_86 = arith.constant 0.000000e+00 : f32
    %263 = vector.broadcast %cst_86 : f32 to vector<4x1xf32>
    %264 = vector.extract_strided_slice %245 {offsets = [0, 0], sizes = [4, 255], strides = [1, 1]} : vector<4x256xf32> to vector<4x255xf32>
    %265 = tpu.concatenate %263, %264 in 1 : vector<4x1xf32>, vector<4x255xf32> -> vector<4x256xf32>
    %cst_87 = arith.constant 0.000000e+00 : f32
    %266 = vector.shape_cast %18 : vector<1x256xi1> to vector<1x256xi1>
    %267 = vector.broadcast %266 : vector<1x256xi1> to vector<4x256xi1>
    %268 = vector.broadcast %cst_87 : f32 to vector<4x256xf32>
    %269 = arith.select %267, %265, %268 : vector<4x256xi1>, vector<4x256xf32>
    %270 = vector.extract_strided_slice %245 {offsets = [0, 1], sizes = [4, 255], strides = [1, 1]} : vector<4x256xf32> to vector<4x255xf32>
    %cst_88 = arith.constant 0.000000e+00 : f32
    %271 = vector.broadcast %cst_88 : f32 to vector<4x1xf32>
    %272 = tpu.concatenate %270, %271 in 1 : vector<4x255xf32>, vector<4x1xf32> -> vector<4x256xf32>
    %cst_89 = arith.constant 0.000000e+00 : f32
    %273 = vector.shape_cast %20 : vector<1x256xi1> to vector<1x256xi1>
    %274 = vector.broadcast %273 : vector<1x256xi1> to vector<4x256xi1>
    %275 = vector.broadcast %cst_89 : f32 to vector<4x256xf32>
    %276 = arith.select %274, %272, %275 : vector<4x256xi1>, vector<4x256xf32>
    %277 = vector.extract_strided_slice %245 {offsets = [0, 15], sizes = [4, 241], strides = [1, 1]} : vector<4x256xf32> to vector<4x241xf32>
    %cst_90 = arith.constant 0.000000e+00 : f32
    %278 = vector.broadcast %cst_90 : f32 to vector<4x15xf32>
    %279 = tpu.concatenate %277, %278 in 1 : vector<4x241xf32>, vector<4x15xf32> -> vector<4x256xf32>
    %cst_91 = arith.constant 0.000000e+00 : f32
    %280 = vector.shape_cast %18 : vector<1x256xi1> to vector<1x256xi1>
    %281 = vector.broadcast %280 : vector<1x256xi1> to vector<4x256xi1>
    %282 = vector.broadcast %cst_91 : f32 to vector<4x256xf32>
    %283 = arith.select %281, %279, %282 : vector<4x256xi1>, vector<4x256xf32>
    %284 = vector.extract_strided_slice %245 {offsets = [0, 16], sizes = [4, 240], strides = [1, 1]} : vector<4x256xf32> to vector<4x240xf32>
    %cst_92 = arith.constant 0.000000e+00 : f32
    %285 = vector.broadcast %cst_92 : f32 to vector<4x16xf32>
    %286 = tpu.concatenate %284, %285 in 1 : vector<4x240xf32>, vector<4x16xf32> -> vector<4x256xf32>
    %287 = vector.extract_strided_slice %245 {offsets = [0, 17], sizes = [4, 239], strides = [1, 1]} : vector<4x256xf32> to vector<4x239xf32>
    %cst_93 = arith.constant 0.000000e+00 : f32
    %288 = vector.broadcast %cst_93 : f32 to vector<4x17xf32>
    %289 = tpu.concatenate %287, %288 in 1 : vector<4x239xf32>, vector<4x17xf32> -> vector<4x256xf32>
    %cst_94 = arith.constant 0.000000e+00 : f32
    %290 = vector.shape_cast %20 : vector<1x256xi1> to vector<1x256xi1>
    %291 = vector.broadcast %290 : vector<1x256xi1> to vector<4x256xi1>
    %292 = vector.broadcast %cst_94 : f32 to vector<4x256xf32>
    %293 = arith.select %291, %289, %292 : vector<4x256xi1>, vector<4x256xf32>
    %294 = tpu.concatenate %193, %252, %196, %255, %203, %262, %210, %269, %186, %245, %217, %276, %224, %283, %227, %286 in 0 : vector<4x256xf32>, vector<4x256xf32>, vector<4x256xf32>, vector<4x256xf32>, vector<4x256xf32>, vector<4x256xf32>, vector<4x256xf32>, vector<4x256xf32>, vector<4x256xf32>, vector<4x256xf32>, vector<4x256xf32>, vector<4x256xf32>, vector<4x256xf32>, vector<4x256xf32>, vector<4x256xf32>, vector<4x256xf32> -> vector<64x256xf32>
    %295 = tpu.concatenate %234, %293 in 0 : vector<4x256xf32>, vector<4x256xf32> -> vector<8x256xf32>
    %296 = tpu.concatenate %294, %295 in 0 : vector<64x256xf32>, vector<8x256xf32> -> vector<72x256xf32>
    %c0_95 = arith.constant 0 : index
    %c0_96 = arith.constant 0 : index
    %297 = vector.load %arg7[%c0_95, %c0_96] : memref<4x72xf32, #tpu.memory_space<vmem>>, vector<4x72xf32>
    %cst_97 = arith.constant dense<0.000000e+00> : vector<4x256xf32>
    %298 = tpu.matmul %297, %296, %cst_97 {dimension_numbers = #tpu.dot_dimension_numbers<[1], [0], [0], [1], [0, 0, 1, 1], [], []>} : vector<4x72xf32>, vector<72x256xf32>, vector<4x256xf32> -> vector<4x256xf32>
    %c0_98 = arith.constant 0 : index
    %c0_99 = arith.constant 0 : index
    %299 = vector.load %arg8[%c0_98, %c0_99] : memref<4x1xf32, #tpu.memory_space<vmem>>, vector<4x1xf32>
    %300 = vector.broadcast %299 : vector<4x1xf32> to vector<4x256xf32>
    %301 = arith.addf %298, %300 : vector<4x256xf32>
    %cst_100 = arith.constant 0.000000e+00 : f32
    %302 = vector.broadcast %cst_100 : f32 to vector<4x256xf32>
    %303 = arith.cmpf oge, %301, %302 : vector<4x256xf32>
    %cst_101 = arith.constant 2.000000e-01 : f32
    %304 = vector.broadcast %cst_101 : f32 to vector<4x256xf32>
    %305 = arith.mulf %301, %304 : vector<4x256xf32>
    %306 = arith.select %303, %301, %305 : vector<4x256xi1>, vector<4x256xf32>
    %cst_102 = arith.constant 0.000000e+00 : f32
    %307 = vector.broadcast %cst_102 : f32 to vector<4x17xf32>
    %308 = vector.extract_strided_slice %306 {offsets = [0, 0], sizes = [4, 239], strides = [1, 1]} : vector<4x256xf32> to vector<4x239xf32>
    %309 = tpu.concatenate %307, %308 in 1 : vector<4x17xf32>, vector<4x239xf32> -> vector<4x256xf32>
    %cst_103 = arith.constant 0.000000e+00 : f32
    %310 = vector.shape_cast %18 : vector<1x256xi1> to vector<1x256xi1>
    %311 = vector.broadcast %310 : vector<1x256xi1> to vector<4x256xi1>
    %312 = vector.broadcast %cst_103 : f32 to vector<4x256xf32>
    %313 = arith.select %311, %309, %312 : vector<4x256xi1>, vector<4x256xf32>
    %cst_104 = arith.constant 0.000000e+00 : f32
    %314 = vector.broadcast %cst_104 : f32 to vector<4x16xf32>
    %315 = vector.extract_strided_slice %306 {offsets = [0, 0], sizes = [4, 240], strides = [1, 1]} : vector<4x256xf32> to vector<4x240xf32>
    %316 = tpu.concatenate %314, %315 in 1 : vector<4x16xf32>, vector<4x240xf32> -> vector<4x256xf32>
    %cst_105 = arith.constant 0.000000e+00 : f32
    %317 = vector.broadcast %cst_105 : f32 to vector<4x15xf32>
    %318 = vector.extract_strided_slice %306 {offsets = [0, 0], sizes = [4, 241], strides = [1, 1]} : vector<4x256xf32> to vector<4x241xf32>
    %319 = tpu.concatenate %317, %318 in 1 : vector<4x15xf32>, vector<4x241xf32> -> vector<4x256xf32>
    %cst_106 = arith.constant 0.000000e+00 : f32
    %320 = vector.shape_cast %20 : vector<1x256xi1> to vector<1x256xi1>
    %321 = vector.broadcast %320 : vector<1x256xi1> to vector<4x256xi1>
    %322 = vector.broadcast %cst_106 : f32 to vector<4x256xf32>
    %323 = arith.select %321, %319, %322 : vector<4x256xi1>, vector<4x256xf32>
    %cst_107 = arith.constant 0.000000e+00 : f32
    %324 = vector.broadcast %cst_107 : f32 to vector<4x1xf32>
    %325 = vector.extract_strided_slice %306 {offsets = [0, 0], sizes = [4, 255], strides = [1, 1]} : vector<4x256xf32> to vector<4x255xf32>
    %326 = tpu.concatenate %324, %325 in 1 : vector<4x1xf32>, vector<4x255xf32> -> vector<4x256xf32>
    %cst_108 = arith.constant 0.000000e+00 : f32
    %327 = vector.shape_cast %18 : vector<1x256xi1> to vector<1x256xi1>
    %328 = vector.broadcast %327 : vector<1x256xi1> to vector<4x256xi1>
    %329 = vector.broadcast %cst_108 : f32 to vector<4x256xf32>
    %330 = arith.select %328, %326, %329 : vector<4x256xi1>, vector<4x256xf32>
    %331 = vector.extract_strided_slice %306 {offsets = [0, 1], sizes = [4, 255], strides = [1, 1]} : vector<4x256xf32> to vector<4x255xf32>
    %cst_109 = arith.constant 0.000000e+00 : f32
    %332 = vector.broadcast %cst_109 : f32 to vector<4x1xf32>
    %333 = tpu.concatenate %331, %332 in 1 : vector<4x255xf32>, vector<4x1xf32> -> vector<4x256xf32>
    %cst_110 = arith.constant 0.000000e+00 : f32
    %334 = vector.shape_cast %20 : vector<1x256xi1> to vector<1x256xi1>
    %335 = vector.broadcast %334 : vector<1x256xi1> to vector<4x256xi1>
    %336 = vector.broadcast %cst_110 : f32 to vector<4x256xf32>
    %337 = arith.select %335, %333, %336 : vector<4x256xi1>, vector<4x256xf32>
    %338 = vector.extract_strided_slice %306 {offsets = [0, 15], sizes = [4, 241], strides = [1, 1]} : vector<4x256xf32> to vector<4x241xf32>
    %cst_111 = arith.constant 0.000000e+00 : f32
    %339 = vector.broadcast %cst_111 : f32 to vector<4x15xf32>
    %340 = tpu.concatenate %338, %339 in 1 : vector<4x241xf32>, vector<4x15xf32> -> vector<4x256xf32>
    %cst_112 = arith.constant 0.000000e+00 : f32
    %341 = vector.shape_cast %18 : vector<1x256xi1> to vector<1x256xi1>
    %342 = vector.broadcast %341 : vector<1x256xi1> to vector<4x256xi1>
    %343 = vector.broadcast %cst_112 : f32 to vector<4x256xf32>
    %344 = arith.select %342, %340, %343 : vector<4x256xi1>, vector<4x256xf32>
    %345 = vector.extract_strided_slice %306 {offsets = [0, 16], sizes = [4, 240], strides = [1, 1]} : vector<4x256xf32> to vector<4x240xf32>
    %cst_113 = arith.constant 0.000000e+00 : f32
    %346 = vector.broadcast %cst_113 : f32 to vector<4x16xf32>
    %347 = tpu.concatenate %345, %346 in 1 : vector<4x240xf32>, vector<4x16xf32> -> vector<4x256xf32>
    %348 = vector.extract_strided_slice %306 {offsets = [0, 17], sizes = [4, 239], strides = [1, 1]} : vector<4x256xf32> to vector<4x239xf32>
    %cst_114 = arith.constant 0.000000e+00 : f32
    %349 = vector.broadcast %cst_114 : f32 to vector<4x17xf32>
    %350 = tpu.concatenate %348, %349 in 1 : vector<4x239xf32>, vector<4x17xf32> -> vector<4x256xf32>
    %cst_115 = arith.constant 0.000000e+00 : f32
    %351 = vector.shape_cast %20 : vector<1x256xi1> to vector<1x256xi1>
    %352 = vector.broadcast %351 : vector<1x256xi1> to vector<4x256xi1>
    %353 = vector.broadcast %cst_115 : f32 to vector<4x256xf32>
    %354 = arith.select %352, %350, %353 : vector<4x256xi1>, vector<4x256xf32>
    %355 = tpu.concatenate %193, %252, %313, %196, %255, %316, %203, %262, %323, %210, %269, %330, %186, %245, %306, %217 in 0 : vector<4x256xf32>, vector<4x256xf32>, vector<4x256xf32>, vector<4x256xf32>, vector<4x256xf32>, vector<4x256xf32>, vector<4x256xf32>, vector<4x256xf32>, vector<4x256xf32>, vector<4x256xf32>, vector<4x256xf32>, vector<4x256xf32>, vector<4x256xf32>, vector<4x256xf32>, vector<4x256xf32>, vector<4x256xf32> -> vector<64x256xf32>
    %356 = tpu.concatenate %276, %337, %224, %283, %344, %227, %286, %347, %234, %293, %354 in 0 : vector<4x256xf32>, vector<4x256xf32>, vector<4x256xf32>, vector<4x256xf32>, vector<4x256xf32>, vector<4x256xf32>, vector<4x256xf32>, vector<4x256xf32>, vector<4x256xf32>, vector<4x256xf32>, vector<4x256xf32> -> vector<44x256xf32>
    %357 = tpu.concatenate %355, %356 in 0 : vector<64x256xf32>, vector<44x256xf32> -> vector<108x256xf32>
    %c0_116 = arith.constant 0 : index
    %c0_117 = arith.constant 0 : index
    %358 = vector.load %arg9[%c0_116, %c0_117] : memref<4x108xf32, #tpu.memory_space<vmem>>, vector<4x108xf32>
    %cst_118 = arith.constant dense<0.000000e+00> : vector<4x256xf32>
    %359 = tpu.matmul %358, %357, %cst_118 {dimension_numbers = #tpu.dot_dimension_numbers<[1], [0], [0], [1], [0, 0, 1, 1], [], []>} : vector<4x108xf32>, vector<108x256xf32>, vector<4x256xf32> -> vector<4x256xf32>
    %c0_119 = arith.constant 0 : index
    %c0_120 = arith.constant 0 : index
    %360 = vector.load %arg10[%c0_119, %c0_120] : memref<4x1xf32, #tpu.memory_space<vmem>>, vector<4x1xf32>
    %361 = vector.broadcast %360 : vector<4x1xf32> to vector<4x256xf32>
    %362 = arith.addf %359, %361 : vector<4x256xf32>
    %cst_121 = arith.constant 0.000000e+00 : f32
    %363 = vector.broadcast %cst_121 : f32 to vector<4x256xf32>
    %364 = arith.cmpf oge, %362, %363 : vector<4x256xf32>
    %cst_122 = arith.constant 2.000000e-01 : f32
    %365 = vector.broadcast %cst_122 : f32 to vector<4x256xf32>
    %366 = arith.mulf %362, %365 : vector<4x256xf32>
    %367 = arith.select %364, %362, %366 : vector<4x256xi1>, vector<4x256xf32>
    %cst_123 = arith.constant 0.000000e+00 : f32
    %368 = vector.broadcast %cst_123 : f32 to vector<4x17xf32>
    %369 = vector.extract_strided_slice %367 {offsets = [0, 0], sizes = [4, 239], strides = [1, 1]} : vector<4x256xf32> to vector<4x239xf32>
    %370 = tpu.concatenate %368, %369 in 1 : vector<4x17xf32>, vector<4x239xf32> -> vector<4x256xf32>
    %cst_124 = arith.constant 0.000000e+00 : f32
    %371 = vector.shape_cast %18 : vector<1x256xi1> to vector<1x256xi1>
    %372 = vector.broadcast %371 : vector<1x256xi1> to vector<4x256xi1>
    %373 = vector.broadcast %cst_124 : f32 to vector<4x256xf32>
    %374 = arith.select %372, %370, %373 : vector<4x256xi1>, vector<4x256xf32>
    %cst_125 = arith.constant 0.000000e+00 : f32
    %375 = vector.broadcast %cst_125 : f32 to vector<4x16xf32>
    %376 = vector.extract_strided_slice %367 {offsets = [0, 0], sizes = [4, 240], strides = [1, 1]} : vector<4x256xf32> to vector<4x240xf32>
    %377 = tpu.concatenate %375, %376 in 1 : vector<4x16xf32>, vector<4x240xf32> -> vector<4x256xf32>
    %cst_126 = arith.constant 0.000000e+00 : f32
    %378 = vector.broadcast %cst_126 : f32 to vector<4x15xf32>
    %379 = vector.extract_strided_slice %367 {offsets = [0, 0], sizes = [4, 241], strides = [1, 1]} : vector<4x256xf32> to vector<4x241xf32>
    %380 = tpu.concatenate %378, %379 in 1 : vector<4x15xf32>, vector<4x241xf32> -> vector<4x256xf32>
    %cst_127 = arith.constant 0.000000e+00 : f32
    %381 = vector.shape_cast %20 : vector<1x256xi1> to vector<1x256xi1>
    %382 = vector.broadcast %381 : vector<1x256xi1> to vector<4x256xi1>
    %383 = vector.broadcast %cst_127 : f32 to vector<4x256xf32>
    %384 = arith.select %382, %380, %383 : vector<4x256xi1>, vector<4x256xf32>
    %cst_128 = arith.constant 0.000000e+00 : f32
    %385 = vector.broadcast %cst_128 : f32 to vector<4x1xf32>
    %386 = vector.extract_strided_slice %367 {offsets = [0, 0], sizes = [4, 255], strides = [1, 1]} : vector<4x256xf32> to vector<4x255xf32>
    %387 = tpu.concatenate %385, %386 in 1 : vector<4x1xf32>, vector<4x255xf32> -> vector<4x256xf32>
    %cst_129 = arith.constant 0.000000e+00 : f32
    %388 = vector.shape_cast %18 : vector<1x256xi1> to vector<1x256xi1>
    %389 = vector.broadcast %388 : vector<1x256xi1> to vector<4x256xi1>
    %390 = vector.broadcast %cst_129 : f32 to vector<4x256xf32>
    %391 = arith.select %389, %387, %390 : vector<4x256xi1>, vector<4x256xf32>
    %392 = vector.extract_strided_slice %367 {offsets = [0, 1], sizes = [4, 255], strides = [1, 1]} : vector<4x256xf32> to vector<4x255xf32>
    %cst_130 = arith.constant 0.000000e+00 : f32
    %393 = vector.broadcast %cst_130 : f32 to vector<4x1xf32>
    %394 = tpu.concatenate %392, %393 in 1 : vector<4x255xf32>, vector<4x1xf32> -> vector<4x256xf32>
    %cst_131 = arith.constant 0.000000e+00 : f32
    %395 = vector.shape_cast %20 : vector<1x256xi1> to vector<1x256xi1>
    %396 = vector.broadcast %395 : vector<1x256xi1> to vector<4x256xi1>
    %397 = vector.broadcast %cst_131 : f32 to vector<4x256xf32>
    %398 = arith.select %396, %394, %397 : vector<4x256xi1>, vector<4x256xf32>
    %399 = vector.extract_strided_slice %367 {offsets = [0, 15], sizes = [4, 241], strides = [1, 1]} : vector<4x256xf32> to vector<4x241xf32>
    %cst_132 = arith.constant 0.000000e+00 : f32
    %400 = vector.broadcast %cst_132 : f32 to vector<4x15xf32>
    %401 = tpu.concatenate %399, %400 in 1 : vector<4x241xf32>, vector<4x15xf32> -> vector<4x256xf32>
    %cst_133 = arith.constant 0.000000e+00 : f32
    %402 = vector.shape_cast %18 : vector<1x256xi1> to vector<1x256xi1>
    %403 = vector.broadcast %402 : vector<1x256xi1> to vector<4x256xi1>
    %404 = vector.broadcast %cst_133 : f32 to vector<4x256xf32>
    %405 = arith.select %403, %401, %404 : vector<4x256xi1>, vector<4x256xf32>
    %406 = vector.extract_strided_slice %367 {offsets = [0, 16], sizes = [4, 240], strides = [1, 1]} : vector<4x256xf32> to vector<4x240xf32>
    %cst_134 = arith.constant 0.000000e+00 : f32
    %407 = vector.broadcast %cst_134 : f32 to vector<4x16xf32>
    %408 = tpu.concatenate %406, %407 in 1 : vector<4x240xf32>, vector<4x16xf32> -> vector<4x256xf32>
    %409 = vector.extract_strided_slice %367 {offsets = [0, 17], sizes = [4, 239], strides = [1, 1]} : vector<4x256xf32> to vector<4x239xf32>
    %cst_135 = arith.constant 0.000000e+00 : f32
    %410 = vector.broadcast %cst_135 : f32 to vector<4x17xf32>
    %411 = tpu.concatenate %409, %410 in 1 : vector<4x239xf32>, vector<4x17xf32> -> vector<4x256xf32>
    %cst_136 = arith.constant 0.000000e+00 : f32
    %412 = vector.shape_cast %20 : vector<1x256xi1> to vector<1x256xi1>
    %413 = vector.broadcast %412 : vector<1x256xi1> to vector<4x256xi1>
    %414 = vector.broadcast %cst_136 : f32 to vector<4x256xf32>
    %415 = arith.select %413, %411, %414 : vector<4x256xi1>, vector<4x256xf32>
    %416 = tpu.concatenate %193, %252, %313, %374, %196, %255, %316, %377, %203, %262, %323, %384, %210, %269, %330, %391 in 0 : vector<4x256xf32>, vector<4x256xf32>, vector<4x256xf32>, vector<4x256xf32>, vector<4x256xf32>, vector<4x256xf32>, vector<4x256xf32>, vector<4x256xf32>, vector<4x256xf32>, vector<4x256xf32>, vector<4x256xf32>, vector<4x256xf32>, vector<4x256xf32>, vector<4x256xf32>, vector<4x256xf32>, vector<4x256xf32> -> vector<64x256xf32>
    %417 = tpu.concatenate %186, %245, %306, %367, %217, %276, %337, %398, %224, %283, %344, %405, %227, %286, %347, %408 in 0 : vector<4x256xf32>, vector<4x256xf32>, vector<4x256xf32>, vector<4x256xf32>, vector<4x256xf32>, vector<4x256xf32>, vector<4x256xf32>, vector<4x256xf32>, vector<4x256xf32>, vector<4x256xf32>, vector<4x256xf32>, vector<4x256xf32>, vector<4x256xf32>, vector<4x256xf32>, vector<4x256xf32>, vector<4x256xf32> -> vector<64x256xf32>
    %418 = tpu.concatenate %234, %293, %354, %415 in 0 : vector<4x256xf32>, vector<4x256xf32>, vector<4x256xf32>, vector<4x256xf32> -> vector<16x256xf32>
    %419 = tpu.concatenate %416, %417, %418 in 0 : vector<64x256xf32>, vector<64x256xf32>, vector<16x256xf32> -> vector<144x256xf32>
    %c0_137 = arith.constant 0 : index
    %c0_138 = arith.constant 0 : index
    %420 = vector.load %arg11[%c0_137, %c0_138] : memref<4x144xf32, #tpu.memory_space<vmem>>, vector<4x144xf32>
    %cst_139 = arith.constant dense<0.000000e+00> : vector<4x256xf32>
    %421 = tpu.matmul %420, %419, %cst_139 {dimension_numbers = #tpu.dot_dimension_numbers<[1], [0], [0], [1], [0, 0, 1, 1], [], []>} : vector<4x144xf32>, vector<144x256xf32>, vector<4x256xf32> -> vector<4x256xf32>
    %c0_140 = arith.constant 0 : index
    %c0_141 = arith.constant 0 : index
    %422 = vector.load %arg12[%c0_140, %c0_141] : memref<4x1xf32, #tpu.memory_space<vmem>>, vector<4x1xf32>
    %423 = vector.broadcast %422 : vector<4x1xf32> to vector<4x256xf32>
    %424 = arith.addf %421, %423 : vector<4x256xf32>
    %cst_142 = arith.constant 0.000000e+00 : f32
    %425 = vector.broadcast %cst_142 : f32 to vector<4x256xf32>
    %426 = arith.cmpf oge, %424, %425 : vector<4x256xf32>
    %cst_143 = arith.constant 2.000000e-01 : f32
    %427 = vector.broadcast %cst_143 : f32 to vector<4x256xf32>
    %428 = arith.mulf %424, %427 : vector<4x256xf32>
    %429 = arith.select %426, %424, %428 : vector<4x256xi1>, vector<4x256xf32>
    %cst_144 = arith.constant 0.000000e+00 : f32
    %430 = vector.broadcast %cst_144 : f32 to vector<4x17xf32>
    %431 = vector.extract_strided_slice %429 {offsets = [0, 0], sizes = [4, 239], strides = [1, 1]} : vector<4x256xf32> to vector<4x239xf32>
    %432 = tpu.concatenate %430, %431 in 1 : vector<4x17xf32>, vector<4x239xf32> -> vector<4x256xf32>
    %cst_145 = arith.constant 0.000000e+00 : f32
    %433 = vector.shape_cast %18 : vector<1x256xi1> to vector<1x256xi1>
    %434 = vector.broadcast %433 : vector<1x256xi1> to vector<4x256xi1>
    %435 = vector.broadcast %cst_145 : f32 to vector<4x256xf32>
    %436 = arith.select %434, %432, %435 : vector<4x256xi1>, vector<4x256xf32>
    %cst_146 = arith.constant 0.000000e+00 : f32
    %437 = vector.broadcast %cst_146 : f32 to vector<4x16xf32>
    %438 = vector.extract_strided_slice %429 {offsets = [0, 0], sizes = [4, 240], strides = [1, 1]} : vector<4x256xf32> to vector<4x240xf32>
    %439 = tpu.concatenate %437, %438 in 1 : vector<4x16xf32>, vector<4x240xf32> -> vector<4x256xf32>
    %cst_147 = arith.constant 0.000000e+00 : f32
    %440 = vector.broadcast %cst_147 : f32 to vector<4x15xf32>
    %441 = vector.extract_strided_slice %429 {offsets = [0, 0], sizes = [4, 241], strides = [1, 1]} : vector<4x256xf32> to vector<4x241xf32>
    %442 = tpu.concatenate %440, %441 in 1 : vector<4x15xf32>, vector<4x241xf32> -> vector<4x256xf32>
    %cst_148 = arith.constant 0.000000e+00 : f32
    %443 = vector.shape_cast %20 : vector<1x256xi1> to vector<1x256xi1>
    %444 = vector.broadcast %443 : vector<1x256xi1> to vector<4x256xi1>
    %445 = vector.broadcast %cst_148 : f32 to vector<4x256xf32>
    %446 = arith.select %444, %442, %445 : vector<4x256xi1>, vector<4x256xf32>
    %cst_149 = arith.constant 0.000000e+00 : f32
    %447 = vector.broadcast %cst_149 : f32 to vector<4x1xf32>
    %448 = vector.extract_strided_slice %429 {offsets = [0, 0], sizes = [4, 255], strides = [1, 1]} : vector<4x256xf32> to vector<4x255xf32>
    %449 = tpu.concatenate %447, %448 in 1 : vector<4x1xf32>, vector<4x255xf32> -> vector<4x256xf32>
    %cst_150 = arith.constant 0.000000e+00 : f32
    %450 = vector.shape_cast %18 : vector<1x256xi1> to vector<1x256xi1>
    %451 = vector.broadcast %450 : vector<1x256xi1> to vector<4x256xi1>
    %452 = vector.broadcast %cst_150 : f32 to vector<4x256xf32>
    %453 = arith.select %451, %449, %452 : vector<4x256xi1>, vector<4x256xf32>
    %454 = vector.extract_strided_slice %429 {offsets = [0, 1], sizes = [4, 255], strides = [1, 1]} : vector<4x256xf32> to vector<4x255xf32>
    %cst_151 = arith.constant 0.000000e+00 : f32
    %455 = vector.broadcast %cst_151 : f32 to vector<4x1xf32>
    %456 = tpu.concatenate %454, %455 in 1 : vector<4x255xf32>, vector<4x1xf32> -> vector<4x256xf32>
    %cst_152 = arith.constant 0.000000e+00 : f32
    %457 = vector.shape_cast %20 : vector<1x256xi1> to vector<1x256xi1>
    %458 = vector.broadcast %457 : vector<1x256xi1> to vector<4x256xi1>
    %459 = vector.broadcast %cst_152 : f32 to vector<4x256xf32>
    %460 = arith.select %458, %456, %459 : vector<4x256xi1>, vector<4x256xf32>
    %461 = vector.extract_strided_slice %429 {offsets = [0, 15], sizes = [4, 241], strides = [1, 1]} : vector<4x256xf32> to vector<4x241xf32>
    %cst_153 = arith.constant 0.000000e+00 : f32
    %462 = vector.broadcast %cst_153 : f32 to vector<4x15xf32>
    %463 = tpu.concatenate %461, %462 in 1 : vector<4x241xf32>, vector<4x15xf32> -> vector<4x256xf32>
    %cst_154 = arith.constant 0.000000e+00 : f32
    %464 = vector.shape_cast %18 : vector<1x256xi1> to vector<1x256xi1>
    %465 = vector.broadcast %464 : vector<1x256xi1> to vector<4x256xi1>
    %466 = vector.broadcast %cst_154 : f32 to vector<4x256xf32>
    %467 = arith.select %465, %463, %466 : vector<4x256xi1>, vector<4x256xf32>
    %468 = vector.extract_strided_slice %429 {offsets = [0, 16], sizes = [4, 240], strides = [1, 1]} : vector<4x256xf32> to vector<4x240xf32>
    %cst_155 = arith.constant 0.000000e+00 : f32
    %469 = vector.broadcast %cst_155 : f32 to vector<4x16xf32>
    %470 = tpu.concatenate %468, %469 in 1 : vector<4x240xf32>, vector<4x16xf32> -> vector<4x256xf32>
    %471 = vector.extract_strided_slice %429 {offsets = [0, 17], sizes = [4, 239], strides = [1, 1]} : vector<4x256xf32> to vector<4x239xf32>
    %cst_156 = arith.constant 0.000000e+00 : f32
    %472 = vector.broadcast %cst_156 : f32 to vector<4x17xf32>
    %473 = tpu.concatenate %471, %472 in 1 : vector<4x239xf32>, vector<4x17xf32> -> vector<4x256xf32>
    %cst_157 = arith.constant 0.000000e+00 : f32
    %474 = vector.shape_cast %20 : vector<1x256xi1> to vector<1x256xi1>
    %475 = vector.broadcast %474 : vector<1x256xi1> to vector<4x256xi1>
    %476 = vector.broadcast %cst_157 : f32 to vector<4x256xf32>
    %477 = arith.select %475, %473, %476 : vector<4x256xi1>, vector<4x256xf32>
    %478 = tpu.concatenate %193, %252, %313, %374, %436, %196, %255, %316, %377, %439, %203, %262, %323, %384, %446, %210 in 0 : vector<4x256xf32>, vector<4x256xf32>, vector<4x256xf32>, vector<4x256xf32>, vector<4x256xf32>, vector<4x256xf32>, vector<4x256xf32>, vector<4x256xf32>, vector<4x256xf32>, vector<4x256xf32>, vector<4x256xf32>, vector<4x256xf32>, vector<4x256xf32>, vector<4x256xf32>, vector<4x256xf32>, vector<4x256xf32> -> vector<64x256xf32>
    %479 = tpu.concatenate %269, %330, %391, %453, %186, %245, %306, %367, %429, %217, %276, %337, %398, %460, %224, %283 in 0 : vector<4x256xf32>, vector<4x256xf32>, vector<4x256xf32>, vector<4x256xf32>, vector<4x256xf32>, vector<4x256xf32>, vector<4x256xf32>, vector<4x256xf32>, vector<4x256xf32>, vector<4x256xf32>, vector<4x256xf32>, vector<4x256xf32>, vector<4x256xf32>, vector<4x256xf32>, vector<4x256xf32>, vector<4x256xf32> -> vector<64x256xf32>
    %480 = tpu.concatenate %344, %405, %467, %227, %286, %347, %408, %470, %234, %293, %354, %415, %477 in 0 : vector<4x256xf32>, vector<4x256xf32>, vector<4x256xf32>, vector<4x256xf32>, vector<4x256xf32>, vector<4x256xf32>, vector<4x256xf32>, vector<4x256xf32>, vector<4x256xf32>, vector<4x256xf32>, vector<4x256xf32>, vector<4x256xf32>, vector<4x256xf32> -> vector<52x256xf32>
    %481 = tpu.concatenate %478, %479, %480 in 0 : vector<64x256xf32>, vector<64x256xf32>, vector<52x256xf32> -> vector<180x256xf32>
    %c0_158 = arith.constant 0 : index
    %c0_159 = arith.constant 0 : index
    %482 = vector.load %arg13[%c0_158, %c0_159] : memref<4x180xf32, #tpu.memory_space<vmem>>, vector<4x180xf32>
    %cst_160 = arith.constant dense<0.000000e+00> : vector<4x256xf32>
    %483 = tpu.matmul %482, %481, %cst_160 {dimension_numbers = #tpu.dot_dimension_numbers<[1], [0], [0], [1], [0, 0, 1, 1], [], []>} : vector<4x180xf32>, vector<180x256xf32>, vector<4x256xf32> -> vector<4x256xf32>
    %c0_161 = arith.constant 0 : index
    %c0_162 = arith.constant 0 : index
    %484 = vector.load %arg14[%c0_161, %c0_162] : memref<4x1xf32, #tpu.memory_space<vmem>>, vector<4x1xf32>
    %485 = vector.broadcast %484 : vector<4x1xf32> to vector<4x256xf32>
    %486 = arith.addf %483, %485 : vector<4x256xf32>
    %cst_163 = arith.constant 2.000000e-01 : f32
    %487 = vector.broadcast %cst_163 : f32 to vector<4x256xf32>
    %488 = arith.mulf %486, %487 : vector<4x256xf32>
    %489 = arith.addf %488, %186 : vector<4x256xf32>
    %c0_164 = arith.constant 0 : index
    %c0_165 = arith.constant 0 : index
    %c0_166 = arith.constant 0 : index
    %490 = vector.load %arg15[%c0_164, %c0_165, %c0_166] : memref<1x4x256xf32, #tpu.memory_space<vmem>>, vector<1x4x256xf32>
    %491 = vector.shape_cast %490 : vector<1x4x256xf32> to vector<4x256xf32>
    %492 = vector.shape_cast %489 : vector<4x256xf32> to vector<1x4x256xf32>
    tpu.vector_store %arg15[%c0_164, %c0_165, %c0_166], %492 {strides = array<i32>} : memref<1x4x256xf32, #tpu.memory_space<vmem>>, vector<1x4x256xf32>,
    return
  }
  func.func @transform_0(%arg0: i32) -> (i32, i32, i32) {
    %c0_i32 = arith.constant 0 : i32
    %c0_i32_0 = arith.constant 0 : i32
    %c0_i32_1 = arith.constant 0 : i32
    return %arg0, %c0_i32, %c0_i32_0 : i32, i32, i32
  }
  func.func @transform_1(%arg0: i32) -> (i32, i32, i32) {
    %c0_i32 = arith.constant 0 : i32
    %c0_i32_0 = arith.constant 0 : i32
    %c0_i32_1 = arith.constant 0 : i32
    return %arg0, %c0_i32, %c0_i32_0 : i32, i32, i32
  }
  func.func @transform_2(%arg0: i32) -> (i32, i32) {
    %c0_i32 = arith.constant 0 : i32
    %c0_i32_0 = arith.constant 0 : i32
    %c0_i32_1 = arith.constant 0 : i32
    return %c0_i32, %c0_i32_0 : i32, i32
  }
  func.func @transform_3(%arg0: i32) -> (i32, i32) {
    %c0_i32 = arith.constant 0 : i32
    %c0_i32_0 = arith.constant 0 : i32
    %c0_i32_1 = arith.constant 0 : i32
    return %c0_i32, %c0_i32_0 : i32, i32
  }
  func.func @transform_4(%arg0: i32) -> (i32, i32) {
    %c0_i32 = arith.constant 0 : i32
    %c0_i32_0 = arith.constant 0 : i32
    %c0_i32_1 = arith.constant 0 : i32
    return %c0_i32, %c0_i32_0 : i32, i32
  }
  func.func @transform_5(%arg0: i32) -> (i32, i32) {
    %c0_i32 = arith.constant 0 : i32
    %c0_i32_0 = arith.constant 0 : i32
    %c0_i32_1 = arith.constant 0 : i32
    return %c0_i32, %c0_i32_0 : i32, i32
  }
  func.func @transform_6(%arg0: i32) -> (i32, i32) {
    %c0_i32 = arith.constant 0 : i32
    %c0_i32_0 = arith.constant 0 : i32
    %c0_i32_1 = arith.constant 0 : i32
    return %c0_i32, %c0_i32_0 : i32, i32
  }
  func.func @transform_7(%arg0: i32) -> (i32, i32) {
    %c0_i32 = arith.constant 0 : i32
    %c0_i32_0 = arith.constant 0 : i32
    %c0_i32_1 = arith.constant 0 : i32
    return %c0_i32, %c0_i32_0 : i32, i32
  }
  func.func @transform_8(%arg0: i32) -> (i32, i32) {
    %c0_i32 = arith.constant 0 : i32
    %c0_i32_0 = arith.constant 0 : i32
    %c0_i32_1 = arith.constant 0 : i32
    return %c0_i32, %c0_i32_0 : i32, i32
  }
  func.func @transform_9(%arg0: i32) -> (i32, i32) {
    %c0_i32 = arith.constant 0 : i32
    %c0_i32_0 = arith.constant 0 : i32
    %c0_i32_1 = arith.constant 0 : i32
    return %c0_i32, %c0_i32_0 : i32, i32
  }
  func.func @transform_10(%arg0: i32) -> (i32, i32) {
    %c0_i32 = arith.constant 0 : i32
    %c0_i32_0 = arith.constant 0 : i32
    %c0_i32_1 = arith.constant 0 : i32
    return %c0_i32, %c0_i32_0 : i32, i32
  }
  func.func @transform_11(%arg0: i32) -> (i32, i32) {
    %c0_i32 = arith.constant 0 : i32
    %c0_i32_0 = arith.constant 0 : i32
    %c0_i32_1 = arith.constant 0 : i32
    return %c0_i32, %c0_i32_0 : i32, i32
  }
  func.func @transform_12(%arg0: i32) -> (i32, i32) {
    %c0_i32 = arith.constant 0 : i32
    %c0_i32_0 = arith.constant 0 : i32
    %c0_i32_1 = arith.constant 0 : i32
    return %c0_i32, %c0_i32_0 : i32, i32
  }
  func.func @transform_13(%arg0: i32) -> (i32, i32) {
    %c0_i32 = arith.constant 0 : i32
    %c0_i32_0 = arith.constant 0 : i32
    %c0_i32_1 = arith.constant 0 : i32
    return %c0_i32, %c0_i32_0 : i32, i32
  }
  func.func @transform_14(%arg0: i32) -> (i32, i32, i32) {
    %c0_i32 = arith.constant 0 : i32
    %c0_i32_0 = arith.constant 0 : i32
    %c0_i32_1 = arith.constant 0 : i32
    return %arg0, %c0_i32, %c0_i32_0 : i32, i32, i32
  }
}

</mosaic_0001>

<bundles_post_ra>
// kernel: upsample_dense_block.2
= control target key start
LH: loop header
LB: loop body
LE: loop exit
PB: predicated region body
PF: predicated region fallthrough
CT: control target
= control target key end

     0   :  { %s500_s12 = smov 0   ;;  %s567_s0 = inlined_call_operand.vmem [shape: f32[2,8,64], index: 0, kind: input, shape index: {}]   ;;  %s568_s1 = inlined_call_operand.vmem [shape: f32[16,72], index: 1, kind: input, shape index: {}]   ;;  %s569_s2 = inlined_call_operand.vmem [shape: f32[16,1], index: 2, kind: input, shape index: {}]   ;;  %s570_s3 = inlined_call_operand.vmem [shape: f32[2,16,64], index: 3, kind: output, shape index: {}]  }
   0x1 LB: > { %s390_s13 = sadd.s32 4294967295, %s469_s12   ;;  %p394_p0 = scmp.ge.s32.totalorder %s469_s12, 1  ;;  %s469_s12 = sphi %s500_s12, %s13_s12  }
   0x2   : > { %p136_p1 = scmp.lt.s32.totalorder %s469_s12, 3 }
   0x4   : > { %p137_p2 = pnand %p394_p0, %p136_p1 }
   0x5   : > { %p159_p3 = scmp.lt.s32.totalorder (!%p137_p2), %s390_s13, 1  ;;  %s471_s18 = smov (!%p137_p2), 119  }
   0x6   : > { %140 = sbr.rel (%p137_p2) target bundleno = 348 (0x15c), region = 32  ;;  %s472_s19 = smov (!%p137_p2), 121  }
   0x7   : > { %s473_s20 = smov (!%p137_p2), 120   ;;  %s474_s21 = smov (!%p137_p2), 127  }
   0x8   : > { %s475_s24 = smov (!%p137_p2), 1   ;;  %s476_s25 = smov (!%p137_p2), 7  }
   0x9   : > { %s478_s26 = smov (!%p137_p2), 8   ;;  %s479_s27 = smov (!%p137_p2), 9  }
   0xb   : > { %s576_s13 = smov (!%p159_p3, %s390_s13), 1  ;;  %v236_v1 = vld [vmem:[%s568_s1] sm:$0xff]  ;;  %vm250_vm0 = vcmask 588800   ;;  %v477_v2 = vmov 0   ;;  %v239_v3 = vld [vmem:[%s569_s2 + $0x8] sm:$0xff]  ;;  %v168_v5 = vlaneseq  ;;  %vm233_vm1 = vcmask 449536  }
   0xc   : > { %s395_s14 = sshll.u32 %s576_s13, 3  ;;  %441 = vmatprep.mubr.msk.f32.mxu0 %vm250_vm0, %v236_v1  ;;  %462 = vset.pattern.permute.xlu1 %v477_v2  ;;  %v238_v4 = vld [vmem:[%s569_s2] sm:$0xff]  ;;  %vm228_vm3 = vcmask 457728   ;;  %vm222_vm4 = vcmask 465920   ;;  %vm216_vm5 = vcmask 515072   ;;  %vm210_vm7 = vcmask 7168  }
   0xd   : > { %s162_s17 = scalar_lea.vmem %s567_s0, %s395_s14  ;;  %461 = vset.pattern.permute.xlu0 %v477_v2  ;;  %v169_v6 = vand.u32 127, %v168_v5  ;;  %vm202_vm8 = vcmask 56320   ;;  %vm197_vm9 = vcmask 64512   ;;  %vm189_vm10 = vcmask 72704   ;;  %v237_v24 = vld [vmem:[%s568_s1 + $0x8] sm:$0xff]  ;;  %s411_s7 = sshll.u32 %s576_s13, 4 }
   0xe   : > { %v184_v0 = vld [vmem:[%s162_s17] sm:$0xff]  ;;  %vm404_vm11 = vmneg %vm197_vm9  ;;  %s167_s10 = scalar_lea.vmem %s570_s3, %s411_s7  ;;  %vm332_vm12 = vcmask 523264  }
   0xf   : > { %230 = vrot.lane.b32.xlu0 %v184_v0, %s471_s18  ;;  %219 = vrot.lane.b32.xlu1 %v184_v0, %s472_s19  ;;  %v174_v7 = vand.u32 7, %v169_v6 }
  0x11   : > { %vm524_vm2 = vcmp.lt.s32.totalorder %v174_v7, 7  ;;  %vm532_vm6 = vcmp.gt.s32.totalorder %v174_v7, 0 }
  0x13   : > { %225 = vrot.lane.b32.xlu0 %v184_v0, %s473_s20  ;;  %213 = vrot.lane.b32.xlu1 %v184_v0, %s474_s21 }
  0x17   : > { %207 = vrot.lane.b32.xlu0 %v184_v0, %s475_s24  ;;  %199 = vrot.lane.b32.xlu1 %v184_v0, %s476_s25 }
  0x1b   : > { %194 = vrot.lane.b32.xlu0 %v184_v0, %s478_s26  ;;  %186 = vrot.lane.b32.xlu1 %v184_v0, %s479_s27 }
  0x1f   : > { %247 = vperm.xlu1 %462, %v239_v3   ;;  %242 = vperm.xlu0 %461, %v238_v4  }
  0x81   : > { %v231_v9 = vpop.permute.xlu0 %230  ;;  %v220_v10 = vpop.permute.xlu1 %219 }
  0x82   : > { %v234_v11 = vsel %vm233_vm1, %v231_v9, 0.0  ;;  %v223_v15 = vsel %vm222_vm4, %v220_v10, 0.0 }
  0x83   : > { %423 = vmatprep.subr.msk.mxu0 %vm524_vm2, %v234_v11 }
  0x84   : > { %424 = vmatpush3.msk.msra.mxu0 %vm524_vm2, %v234_v11 }
  0x85   : > { %v226_v12 = vpop.permute.xlu0 %225  ;;  %v214_v13 = vpop.permute.xlu1 %213 }
  0x86   : > { %425 = vmatprep.subr.msk.mxu0 %vm228_vm3, %v226_v12  ;;  %v217_v16 = vsel %vm216_vm5, %v214_v13, 0.0 }
  0x87   : > { %426 = vmatpush3.msk.msra.mxu0 %vm228_vm3, %v226_v12 }
  0x88   : > { %427 = vmatprep.subr.msk.mxu0 %vm532_vm6, %v223_v15 }
  0x89   : > { %428 = vmatpush3.msk.msra.mxu0 %vm532_vm6, %v223_v15  ;;  %v208_v17 = vpop.permute.xlu0 %207  ;;  %v200_v18 = vpop.permute.xlu1 %199 }
  0x8a   : > { %429 = vmatprep.subr.msk.mxu0 %vm524_vm2, %v217_v16  ;;  %v211_v19 = vsel %vm210_vm7, 0.0, %v208_v17  ;;  %v203_v20 = vsel %vm202_vm8, 0.0, %v200_v18 }
  0x8b   : > { %430 = vmatpush3.msk.msra.mxu0 %vm524_vm2, %v217_v16 }
  0x8c   : > { %431 = vmatprep.subr.mxu0 %v184_v0 }
  0x8d   : > { %432 = vmatpush3.msra.mxu0 %v184_v0  ;;  %v187_v21 = vpop.permute.xlu1 %186  ;;  %v195_v22 = vpop.permute.xlu0 %194 }
  0x8e   : > { %433 = vmatprep.subr.msk.mxu0 %vm532_vm6, %v211_v19  ;;  %v190_v23 = vsel %vm189_vm10, 0.0, %v187_v21 }
  0x8f   : > { %434 = vmatpush3.msk.msra.mxu0 %vm532_vm6, %v211_v19 }
  0x90   : > { %435 = vmatprep.subr.msk.mxu0 %vm524_vm2, %v203_v20 }
  0x91   : > { %436 = vmatpush3.msk.msra.mxu0 %vm524_vm2, %v203_v20 }
  0x92   : > { %437 = vmatprep.subr.msk.mxu0 %vm404_vm11, %v195_v22 }
  0x93   : > { %438 = vmatpush3.msk.msra.mxu0 %vm404_vm11, %v195_v22 }
  0x94   : > { %439 = vmatprep.subr.msk.mxu0 %vm532_vm6, %v190_v23 }
  0x95   : > { %440 = vmatpush3.msk.msra.mxu0 %vm532_vm6, %v190_v23 }
  0x96   : > { %442 = vmatmul.mubr.msk.f32.vlgmr.msra.gmra.mxu0 %vm250_vm0, %v237_v24 }
  0x9a   : > { %v248_v25 = vpop.permute.xlu1 %247  ;;  %v243_v27 = vpop.permute.xlu0 %242 }
 0x156   : > { %v443_v26 = vpop.f32.mrf.mxu0 }
 0x157   : > { %v329_v28 = vadd.f32 %v443_v26, %v248_v25 }
 0x158   : > { %v323_v29 = vpop.f32.mrf.mxu0 }
 0x159   : > { %334 = vst.msk [vmem:[%s167_s10 + $0x8] sm:$0xff] %vm332_vm12, %v329_v28  ;;  %v324_v30 = vadd.f32 %v323_v29, %v243_v27 }
 0x15b   : > { %333 = vst.msk [vmem:[%s167_s10] sm:$0xff] %vm332_vm12, %v324_v30 }
 0x15c PF: > { %s13_s12 = sadd.s32 1, %s469_s12  }
 0x15d   : > { %p10_p4 = scmp.ge.s32.totalorder %s13_s12, 4  }
 0x15f   :  { %12 = sbr.rel (!%p10_p4) target bundleno = 1 (0x1), region = 62 }

// kernel: upsample_dense_block.3
= control target key start
LH: loop header
LB: loop body
LE: loop exit
PB: predicated region body
PF: predicated region fallthrough
CT: control target
= control target key end

     0   :  { %s2341_s29 = smov 0   ;;  %s3503_s0 = inlined_call_operand.vmem [shape: f32[2,4,256], index: 0, kind: input, shape index: {}]   ;;  %s3504_s1 = inlined_call_operand.vmem [shape: f32[2,4,256], index: 1, kind: input, shape index: {}]   ;;  %s3505_s2 = inlined_call_operand.vmem [shape: f32[4,72], index: 2, kind: input, shape index: {}]   ;;  %s3506_s3 = inlined_call_operand.vmem [shape: f32[4,36], index: 3, kind: input, shape index: {}]   ;;  %s3507_s4 = inlined_call_operand.vmem [shape: f32[4,36], index: 4, kind: input, shape index: {}]   ;;  %s3508_s5 = inlined_call_operand.vmem [shape: f32[4,1], index: 5, kind: input, shape index: {}]   ;;  %s3509_s6 = inlined_call_operand.vmem [shape: f32[4,72], index: 6, kind: input, shape index: {}]   ;;  %s3510_s7 = inlined_call_operand.vmem [shape: f32[4,1], index: 7, kind: input, shape index: {}]   ;;  %s3511_s8 = inlined_call_operand.vmem [shape: f32[4,108], index: 8, kind: input, shape index: {}]   ;;  %s3512_s9 = inlined_call_operand.vmem [shape: f32[4,1], index: 9, kind: input, shape index: {}]   ;;  %s3513_s10 = inlined_call_operand.vmem [shape: f32[4,144], index: 10, kind: input, shape index: {}]   ;;  %s3514_s11 = inlined_call_operand.vmem [shape: f32[4,1], index: 11, kind: input, shape index: {}]   ;;  %s3515_s12 = inlined_call_operand.vmem [shape: f32[4,180], index: 12, kind: input, shape index: {}]   ;;  %s3516_s13 = inlined_call_operand.vmem [shape: f32[4,1], index: 13, kind: input, shape index: {}]   ;;  %s3517_s14 = inlined_call_operand.vmem [shape: f32[2,4,256], index: 14, kind: output, shape index: {}]  }
   0x1 LB: > { %s2192_s30 = sadd.s32 4294967295, %s2254_s29   ;;  %p2196_p0 = scmp.ge.s32.totalorder %s2254_s29, 1  ;;  %s2254_s29 = sphi %s2341_s29, %s24_s29  }
   0x2   : > { %p422_p1 = scmp.lt.s32.totalorder %s2254_s29, 3 }
   0x4   : > { %p423_p2 = pnand %p2196_p0, %p422_p1 }
   0x6   : > { %426 = sbr.rel (%p423_p2) target bundleno = 2512 (0x9d0), region = 76 }
   0xb   : > { %p473_p3 = scmp.lt.s32.totalorder %s2192_s30, 1  ;;  %s2256_s22 = smov 111   ;;  %vm734_vm0 = vcmask 1043456   ;;  %v2263_v7 = vmov 0.0   ;;  %v488_v8 = vlaneseq  ;;  %vm608_vm1 = vcmask 908288  }
   0xc   : > { %s2257_s23 = smov 112   ;;  %s2258_s24 = smov 113   ;;  %828 = vmatprep.mubr.f32.mxu0 %v2263_v7  ;;  %1223 = vmatprep.mubr.f32.mxu1 %v2263_v7  ;;  %vm599_vm4 = vcmask 916480   ;;  %vm588_vm5 = vcmask 924672   ;;  %vm577_vm8 = vcmask 1039360   ;;  %vm566_vm9 = vcmask 7168  }
   0xd   : > { %s3565_s30 = smov (!%p473_p3, %s2192_s30), 1  ;;  %s2259_s25 = smov 127   ;;  %v489_v9 = vand.u32 127, %v488_v8  ;;  %vm551_vm10 = vcmask 121856   ;;  %vm542_vm11 = vcmask 130048   ;;  %vm527_vm12 = vcmask 138240  }
   0xe   : > { %s2349_s15 = sshll.u32 %s3565_s30, 3  ;;  %s2260_s26 = smov 1   ;;  %vm3518_vm13 = vcmask 588800  }
   0xf   : > { %s482_s18 = scalar_lea.vmem %s3504_s1, %s2349_s15  ;;  %s477_s21 = scalar_lea.vmem %s3503_s0, %s2349_s15  ;;  %v490_v10 = vadd.s32 128, %v489_v9  ;;  %v495_v11 = vand.u32 15, %v489_v9 }
  0x10   : > { %v520_v0 = vld [vmem:[%s482_s18] sm:$0xff]  ;;  %s2261_s27 = smov 15   ;;  %s2262_s28 = smov 16  }
  0x11   : > { %v519_v1 = vld [vmem:[%s477_s21] sm:$0xff]  ;;  %681 = vrot.lane.b32.xlu0 %v520_v0, %s2256_s22  ;;  %v616_v2 = vcombine.high %v520_v0, %v520_v0  ;;  %v715_v4 = vcombine.low %v520_v0, %v520_v0  ;;  %s2264_s30 = smov 17   ;;  %v502_v12 = vand.u32 15, %v490_v10  ;;  %vm2399_vm2 = vcmp.lt.s32.totalorder %v495_v11, 15 }
  0x12   : > { %604 = vrot.lane.b32.xlu1 %v519_v1, %s2256_s22  ;;  %v522_v3 = vcombine.high %v519_v1, %v519_v1  ;;  %vm2433_vm7 = vcmp.gt.s32.totalorder %v495_v11, 0 }
  0x13   : > { %v2377_v6 = vsel %vm734_vm0, %v519_v1, %v715_v4  ;;  %vm2403_vm3 = vcmp.lt.s32.totalorder %v502_v12, 15  ;;  %vm2424_vm6 = vcmp.gt.s32.totalorder %v502_v12, 0 }
  0x14   : > { %v2372_v5 = vsel %vm734_vm0, %v522_v3, %v520_v0 }
  0x15   : > { %683 = vrot.lane.b32.xlu0 %v616_v2, %s2256_s22 }
  0x16   : > { %606 = vrot.lane.b32.xlu1 %v522_v3, %s2256_s22 }
  0x19   : > { %676 = vrot.lane.b32.xlu0 %v616_v2, %s2257_s23 }
  0x1a   : > { %666 = vrot.lane.b32.xlu1 %v616_v2, %s2258_s24 }
  0x1d   : > { %674 = vrot.lane.b32.xlu0 %v520_v0, %s2257_s23 }
  0x1e   : > { %597 = vrot.lane.b32.xlu1 %v522_v3, %s2257_s23 }
  0x21   : > { %664 = vrot.lane.b32.xlu0 %v520_v0, %s2258_s24 }
  0x22   : > { %586 = vrot.lane.b32.xlu1 %v522_v3, %s2258_s24 }
  0x25   : > { %595 = vrot.lane.b32.xlu0 %v519_v1, %s2257_s23 }
  0x26   : > { %656 = vrot.lane.b32.xlu1 %v616_v2, %s2259_s25 }
  0x29   : > { %584 = vrot.lane.b32.xlu0 %v519_v1, %s2258_s24 }
  0x2a   : > { %654 = vrot.lane.b32.xlu1 %v520_v0, %s2259_s25 }
  0x2d   : > { %575 = vrot.lane.b32.xlu0 %v522_v3, %s2259_s25 }
  0x2e   : > { %573 = vrot.lane.b32.xlu1 %v519_v1, %s2259_s25 }
  0x31   : > { %644 = vrot.lane.b32.xlu0 %v520_v0, %s2260_s26 }
  0x32   : > { %646 = vrot.lane.b32.xlu1 %v616_v2, %s2260_s26 }
  0x35   : > { %562 = vrot.lane.b32.xlu0 %v519_v1, %s2260_s26 }
  0x36   : > { %564 = vrot.lane.b32.xlu1 %v522_v3, %s2260_s26 }
  0x39   : > { %634 = vrot.lane.b32.xlu0 %v520_v0, %s2261_s27 }
  0x3a   : > { %636 = vrot.lane.b32.xlu1 %v616_v2, %s2261_s27 }
  0x3d   : > { %547 = vrot.lane.b32.xlu0 %v519_v1, %s2261_s27 }
  0x3e   : > { %549 = vrot.lane.b32.xlu1 %v522_v3, %s2261_s27 }
  0x41   : > { %627 = vrot.lane.b32.xlu0 %v520_v0, %s2262_s28 }
  0x42   : > { %629 = vrot.lane.b32.xlu1 %v616_v2, %s2262_s28 }
  0x45   : > { %617 = vrot.lane.b32.xlu0 %v520_v0, %s2264_s30 }
  0x46   : > { %619 = vrot.lane.b32.xlu1 %v616_v2, %s2264_s30 }
  0x49   : > { %538 = vrot.lane.b32.xlu0 %v519_v1, %s2262_s28 }
  0x4a   : > { %540 = vrot.lane.b32.xlu1 %v522_v3, %s2262_s28 }
  0x4d   : > { %523 = vrot.lane.b32.xlu0 %v519_v1, %s2264_s30 }
  0x4e   : > { %525 = vrot.lane.b32.xlu1 %v522_v3, %s2264_s30 }
  0x83   : > { %v682_v13 = vpop.permute.xlu0 %681 }
  0x84   : > { %v605_v14 = vpop.permute.xlu1 %604 }
  0x87   : > { %v684_v17 = vpop.permute.xlu0 %683 }
  0x88   : > { %v607_v18 = vpop.permute.xlu1 %606  ;;  %v685_v19 = vsel %vm608_vm1, %v682_v13, %v684_v17  ;;  %v688_v20 = vsel %vm608_vm1, %v684_v17, 0.0 }
  0x89   : > { %v609_v21 = vsel %vm608_vm1, %v605_v14, %v607_v18  ;;  %v612_v22 = vsel %vm608_vm1, %v607_v18, 0.0  ;;  %v689_v23 = vsel %vm2399_vm2, %v685_v19, 0.0  ;;  %v690_v24 = vsel %vm2403_vm3, %v688_v20, 0.0 }
  0x8a   : > { %v753_v25 = vrot.slane %v689_v23, 4  ;;  %v754_v26 = vrot.slane %v690_v24, 4  ;;  %v614_v29 = vsel %vm2403_vm3, %v612_v22, 0.0  ;;  %v613_v30 = vsel %vm2399_vm2, %v609_v21, 0.0 }
  0x8b   : > { %v677_v27 = vpop.permute.xlu0 %676 }
  0x8c   : > { %v667_v28 = vpop.permute.xlu1 %666  ;;  %v680_v31 = vsel %vm599_vm4, %v677_v27, 0.0  ;;  %v758_v32 = vsel %vm734_vm0, %v614_v29, %v754_v26  ;;  %v757_v33 = vsel %vm734_vm0, %v613_v30, %v753_v25 }
  0x8d   : > { %778 = vmatprep.subr.mxu0 %v758_v32  ;;  %v731_v34 = vrot.slane %v680_v31, 4  ;;  %v671_v40 = vsel %vm588_vm5, %v667_v28, 0.0 }
  0x8e   : > { %779 = vmatpush1.msra.mxu0 %v757_v33  ;;  %v673_v45 = vsel %vm2424_vm6, %v671_v40, 0.0 }
  0x8f   : > { %v675_v35 = vpop.permute.xlu0 %674  ;;  %v726_v52 = vrot.slane %v673_v45, 4 }
  0x90   : > { %v598_v36 = vpop.permute.xlu1 %597  ;;  %v678_v43 = vsel %vm599_vm4, %v675_v35, %v677_v27 }
  0x91   : > { %v603_v37 = vsel %vm599_vm4, %v598_v36, 0.0  ;;  %v730_v48 = vrot.slane %v678_v43, 4 }
  0x92   : > { %v750_v38 = vsel %vm734_vm0, %v603_v37, %v731_v34 }
  0x93   : > { %780 = vmatprep.subr.mxu0 %v750_v38  ;;  %v665_v41 = vpop.permute.xlu0 %664 }
  0x94   : > { %v587_v42 = vpop.permute.xlu1 %586  ;;  %v668_v47 = vsel %vm588_vm5, %v665_v41, %v667_v28 }
  0x95   : > { %v592_v44 = vsel %vm588_vm5, %v587_v42, 0.0  ;;  %v672_v54 = vsel %vm2433_vm7, %v668_v47, 0.0 }
  0x96   : > { %v594_v51 = vsel %vm2424_vm6, %v592_v44, 0.0  ;;  %v725_v60 = vrot.slane %v672_v54, 4 }
  0x97   : > { %v596_v49 = vpop.permute.xlu0 %595  ;;  %v748_v57 = vsel %vm734_vm0, %v594_v51, %v726_v52 }
  0x98   : > { %v657_v50 = vpop.permute.xlu1 %656  ;;  %v600_v53 = vsel %vm599_vm4, %v596_v49, %v598_v36 }
  0x99   : > { %v749_v55 = vsel %vm734_vm0, %v600_v53, %v730_v48  ;;  %v661_v56 = vsel %vm577_vm8, %v657_v50, 0.0 }
  0x9a   : > { %781 = vmatpush1.msra.mxu0 %v749_v55  ;;  %v663_v63 = vsel %vm2403_vm3, %v661_v56, 0.0 }
  0x9b   : > { %v585_v58 = vpop.permute.xlu0 %584  ;;  %782 = vmatprep.subr.mxu0 %v748_v57  ;;  %v720_v8 = vrot.slane %v663_v63, 4 }
  0x9c   : > { %v655_v59 = vpop.permute.xlu1 %654  ;;  %v589_v61 = vsel %vm588_vm5, %v585_v58, %v587_v42 }
  0x9d   : > { %v658_v62 = vsel %vm577_vm8, %v655_v59, %v657_v50  ;;  %v593_v0 = vsel %vm2433_vm7, %v589_v61, 0.0 }
  0x9e   : > { %v662_v1 = vsel %vm2399_vm2, %v658_v62, 0.0  ;;  %v747_v2 = vsel %vm734_vm0, %v593_v0, %v725_v60 }
  0x9f   : > { %v576_v3 = vpop.permute.xlu0 %575  ;;  %783 = vmatpush1.msra.mxu0 %v747_v2  ;;  %v719_v9 = vrot.slane %v662_v1, 4 }
  0xa0   : > { %v574_v4 = vpop.permute.xlu1 %573  ;;  %v581_v10 = vsel %vm577_vm8, %v576_v3, 0.0 }
  0xa1   : > { %v578_v11 = vsel %vm577_vm8, %v574_v4, %v576_v3  ;;  %v583_v13 = vsel %vm2403_vm3, %v581_v10, 0.0 }
  0xa2   : > { %v582_v12 = vsel %vm2399_vm2, %v578_v11, 0.0  ;;  %v746_v14 = vsel %vm734_vm0, %v583_v13, %v720_v8 }
  0xa3   : > { %v745_v17 = vsel %vm734_vm0, %v582_v12, %v719_v9  ;;  %v645_v18 = vpop.permute.xlu0 %644  ;;  %784 = vmatprep.subr.mxu0 %v746_v14 }
  0xa4   : > { %v647_v19 = vpop.permute.xlu1 %646  ;;  %v651_v20 = vsel %vm566_vm9, 0.0, %v645_v18  ;;  %785 = vmatpush1.msra.mxu0 %v745_v17 }
  0xa5   : > { %v648_v21 = vsel %vm566_vm9, %v645_v18, %v647_v19  ;;  %v652_v22 = vsel %vm2433_vm7, %v651_v20, 0.0  ;;  %786 = vmatprep.subr.mxu0 %v2372_v5  ;;  %v759_v19 = vld [vmem:[%s3505_s2] sm:$0xf] }
  0xa6   : > { %v653_v23 = vsel %vm2424_vm6, %v648_v21, 0.0  ;;  %787 = vmatpush1.msra.mxu0 %v2377_v6  ;;  %v710_v26 = vrot.slane %v652_v22, 4 }
  0xa7   : > { %v563_v24 = vpop.permute.xlu0 %562  ;;  %v711_v27 = vrot.slane %v653_v23, 4 }
  0xa8   : > { %v565_v25 = vpop.permute.xlu1 %564  ;;  %v570_v28 = vsel %vm566_vm9, 0.0, %v563_v24 }
  0xa9   : > { %v567_v29 = vsel %vm566_vm9, %v563_v24, %v565_v25  ;;  %v571_v31 = vsel %vm2433_vm7, %v570_v28, 0.0 }
  0xaa   : > { %v572_v30 = vsel %vm2424_vm6, %v567_v29, 0.0  ;;  %v741_v5 = vsel %vm734_vm0, %v571_v31, %v710_v26 }
  0xab   : > { %v742_v32 = vsel %vm734_vm0, %v572_v30, %v711_v27  ;;  %v635_v6 = vpop.permute.xlu0 %634 }
  0xac   : > { %v637_v33 = vpop.permute.xlu1 %636  ;;  %788 = vmatprep.subr.mxu0 %v742_v32  ;;  %v641_v34 = vsel %vm551_vm10, 0.0, %v635_v6 }
  0xad   : > { %v638_v35 = vsel %vm551_vm10, %v635_v6, %v637_v33  ;;  %789 = vmatpush1.msra.mxu0 %v741_v5  ;;  %v642_v36 = vsel %vm2399_vm2, %v641_v34, 0.0 }
  0xae   : > { %v643_v37 = vsel %vm2403_vm3, %v638_v35, 0.0  ;;  %v704_v41 = vrot.slane %v642_v36, 4 }
  0xaf   : > { %v548_v38 = vpop.permute.xlu0 %547  ;;  %v705_v42 = vrot.slane %v643_v37, 4 }
  0xb0   : > { %v550_v40 = vpop.permute.xlu1 %549  ;;  %v555_v43 = vsel %vm551_vm10, 0.0, %v548_v38 }
  0xb1   : > { %v552_v44 = vsel %vm551_vm10, %v548_v38, %v550_v40  ;;  %v560_v47 = vsel %vm2399_vm2, %v555_v43, 0.0 }
  0xb2   : > { %v561_v45 = vsel %vm2403_vm3, %v552_v44, 0.0  ;;  %v739_v49 = vsel %vm734_vm0, %v560_v47, %v704_v41 }
  0xb3   : > { %v740_v48 = vsel %vm734_vm0, %v561_v45, %v705_v42  ;;  %v628_v50 = vpop.permute.xlu0 %627 }
  0xb4   : > { %v630_v51 = vpop.permute.xlu1 %629  ;;  %790 = vmatprep.subr.mxu0 %v740_v48  ;;  %v633_v54 = vsel %vm542_vm11, 0.0, %v628_v50 }
  0xb5   : > { %791 = vmatpush1.msra.mxu0 %v739_v49  ;;  %v631_v55 = vsel %vm542_vm11, %v628_v50, %v630_v51  ;;  %v698_v58 = vrot.slane %v633_v54, 4 }
  0xb6   : > { %v699_v59 = vrot.slane %v631_v55, 4 }
  0xb7   : > { %v618_v52 = vpop.permute.xlu0 %617 }
  0xb8   : > { %v620_v53 = vpop.permute.xlu1 %619  ;;  %v624_v56 = vsel %vm527_vm12, 0.0, %v618_v52 }
  0xb9   : > { %v621_v57 = vsel %vm527_vm12, %v618_v52, %v620_v53  ;;  %v625_v0 = vsel %vm2433_vm7, %v624_v56, 0.0 }
  0xba   : > { %v626_v1 = vsel %vm2424_vm6, %v621_v57, 0.0  ;;  %v693_v9 = vrot.slane %v625_v0, 4 }
  0xbb   : > { %v539_v60 = vpop.permute.xlu0 %538  ;;  %v694_v10 = vrot.slane %v626_v1, 4 }
  0xbc   : > { %v541_v61 = vpop.permute.xlu1 %540  ;;  %v546_v62 = vsel %vm542_vm11, 0.0, %v539_v60 }
  0xbd   : > { %v543_v63 = vsel %vm542_vm11, %v539_v60, %v541_v61  ;;  %v737_v3 = vsel %vm734_vm0, %v546_v62, %v698_v58 }
  0xbe   : > { %v738_v2 = vsel %vm734_vm0, %v543_v63, %v699_v59 }
  0xbf   : > { %792 = vmatprep.subr.mxu0 %v738_v2  ;;  %v524_v4 = vpop.permute.xlu0 %523 }
  0xc0   : > { %v526_v8 = vpop.permute.xlu1 %525  ;;  %793 = vmatpush1.msra.mxu0 %v737_v3  ;;  %v531_v11 = vsel %vm527_vm12, 0.0, %v524_v4 }
  0xc1   : > { %v528_v12 = vsel %vm527_vm12, %v524_v4, %v526_v8  ;;  %v536_v14 = vsel %vm2433_vm7, %v531_v11, 0.0 }
  0xc2   : > { %v537_v13 = vsel %vm2424_vm6, %v528_v12, 0.0  ;;  %v735_v18 = vsel %vm734_vm0, %v536_v14, %v693_v9 }
  0xc3   : > { %v736_v17 = vsel %vm734_vm0, %v537_v13, %v694_v10 }
  0xc4   : > { %794 = vmatprep.subr.mxu0 %v736_v17 }
  0xc5   : > { %795 = vmatpush1.msra.mxu0 %v735_v18 }
  0xc6   : > { %2203 = vmatmul.mubr.msk.f32.vlgmr.msra.gmra.mxu0 %vm3518_vm13, %v759_v19 }
  0xc7   : > { %1022 = vmatprep.mubr.f32.mxu0 %v2263_v7 }
 0x186   : > { %v830_v20 = vpop.f32.mrf.mxu0 }
 0x187   : > { %vm835_vm14 = vcmp.ge.f32.partialorder %v830_v20, 0.0  ;;  %v837_v21 = vmul.f32 0.1, %v830_v20 }
 0x188   : > { %v832_v23 = vpop.f32.mrf.mxu0 }
 0x189   : > { %v2518_v22 = vsel %vm835_vm14, %v830_v20, %v837_v21  ;;  %v838_v24 = vmul.f32 0.1, %v832_v23  ;;  %vm836_vm15 = vcmp.ge.f32.partialorder %v832_v23, 0.0  ;;  %vm948_vm14 = vcmask 293888  }
 0x18a   : > { %907 = vrot.lane.b32.xlu1 %v2518_v22, %s2256_s22  ;;  %900 = vrot.lane.b32.xlu0 %v2518_v22, %s2257_s23 }
 0x18b   : > { %v840_v25 = vsel %vm836_vm15, %v832_v23, %v838_v24 }
 0x18e   : > { %890 = vrot.lane.b32.xlu1 %v2518_v22, %s2258_s24  ;;  %880 = vrot.lane.b32.xlu0 %v2518_v22, %s2259_s25 }
 0x192   : > { %870 = vrot.lane.b32.xlu0 %v2518_v22, %s2260_s26  ;;  %909 = vrot.lane.b32.xlu1 %v840_v25, %s2256_s22 }
 0x196   : > { %860 = vrot.lane.b32.xlu0 %v2518_v22, %s2261_s27  ;;  %892 = vrot.lane.b32.xlu1 %v840_v25, %s2258_s24 }
 0x19a   : > { %872 = vrot.lane.b32.xlu1 %v840_v25, %s2260_s26  ;;  %902 = vrot.lane.b32.xlu0 %v840_v25, %s2257_s23 }
 0x19e   : > { %862 = vrot.lane.b32.xlu1 %v840_v25, %s2261_s27  ;;  %882 = vrot.lane.b32.xlu0 %v840_v25, %s2259_s25 }
 0x1a2   : > { %855 = vrot.lane.b32.xlu1 %v840_v25, %s2262_s28  ;;  %853 = vrot.lane.b32.xlu0 %v2518_v22, %s2262_s28 }
 0x1a6   : > { %845 = vrot.lane.b32.xlu1 %v840_v25, %s2264_s30  ;;  %843 = vrot.lane.b32.xlu0 %v2518_v22, %s2264_s30 }
 0x1fc   : > { %v908_v26 = vpop.permute.xlu1 %907  ;;  %v901_v27 = vpop.permute.xlu0 %900 }
 0x200   : > { %v891_v28 = vpop.permute.xlu1 %890  ;;  %v881_v29 = vpop.permute.xlu0 %880 }
 0x204   : > { %v871_v30 = vpop.permute.xlu0 %870  ;;  %v910_v31 = vpop.permute.xlu1 %909 }
 0x205   : > { %v911_v32 = vsel %vm608_vm1, %v908_v26, %v910_v31  ;;  %v914_v5 = vsel %vm608_vm1, %v910_v31, 0.0  ;;  %v877_v49 = vsel %vm566_vm9, 0.0, %v871_v30 }
 0x206   : > { %v915_v6 = vsel %vm2399_vm2, %v911_v32, 0.0  ;;  %v916_v33 = vsel %vm2403_vm3, %v914_v5, 0.0  ;;  %v878_v61 = vsel %vm2433_vm7, %v877_v49, 0.0 }
 0x207   : > { %2204 = vmatprep.subr.msk.mxu0 %vm734_vm0, %v916_v33  ;;  %v924_v10 = vrot.slane %v878_v61, 4  ;;  %v1144_v33 = vld [vmem:[%s3508_s5] sm:$0xf] }
 0x208   : > { %v861_v34 = vpop.permute.xlu0 %860  ;;  %2205 = vmatpush1.msk.msra.mxu0 %vm734_vm0, %v915_v6  ;;  %v893_v35 = vpop.permute.xlu1 %892  ;;  %v2265_v6 = vmov 0  }
 0x209   : > { %v894_v36 = vsel %vm588_vm5, %v891_v28, %v893_v35  ;;  %v897_v37 = vsel %vm588_vm5, %v893_v35, 0.0  ;;  %v867_v57 = vsel %vm551_vm10, 0.0, %v861_v34  ;;  %2241 = vset.pattern.permute.xlu0 %v2265_v6  ;;  %2242 = vset.pattern.permute.xlu1 %v2265_v6 }
 0x20a   : > { %v898_v45 = vsel %vm2433_vm7, %v894_v36, 0.0  ;;  %v899_v47 = vsel %vm2424_vm6, %v897_v37, 0.0  ;;  %v868_v3 = vsel %vm2399_vm2, %v867_v57, 0.0 }
 0x20b   : > { %v941_v18 = vsel %vm734_vm0, %v868_v3, %v924_v10 }
 0x20c   : > { %v873_v38 = vpop.permute.xlu1 %872  ;;  %v903_v40 = vpop.permute.xlu0 %902 }
 0x20d   : > { %v904_v41 = vsel %vm599_vm4, %v901_v27, %v903_v40  ;;  %v906_v42 = vsel %vm599_vm4, %v903_v40, 0.0  ;;  %v874_v48 = vsel %vm566_vm9, %v871_v30, %v873_v38  ;;  %v947_v27 = vld [vmem:[%s3506_s3] sm:$0xf] }
 0x20e   : > { %v935_v43 = vrot.slane %v904_v41, 4  ;;  %v936_v44 = vrot.slane %v906_v42, 4  ;;  %v879_v58 = vsel %vm2424_vm6, %v874_v48, 0.0 }
 0x20f   : > { %v925_v4 = vrot.slane %v879_v58, 4 }
 0x210   : > { %v863_v50 = vpop.permute.xlu1 %862  ;;  %v883_v51 = vpop.permute.xlu0 %882  ;;  %v946_v52 = vsel %vm734_vm0, %v899_v47, %v936_v44  ;;  %v945_v53 = vsel %vm734_vm0, %v898_v45, %v935_v43 }
 0x211   : > { %v864_v54 = vsel %vm551_vm10, %v861_v34, %v863_v50  ;;  %v884_v55 = vsel %vm577_vm8, %v881_v29, %v883_v51  ;;  %v887_v56 = vsel %vm577_vm8, %v883_v51, 0.0  ;;  %982 = vmatprep.subr.mxu0 %v946_v52 }
 0x212   : > { %v888_v59 = vsel %vm2399_vm2, %v884_v55, 0.0  ;;  %v889_v60 = vsel %vm2403_vm3, %v887_v56, 0.0  ;;  %983 = vmatpush1.msra.mxu0 %v945_v53  ;;  %v869_v0 = vsel %vm2403_vm3, %v864_v54, 0.0 }
 0x213   : > { %v930_v62 = vrot.slane %v888_v59, 4  ;;  %v931_v63 = vrot.slane %v889_v60, 4  ;;  %v942_v13 = vsel %vm734_vm0, %v869_v0, %v925_v4 }
 0x214   : > { %v856_v1 = vpop.permute.xlu1 %855  ;;  %v854_v2 = vpop.permute.xlu0 %853 }
 0x215   : > { %v944_v8 = vsel %vm734_vm0, %v840_v25, %v931_v63  ;;  %v943_v9 = vsel %vm734_vm0, %v2518_v22, %v930_v62  ;;  %v857_v11 = vsel %vm542_vm11, %v854_v2, %v856_v1  ;;  %v859_v12 = vsel %vm542_vm11, 0.0, %v854_v2 }
 0x216   : > { %984 = vmatprep.subr.mxu0 %v944_v8  ;;  %v918_v19 = vrot.slane %v859_v12, 4  ;;  %v919_v20 = vrot.slane %v857_v11, 4 }
 0x217   : > { %985 = vmatpush1.msra.mxu0 %v943_v9 }
 0x218   : > { %v846_v14 = vpop.permute.xlu1 %845  ;;  %986 = vmatprep.subr.mxu0 %v942_v13  ;;  %v844_v17 = vpop.permute.xlu0 %843 }
 0x219   : > { %v847_v21 = vsel %vm527_vm12, %v844_v17, %v846_v14  ;;  %v850_v22 = vsel %vm527_vm12, 0.0, %v844_v17  ;;  %987 = vmatpush1.msra.mxu0 %v941_v18 }
 0x21a   : > { %v851_v23 = vsel %vm2433_vm7, %v850_v22, 0.0  ;;  %v852_v24 = vsel %vm2424_vm6, %v847_v21, 0.0 }
 0x21b   : > { %v940_v25 = vsel %vm734_vm0, %v852_v24, %v919_v20  ;;  %v939_v26 = vsel %vm734_vm0, %v851_v23, %v918_v19 }
 0x21c   : > { %988 = vmatprep.subr.mxu0 %v940_v25 }
 0x21d   : > { %989 = vmatpush1.msra.mxu0 %v939_v26 }
 0x21e   : > { %2206 = vmatmul.mubr.msk.f32.vlgmr.msra.gmra.mxu0 %vm948_vm14, %v947_v27 }
 0x21f   : > { %1456 = vmatprep.mubr.f32.mxu0 %v2263_v7 }
 0x2de   : > { %v1024_v28 = vpop.f32.mrf.mxu0 }
 0x2df   : > { %vm1029_vm15 = vcmp.ge.f32.partialorder %v1024_v28, 0.0  ;;  %v1031_v29 = vmul.f32 0.1, %v1024_v28 }
 0x2e0   : > { %v1026_v31 = vpop.f32.mrf.mxu0 }
 0x2e1   : > { %v2600_v30 = vsel %vm1029_vm15, %v1024_v28, %v1031_v29  ;;  %v1032_v32 = vmul.f32 0.1, %v1026_v31  ;;  %vm1030_vm13 = vcmp.ge.f32.partialorder %v1026_v31, 0.0 }
 0x2e2   : > { %3539 = vst [vmem:[#allocation2_spill] sm:$0xff] %v2600_v30  ;;  %1103 = vrot.lane.b32.xlu1 %v2600_v30, %s2256_s22  ;;  %1095 = vrot.lane.b32.xlu0 %v2600_v30, %s2257_s23 }
 0x2e3   : > { %v2610_v5 = vsel %vm1030_vm13, %v1026_v31, %v1032_v32 }
 0x2e4   : > { %3540 = vst [vmem:[#allocation3_spill] sm:$0xff] %v2610_v5 }
 0x2e6   : > { %1085 = vrot.lane.b32.xlu1 %v2600_v30, %s2258_s24  ;;  %1075 = vrot.lane.b32.xlu0 %v2600_v30, %s2259_s25 }
 0x2ea   : > { %1065 = vrot.lane.b32.xlu0 %v2600_v30, %s2260_s26  ;;  %1105 = vrot.lane.b32.xlu1 %v2610_v5, %s2256_s22 }
 0x2ee   : > { %1055 = vrot.lane.b32.xlu0 %v2600_v30, %s2261_s27  ;;  %1087 = vrot.lane.b32.xlu1 %v2610_v5, %s2258_s24 }
 0x2f2   : > { %1067 = vrot.lane.b32.xlu1 %v2610_v5, %s2260_s26  ;;  %1097 = vrot.lane.b32.xlu0 %v2610_v5, %s2257_s23 }
 0x2f6   : > { %1057 = vrot.lane.b32.xlu1 %v2610_v5, %s2261_s27  ;;  %1077 = vrot.lane.b32.xlu0 %v2610_v5, %s2259_s25 }
 0x2fa   : > { %1049 = vrot.lane.b32.xlu1 %v2610_v5, %s2262_s28  ;;  %1047 = vrot.lane.b32.xlu0 %v2600_v30, %s2262_s28 }
 0x2fe   : > { %1039 = vrot.lane.b32.xlu1 %v2610_v5, %s2264_s30  ;;  %1037 = vrot.lane.b32.xlu0 %v2600_v30, %s2264_s30 }
 0x302   : > { %1147 = vperm.xlu0 %2241, %v1144_v33  }
 0x354   : > { %v1104_v34 = vpop.permute.xlu1 %1103  ;;  %v1096_v35 = vpop.permute.xlu0 %1095 }
 0x358   : > { %v1086_v36 = vpop.permute.xlu1 %1085  ;;  %v1076_v37 = vpop.permute.xlu0 %1075 }
 0x35c   : > { %v1066_v38 = vpop.permute.xlu0 %1065  ;;  %v1106_v40 = vpop.permute.xlu1 %1105 }
 0x35d   : > { %v1107_v41 = vsel %vm608_vm1, %v1104_v34, %v1106_v40  ;;  %v1110_v42 = vsel %vm608_vm1, %v1106_v40, 0.0  ;;  %v1072_v59 = vsel %vm566_vm9, 0.0, %v1066_v38 }
 0x35e   : > { %v2643_v43 = vsel %vm2403_vm3, %v1110_v42, 0.0  ;;  %v2647_v44 = vsel %vm2399_vm2, %v1107_v41, 0.0  ;;  %v2701_v10 = vsel %vm2433_vm7, %v1072_v59, 0.0 }
 0x35f   : > { %2207 = vmatprep.subr.msk.mxu1 %vm734_vm0, %v2643_v43  ;;  %v2727_v22 = vrot.slane %v2701_v10, 4 }
 0x360   : > { %v1056_v45 = vpop.permute.xlu0 %1055  ;;  %2208 = vmatpush1.msk.msra.mxu1 %vm734_vm0, %v2647_v44  ;;  %v1088_v47 = vpop.permute.xlu1 %1087 }
 0x361   : > { %v1089_v48 = vsel %vm588_vm5, %v1086_v36, %v1088_v47  ;;  %v1092_v49 = vsel %vm588_vm5, %v1088_v47, 0.0  ;;  %v1062_v3 = vsel %vm551_vm10, 0.0, %v1056_v45 }
 0x362   : > { %v2669_v56 = vsel %vm2433_vm7, %v1089_v48, 0.0  ;;  %v2673_v57 = vsel %vm2424_vm6, %v1092_v49, 0.0  ;;  %v2715_v18 = vsel %vm2399_vm2, %v1062_v3, 0.0 }
 0x363   : > { %v1137_v28 = vsel %vm734_vm0, %v2715_v18, %v2727_v22 }
 0x364   : > { %v1068_v50 = vpop.permute.xlu1 %1067  ;;  %v1098_v51 = vpop.permute.xlu0 %1097 }
 0x365   : > { %v2656_v52 = vsel %vm599_vm4, %v1096_v35, %v1098_v51  ;;  %v2659_v53 = vsel %vm599_vm4, %v1098_v51, 0.0  ;;  %v1069_v58 = vsel %vm566_vm9, %v1066_v38, %v1068_v50  ;;  %v1383_v50 = vld [vmem:[%s3510_s7] sm:$0xf] }
 0x366   : > { %v2662_v54 = vrot.slane %v2656_v52, 4  ;;  %v2665_v55 = vrot.slane %v2659_v53, 4  ;;  %v2689_v4 = vsel %vm2424_vm6, %v1069_v58, 0.0 }
 0x367   : > { %v2718_v19 = vrot.slane %v2689_v4, 4 }
 0x368   : > { %3541 = vst [vmem:[#allocation4_spill] sm:$0xff] %v2662_v54  ;;  %3542 = vst [vmem:[#allocation5_spill] sm:$0xff] %v2665_v55  ;;  %v1058_v60 = vpop.permute.xlu1 %1057  ;;  %v1078_v61 = vpop.permute.xlu0 %1077  ;;  %v1142_v62 = vsel %vm734_vm0, %v2673_v57, %v2665_v55  ;;  %v1141_v63 = vsel %vm734_vm0, %v2669_v56, %v2662_v54 }
 0x369   : > { %v1059_v0 = vsel %vm551_vm10, %v1056_v45, %v1058_v60  ;;  %v1079_v1 = vsel %vm577_vm8, %v1076_v37, %v1078_v61  ;;  %v1082_v2 = vsel %vm577_vm8, %v1078_v61, 0.0  ;;  %1183 = vmatprep.subr.mxu1 %v1142_v62  ;;  %v1143_v37 = vld [vmem:[%s3507_s4] sm:$0xf] }
 0x36a   : > { %v2693_v8 = vsel %vm2399_vm2, %v1079_v1, 0.0  ;;  %v2697_v9 = vsel %vm2403_vm3, %v1082_v2, 0.0  ;;  %1184 = vmatpush1.msra.mxu1 %v1141_v63  ;;  %v2711_v13 = vsel %vm2403_vm3, %v1059_v0, 0.0 }
 0x36b   : > { %v2704_v11 = vrot.slane %v2693_v8, 4  ;;  %v2707_v12 = vrot.slane %v2697_v9, 4  ;;  %v1138_v25 = vsel %vm734_vm0, %v2711_v13, %v2718_v19 }
 0x36c   : > { %v1050_v14 = vpop.permute.xlu1 %1049  ;;  %v1048_v17 = vpop.permute.xlu0 %1047 }
 0x36d   : > { %v1140_v20 = vsel %vm734_vm0, %v2610_v5, %v2707_v12  ;;  %v1139_v21 = vsel %vm734_vm0, %v2600_v30, %v2704_v11  ;;  %v2730_v23 = vsel %vm542_vm11, %v1048_v17, %v1050_v14  ;;  %v2733_v24 = vsel %vm542_vm11, 0.0, %v1048_v17 }
 0x36e   : > { %1185 = vmatprep.subr.mxu1 %v1140_v20  ;;  %v2742_v29 = vrot.slane %v2733_v24, 4  ;;  %v2745_v31 = vrot.slane %v2730_v23, 4 }
 0x36f   : > { %1186 = vmatpush1.msra.mxu1 %v1139_v21 }
 0x370   : > { %v1040_v26 = vpop.permute.xlu1 %1039  ;;  %1187 = vmatprep.subr.mxu1 %v1138_v25  ;;  %v1038_v27 = vpop.permute.xlu0 %1037  ;;  %3543 = vst [vmem:[#allocation6_spill] sm:$0xff] %v2742_v29  ;;  %3544 = vst [vmem:[#allocation7_spill] sm:$0xff] %v2745_v31 }
 0x371   : > { %v1041_v32 = vsel %vm527_vm12, %v1038_v27, %v1040_v26  ;;  %v1044_v6 = vsel %vm527_vm12, 0.0, %v1038_v27  ;;  %1188 = vmatpush1.msra.mxu1 %v1137_v28 }
 0x372   : > { %v2751_v33 = vsel %vm2433_vm7, %v1044_v6, 0.0  ;;  %v2755_v34 = vsel %vm2424_vm6, %v1041_v32, 0.0 }
 0x373   : > { %v1136_v35 = vsel %vm734_vm0, %v2755_v34, %v2745_v31  ;;  %v1135_v36 = vsel %vm734_vm0, %v2751_v33, %v2742_v29 }
 0x374   : > { %1189 = vmatprep.subr.mxu1 %v1136_v35 }
 0x375   : > { %1190 = vmatpush1.msra.mxu1 %v1135_v36 }
 0x376   : > { %2209 = vmatmul.mubr.msk.f32.vlgmr.msra.gmra.mxu1 %vm948_vm14, %v1143_v37  ;;  %vm3545_vm14 = vcmask 588800  }
 0x377   : > { %1666 = vmatprep.mubr.f32.mxu1 %v2263_v7 }
 0x37d   : > { %v1148_v38 = vpop.permute.xlu0 %1147 }
 0x436   : > { %v1225_v40 = vpop.f32.mrf.mxu1 }
 0x437   : > { %v1226_v41 = vadd.f32 %v1225_v40, %v1148_v38 }
 0x438   : > { %v1227_v42 = vpop.f32.mrf.mxu1 }
 0x439   : > { %vm1230_vm13 = vcmp.ge.f32.partialorder %v1226_v41, 0.0  ;;  %v1232_v45 = vmul.f32 0.2, %v1226_v41  ;;  %v1228_v48 = vadd.f32 %v1227_v42, %v1148_v38 }
 0x43b   : > { %v2768_v47 = vsel %vm1230_vm13, %v1226_v41, %v1232_v45  ;;  %v1233_v49 = vmul.f32 0.2, %v1228_v48  ;;  %vm1231_vm15 = vcmp.ge.f32.partialorder %v1228_v48, 0.0 }
 0x43c   : > { %1296 = vrot.lane.b32.xlu0 %v2768_v47, %s2257_s23  ;;  %1304 = vrot.lane.b32.xlu1 %v2768_v47, %s2256_s22 }
 0x43d   : > { %v2778_v7 = vsel %vm1231_vm15, %v1228_v48, %v1233_v49 }
 0x440   : > { %1266 = vrot.lane.b32.xlu0 %v2768_v47, %s2260_s26  ;;  %1286 = vrot.lane.b32.xlu1 %v2768_v47, %s2258_s24 }
 0x444   : > { %1298 = vrot.lane.b32.xlu0 %v2778_v7, %s2257_s23  ;;  %1276 = vrot.lane.b32.xlu1 %v2768_v47, %s2259_s25 }
 0x448   : > { %1278 = vrot.lane.b32.xlu0 %v2778_v7, %s2259_s25  ;;  %1306 = vrot.lane.b32.xlu1 %v2778_v7, %s2256_s22 }
 0x44c   : > { %1256 = vrot.lane.b32.xlu0 %v2768_v47, %s2261_s27  ;;  %1288 = vrot.lane.b32.xlu1 %v2778_v7, %s2258_s24 }
 0x450   : > { %1248 = vrot.lane.b32.xlu0 %v2768_v47, %s2262_s28  ;;  %1268 = vrot.lane.b32.xlu1 %v2778_v7, %s2260_s26 }
 0x454   : > { %1238 = vrot.lane.b32.xlu0 %v2768_v47, %s2264_s30  ;;  %1258 = vrot.lane.b32.xlu1 %v2778_v7, %s2261_s27 }
 0x458   : > { %1386 = vperm.xlu0 %2241, %v1383_v50   ;;  %1250 = vrot.lane.b32.xlu1 %v2778_v7, %s2262_s28 }
 0x45c   : > { %1240 = vrot.lane.b32.xlu1 %v2778_v7, %s2264_s30 }
 0x4ae   : > { %v1297_v51 = vpop.permute.xlu0 %1296  ;;  %v1305_v58 = vpop.permute.xlu1 %1304 }
 0x4b2   : > { %v1267_v59 = vpop.permute.xlu0 %1266  ;;  %v1287_v60 = vpop.permute.xlu1 %1286 }
 0x4b3   : > { %v1273_v42 = vsel %vm566_vm9, 0.0, %v1267_v59 }
 0x4b6   : > { %v1299_v61 = vpop.permute.xlu0 %1298  ;;  %v1277_v62 = vpop.permute.xlu1 %1276 }
 0x4b7   : > { %v2808_v63 = vsel %vm599_vm4, %v1299_v61, 0.0  ;;  %v2811_v2 = vsel %vm599_vm4, %v1297_v51, %v1299_v61 }
 0x4b8   : > { %v1355_v26 = vrot.slane %v2808_v63, 4  ;;  %v1354_v32 = vrot.slane %v2811_v2, 4 }
 0x4ba   : > { %v1279_v0 = vpop.permute.xlu0 %1278  ;;  %v1307_v1 = vpop.permute.xlu1 %1306 }
 0x4bb   : > { %v1283_v3 = vsel %vm577_vm8, %v1279_v0, 0.0  ;;  %v1308_v14 = vsel %vm608_vm1, %v1305_v58, %v1307_v1  ;;  %v1311_v17 = vsel %vm608_vm1, %v1307_v1, 0.0  ;;  %v1280_v20 = vsel %vm577_vm8, %v1277_v62, %v1279_v0 }
 0x4bc   : > { %v1312_v21 = vsel %vm2399_vm2, %v1308_v14, 0.0  ;;  %v1313_v25 = vsel %vm2403_vm3, %v1311_v17, 0.0  ;;  %v2825_v6 = vsel %vm2403_vm3, %v1283_v3, 0.0  ;;  %v2829_v37 = vsel %vm2399_vm2, %v1280_v20, 0.0 }
 0x4bd   : > { %v1376_v27 = vrot.slane %v1312_v21, 4  ;;  %v1377_v28 = vrot.slane %v1313_v25, 4  ;;  %v1344_v50 = vrot.slane %v2825_v6, 4  ;;  %v1338_v1 = vrot.slane %v2778_v7, 4 }
 0x4be   : > { %v1257_v35 = vpop.permute.xlu0 %1256  ;;  %v1289_v36 = vpop.permute.xlu1 %1288  ;;  %v2863_v3 = vsel %vm2433_vm7, %v1273_v42, 0.0  ;;  %v1337_v7 = vrot.slane %v2768_v47, 4 }
 0x4bf   : > { %v1290_v38 = vsel %vm588_vm5, %v1287_v60, %v1289_v36  ;;  %v1293_v40 = vsel %vm588_vm5, %v1289_v36, 0.0  ;;  %v2835_v41 = vsel %vm734_vm0, %v2643_v43, %v1377_v28  ;;  %v2845_v49 = vsel %vm734_vm0, %v2647_v44, %v1376_v27 }
 0x4c0   : > { %v1294_v45 = vsel %vm2433_vm7, %v1290_v38, 0.0  ;;  %v1295_v48 = vsel %vm2424_vm6, %v1293_v40, 0.0  ;;  %1406 = vmatprep.subr.mxu0 %v2835_v41  ;;  %v2851_v43 = vsel %vm734_vm0, %v2659_v53, %v1355_v26  ;;  %v1343_v60 = vrot.slane %v2829_v37, 4 }
 0x4c1   : > { %v1349_v51 = vrot.slane %v1294_v45, 4  ;;  %v1350_v58 = vrot.slane %v1295_v48, 4  ;;  %1407 = vmatpush1.msra.mxu0 %v2845_v49  ;;  %v1263_v61 = vsel %vm551_vm10, 0.0, %v1257_v35  ;;  %v2858_v44 = vsel %vm734_vm0, %v2656_v52, %v1354_v32 }
 0x4c2   : > { %v1249_v62 = vpop.permute.xlu0 %1248  ;;  %1408 = vmatprep.subr.mxu0 %v2851_v43  ;;  %v1269_v0 = vpop.permute.xlu1 %1268  ;;  %v2893_v25 = vsel %vm734_vm0, %v2693_v8, %v1343_v60  ;;  %v2899_v27 = vsel %vm734_vm0, %v2610_v5, %v1338_v1  ;;  %v2909_v8 = vsel %vm734_vm0, %v2600_v30, %v1337_v7 }
 0x4c3   : > { %v1270_v53 = vsel %vm566_vm9, %v1267_v59, %v1269_v0  ;;  %1409 = vmatpush1.msra.mxu0 %v2858_v44  ;;  %v2869_v14 = vsel %vm734_vm0, %v2673_v57, %v1350_v58  ;;  %v2873_v17 = vsel %vm734_vm0, %v2669_v56, %v1349_v51  ;;  %v1264_v59 = vsel %vm2399_vm2, %v1263_v61, 0.0 }
 0x4c4   : > { %v2877_v52 = vsel %vm2424_vm6, %v1270_v53, 0.0  ;;  %1410 = vmatprep.subr.mxu0 %v2869_v14  ;;  %v2887_v57 = vsel %vm734_vm0, %v2697_v9, %v1344_v50  ;;  %v1333_v56 = vrot.slane %v2863_v3, 4  ;;  %v1327_v9 = vrot.slane %v1264_v59, 4 }
 0x4c5   : > { %v1334_v20 = vrot.slane %v2877_v52, 4  ;;  %1411 = vmatpush1.msra.mxu0 %v2873_v17  ;;  %v2902_v28 = vsel %vm542_vm11, 0.0, %v1249_v62 }
 0x4c6   : > { %1412 = vmatprep.subr.mxu0 %v2887_v57  ;;  %v1259_v21 = vpop.permute.xlu1 %1258  ;;  %v1239_v47 = vpop.permute.xlu0 %1238  ;;  %v2920_v42 = vsel %vm734_vm0, %v2701_v10, %v1333_v56  ;;  %v1321_v45 = vrot.slane %v2902_v28, 4  ;;  %v2935_v51 = vsel %vm734_vm0, %v2715_v18, %v1327_v9 }
 0x4c7   : > { %v1260_v26 = vsel %vm551_vm10, %v1257_v35, %v1259_v21  ;;  %1413 = vmatpush1.msra.mxu0 %v2893_v25  ;;  %v2914_v36 = vsel %vm734_vm0, %v2689_v4, %v1334_v20  ;;  %v1245_v38 = vsel %vm527_vm12, 0.0, %v1239_v47 }
 0x4c8   : > { %v1265_v32 = vsel %vm2403_vm3, %v1260_v26, 0.0  ;;  %1414 = vmatprep.subr.mxu0 %v2899_v27  ;;  %v1246_v10 = vsel %vm2433_vm7, %v1245_v38, 0.0  ;;  %v2948_v61 = vsel %vm734_vm0, %v2733_v24, %v1321_v45  ;;  %v1586_v26 = vld [vmem:[%s3512_s9] sm:$0xf] }
 0x4c9   : > { %v1328_v35 = vrot.slane %v1265_v32, 4  ;;  %1415 = vmatpush1.msra.mxu0 %v2909_v8  ;;  %v1316_v18 = vrot.slane %v1246_v10, 4 }
 0x4ca   : > { %v1251_v40 = vpop.permute.xlu1 %1250  ;;  %1416 = vmatprep.subr.mxu0 %v2914_v36 }
 0x4cb   : > { %v2924_v48 = vsel %vm542_vm11, %v1249_v62, %v1251_v40  ;;  %1417 = vmatpush1.msra.mxu0 %v2920_v42  ;;  %v2929_v4 = vsel %vm734_vm0, %v2711_v13, %v1328_v35  ;;  %v2963_v24 = vsel %vm734_vm0, %v2751_v33, %v1316_v18 }
 0x4cc   : > { %v1322_v50 = vrot.slane %v2924_v48, 4  ;;  %1418 = vmatprep.subr.mxu0 %v2929_v4 }
 0x4cd   : > { %1419 = vmatpush1.msra.mxu0 %v2935_v51 }
 0x4ce   : > { %v1241_v58 = vpop.permute.xlu1 %1240  ;;  %v2942_v60 = vsel %vm734_vm0, %v2730_v23, %v1322_v50  ;;  %v1382_v23 = vld [vmem:[%s3509_s6] sm:$0xf] }
 0x4cf   : > { %v1242_v13 = vsel %vm527_vm12, %v1239_v47, %v1241_v58  ;;  %1420 = vmatprep.subr.mxu0 %v2942_v60 }
 0x4d0   : > { %v1247_v62 = vsel %vm2424_vm6, %v1242_v13, 0.0  ;;  %1421 = vmatpush1.msra.mxu0 %v2948_v61 }
 0x4d1   : > { %v1317_v0 = vrot.slane %v1247_v62, 4 }
 0x4d3   : > { %v2955_v1 = vsel %vm734_vm0, %v2755_v34, %v1317_v0  ;;  %v1387_v53 = vpop.permute.xlu0 %1386 }
 0x4d4   : > { %1422 = vmatprep.subr.mxu0 %v2955_v1 }
 0x4d5   : > { %1423 = vmatpush1.msra.mxu0 %v2963_v24 }
 0x4d6   : > { %2210 = vmatmul.mubr.msk.f32.vlgmr.msra.gmra.mxu0 %vm3545_vm14, %v1382_v23  ;;  %vm1592_vm14 = vcmask 883712  }
 0x596   : > { %v1458_v7 = vpop.f32.mrf.mxu0 }
 0x597   : > { %v1459_v59 = vadd.f32 %v1458_v7, %v1387_v53 }
 0x598   : > { %v1460_v20 = vpop.f32.mrf.mxu0 }
 0x599   : > { %vm1463_vm13 = vcmp.ge.f32.partialorder %v1459_v59, 0.0  ;;  %v1465_v34 = vmul.f32 0.2, %v1459_v59  ;;  %v1461_v56 = vadd.f32 %v1460_v20, %v1387_v53 }
 0x59b   : > { %v2967_v21 = vsel %vm1463_vm13, %v1459_v59, %v1465_v34  ;;  %vm1464_vm15 = vcmp.ge.f32.partialorder %v1461_v56, 0.0  ;;  %v1466_v47 = vmul.f32 0.2, %v1461_v56 }
 0x59c   : > { %1537 = vrot.lane.b32.xlu0 %v2967_v21, %s2256_s22 }
 0x59d   : > { %v2971_v33 = vsel %vm1464_vm15, %v1461_v56, %v1466_v47 }
 0x59e   : > { %1539 = vrot.lane.b32.xlu1 %v2971_v33, %s2256_s22 }
 0x5a0   : > { %1529 = vrot.lane.b32.xlu0 %v2967_v21, %s2257_s23 }
 0x5a2   : > { %1531 = vrot.lane.b32.xlu1 %v2971_v33, %s2257_s23 }
 0x5a4   : > { %1519 = vrot.lane.b32.xlu0 %v2967_v21, %s2258_s24 }
 0x5a6   : > { %1521 = vrot.lane.b32.xlu1 %v2971_v33, %s2258_s24 }
 0x5a8   : > { %1509 = vrot.lane.b32.xlu0 %v2967_v21, %s2259_s25 }
 0x5aa   : > { %1511 = vrot.lane.b32.xlu1 %v2971_v33, %s2259_s25 }
 0x5ac   : > { %1501 = vrot.lane.b32.xlu0 %v2971_v33, %s2260_s26 }
 0x5ae   : > { %1499 = vrot.lane.b32.xlu1 %v2967_v21, %s2260_s26 }
 0x5b0   : > { %1491 = vrot.lane.b32.xlu0 %v2971_v33, %s2261_s27 }
 0x5b2   : > { %1489 = vrot.lane.b32.xlu1 %v2967_v21, %s2261_s27 }
 0x5b4   : > { %1483 = vrot.lane.b32.xlu0 %v2971_v33, %s2262_s28 }
 0x5b6   : > { %1481 = vrot.lane.b32.xlu1 %v2967_v21, %s2262_s28 }
 0x5b8   : > { %1473 = vrot.lane.b32.xlu0 %v2971_v33, %s2264_s30 }
 0x5ba   : > { %1471 = vrot.lane.b32.xlu1 %v2967_v21, %s2264_s30 }
 0x5be   : > { %1589 = vperm.xlu1 %2242, %v1586_v26  }
 0x60e   : > { %v1538_v9 = vpop.permute.xlu0 %1537 }
 0x610   : > { %v1540_v32 = vpop.permute.xlu1 %1539 }
 0x611   : > { %v1541_v35 = vsel %vm608_vm1, %v1538_v9, %v1540_v32  ;;  %v1544_v38 = vsel %vm608_vm1, %v1540_v32, 0.0 }
 0x612   : > { %v3010_v40 = vsel %vm2399_vm2, %v1541_v35, 0.0  ;;  %v3014_v45 = vsel %vm2403_vm3, %v1544_v38, 0.0  ;;  %v1530_v50 = vpop.permute.xlu0 %1529 }
 0x613   : > { %2211 = vmatprep.subr.msk.mxu1 %vm734_vm0, %v3014_v45 }
 0x614   : > { %v1532_v10 = vpop.permute.xlu1 %1531  ;;  %2212 = vmatpush1.msk.msra.mxu1 %vm734_vm0, %v3010_v40 }
 0x615   : > { %v3021_v58 = vsel %vm599_vm4, %v1530_v50, %v1532_v10  ;;  %v3024_v13 = vsel %vm599_vm4, %v1532_v10, 0.0  ;;  %1608 = vmatprep.subr.mxu1 %v2835_v41 }
 0x616   : > { %v1575_v18 = vrot.slane %v3021_v58, 4  ;;  %v1576_v62 = vrot.slane %v3024_v13, 4  ;;  %1609 = vmatpush1.msra.mxu1 %v2845_v49  ;;  %v1520_v0 = vpop.permute.xlu0 %1519 }
 0x618   : > { %v1522_v23 = vpop.permute.xlu1 %1521  ;;  %v3032_v53 = vsel %vm734_vm0, %v2808_v63, %v1576_v62  ;;  %v3036_v7 = vsel %vm734_vm0, %v2811_v2, %v1575_v18 }
 0x619   : > { %3546 = vst [vmem:[#allocation8_spill] sm:$0xff] %v3032_v53  ;;  %3547 = vst [vmem:[#allocation9_spill] sm:$0xff] %v3036_v7  ;;  %v1523_v59 = vsel %vm588_vm5, %v1520_v0, %v1522_v23  ;;  %v1526_v20 = vsel %vm588_vm5, %v1522_v23, 0.0  ;;  %1610 = vmatprep.subr.mxu1 %v3032_v53 }
 0x61a   : > { %v3043_v34 = vsel %vm2433_vm7, %v1523_v59, 0.0  ;;  %v3047_v56 = vsel %vm2424_vm6, %v1526_v20, 0.0  ;;  %1611 = vmatpush1.msra.mxu1 %v3036_v7  ;;  %v1510_v63 = vpop.permute.xlu0 %1509 }
 0x61b   : > { %v1582_v2 = vsel %vm734_vm0, %v3047_v56, %v2665_v55  ;;  %v1581_v47 = vsel %vm734_vm0, %v3043_v34, %v2662_v54 }
 0x61c   : > { %v1512_v26 = vpop.permute.xlu1 %1511  ;;  %1612 = vmatprep.subr.mxu1 %v1582_v2 }
 0x61d   : > { %v1513_v9 = vsel %vm577_vm8, %v1510_v63, %v1512_v26  ;;  %v1516_v32 = vsel %vm577_vm8, %v1512_v26, 0.0  ;;  %1613 = vmatpush1.msra.mxu1 %v1581_v47 }
 0x61e   : > { %v3060_v35 = vsel %vm2399_vm2, %v1513_v9, 0.0  ;;  %v3064_v38 = vsel %vm2403_vm3, %v1516_v32, 0.0  ;;  %1614 = vmatprep.subr.mxu1 %v2869_v14  ;;  %v1502_v50 = vpop.permute.xlu0 %1501  ;;  %v1566_v32 = vsel %vm734_vm0, %v2967_v21, %v2704_v11 }
 0x61f   : > { %v1570_v10 = vrot.slane %v3060_v35, 4  ;;  %v1571_v18 = vrot.slane %v3064_v38, 4  ;;  %1615 = vmatpush1.msra.mxu1 %v2873_v17 }
 0x620   : > { %v1500_v62 = vpop.permute.xlu1 %1499 }
 0x621   : > { %v1503_v0 = vsel %vm566_vm9, %v1500_v62, %v1502_v50  ;;  %v1506_v23 = vsel %vm566_vm9, 0.0, %v1500_v62  ;;  %v3074_v59 = vsel %vm734_vm0, %v2825_v6, %v1571_v18  ;;  %v3078_v20 = vsel %vm734_vm0, %v2829_v37, %v1570_v10 }
 0x622   : > { %v3082_v63 = vsel %vm2433_vm7, %v1506_v23, 0.0  ;;  %v3086_v2 = vsel %vm2424_vm6, %v1503_v0, 0.0  ;;  %1616 = vmatprep.subr.mxu1 %v3074_v59  ;;  %v1492_v47 = vpop.permute.xlu0 %1491  ;;  %v1567_v6 = vsel %vm734_vm0, %v2971_v33, %v2707_v12 }
 0x623   : > { %v1555_v26 = vrot.slane %v3086_v2, 4  ;;  %1617 = vmatpush1.msra.mxu1 %v3078_v20  ;;  %v1554_v37 = vrot.slane %v3082_v63, 4 }
 0x624   : > { %v1490_v9 = vpop.permute.xlu1 %1489  ;;  %1618 = vmatprep.subr.mxu1 %v1567_v6 }
 0x625   : > { %v1493_v50 = vsel %vm551_vm10, %v1490_v9, %v1492_v47  ;;  %v1496_v10 = vsel %vm551_vm10, 0.0, %v1490_v9  ;;  %1619 = vmatpush1.msra.mxu1 %v1566_v32  ;;  %v3112_v23 = vsel %vm734_vm0, %v2877_v52, %v1555_v26  ;;  %v3117_v6 = vsel %vm734_vm0, %v2863_v3, %v1554_v37 }
 0x626   : > { %v3102_v18 = vsel %vm2403_vm3, %v1493_v50, 0.0  ;;  %v1484_v62 = vpop.permute.xlu0 %1483  ;;  %1620 = vmatprep.subr.mxu1 %v2899_v27  ;;  %v3107_v0 = vsel %vm2399_vm2, %v1496_v10, 0.0 }
 0x627   : > { %1621 = vmatpush1.msra.mxu1 %v2909_v8  ;;  %v1563_v52 = vsel %vm734_vm0, %v3102_v18, %v2718_v19  ;;  %v1562_v3 = vsel %vm734_vm0, %v3107_v0, %v2727_v22 }
 0x628   : > { %v1482_v47 = vpop.permute.xlu1 %1481  ;;  %1622 = vmatprep.subr.mxu1 %v3112_v23 }
 0x629   : > { %v3120_v9 = vsel %vm542_vm11, %v1482_v47, %v1484_v62  ;;  %v3123_v32 = vsel %vm542_vm11, 0.0, %v1482_v47  ;;  %1623 = vmatpush1.msra.mxu1 %v3117_v6 }
 0x62a   : > { %v1548_v26 = vrot.slane %v3123_v32, 4  ;;  %v1549_v50 = vrot.slane %v3120_v9, 4  ;;  %1624 = vmatprep.subr.mxu1 %v1563_v52  ;;  %v1474_v37 = vpop.permute.xlu0 %1473 }
 0x62b   : > { %1625 = vmatpush1.msra.mxu1 %v1562_v3 }
 0x62c   : > { %v1472_v10 = vpop.permute.xlu1 %1471  ;;  %1626 = vmatprep.subr.mxu1 %v2929_v4  ;;  %v3137_v62 = vsel %vm734_vm0, %v2924_v48, %v1549_v50  ;;  %v3153_v48 = vsel %vm734_vm0, %v2902_v28, %v1548_v26 }
 0x62d   : > { %3548 = vst [vmem:[#allocation10_spill] sm:$0xff] %v3137_v62  ;;  %v1475_v47 = vsel %vm527_vm12, %v1472_v10, %v1474_v37  ;;  %v1478_v5 = vsel %vm527_vm12, 0.0, %v1472_v10  ;;  %1627 = vmatpush1.msra.mxu1 %v2935_v51  ;;  %3549 = vst [vmem:[#allocation11_spill] sm:$0xff] %v3153_v48  ;;  %v1585_v37 = vld [vmem:[%s3511_s8] sm:$0xf] }
 0x62e   : > { %v3144_v52 = vsel %vm2433_vm7, %v1478_v5, 0.0  ;;  %v3148_v3 = vsel %vm2424_vm6, %v1475_v47, 0.0  ;;  %1628 = vmatprep.subr.mxu1 %v3137_v62 }
 0x62f   : > { %1629 = vmatpush1.msra.mxu1 %v3153_v48  ;;  %v1559_v50 = vsel %vm734_vm0, %v3148_v3, %v2745_v31  ;;  %v1558_v5 = vsel %vm734_vm0, %v3144_v52, %v2742_v29 }
 0x630   : > { %1630 = vmatprep.subr.mxu1 %v1559_v50 }
 0x631   : > { %1631 = vmatpush1.msra.mxu1 %v1558_v5 }
 0x632   : > { %1632 = vmatprep.subr.mxu1 %v2955_v1 }
 0x633   : > { %1633 = vmatpush1.msra.mxu1 %v2963_v24 }
 0x634   : > { %2213 = vmatmul.mubr.msk.f32.vlgmr.msra.gmra.mxu1 %vm1592_vm14, %v1585_v37  ;;  %2045 = vmatprep.subr.mxu1 %v2869_v14 }
 0x635   : > { %2046 = vmatpush1.msra.mxu1 %v2873_v17 }
 0x639   : > { %v1590_v28 = vpop.permute.xlu1 %1589 }
 0x6f4   : > { %v1668_v26 = vpop.f32.mrf.mxu1 }
 0x6f5   : > { %v1669_v10 = vadd.f32 %v1668_v26, %v1590_v28 }
 0x6f6   : > { %v1670_v47 = vpop.f32.mrf.mxu1 }
 0x6f7   : > { %vm1673_vm13 = vcmp.ge.f32.partialorder %v1669_v10, 0.0  ;;  %v1675_v50 = vmul.f32 0.2, %v1669_v10  ;;  %v1671_v5 = vadd.f32 %v1670_v47, %v1590_v28  ;;  %v1826_v28 = vld [vmem:[%s3514_s11] sm:$0xf] }
 0x6f9   : > { %v3169_v30 = vsel %vm1673_vm13, %v1669_v10, %v1675_v50  ;;  %vm1674_vm15 = vcmp.ge.f32.partialorder %v1671_v5, 0.0  ;;  %v1676_v54 = vmul.f32 0.2, %v1671_v5 }
 0x6fa   : > { %1739 = vrot.lane.b32.xlu1 %v3169_v30, %s2257_s23 }
 0x6fb   : > { %v3173_v55 = vsel %vm1674_vm15, %v1671_v5, %v1676_v54  ;;  %v3206_v54 = vld [vmem:[%s3513_s10] sm:$0xff]  ;;  %vm2036_vm15 = vcmask 424960  }
 0x6fc   : > { %1741 = vrot.lane.b32.xlu0 %v3173_v55, %s2257_s23  ;;  %v1833_v37 = vcombine.high %v3206_v54, %v3206_v54 }
 0x6fe   : > { %1729 = vrot.lane.b32.xlu1 %v3169_v30, %s2258_s24  ;;  %2214 = vmatprep.mubr.msk.f32.mxu0 %vm542_vm11, %v1833_v37 }
 0x700   : > { %1731 = vrot.lane.b32.xlu0 %v3173_v55, %s2258_s24 }
 0x702   : > { %1719 = vrot.lane.b32.xlu1 %v3169_v30, %s2259_s25 }
 0x704   : > { %1721 = vrot.lane.b32.xlu0 %v3173_v55, %s2259_s25 }
 0x706   : > { %1711 = vrot.lane.b32.xlu1 %v3173_v55, %s2260_s26 }
 0x708   : > { %1709 = vrot.lane.b32.xlu0 %v3169_v30, %s2260_s26 }
 0x70a   : > { %1701 = vrot.lane.b32.xlu1 %v3173_v55, %s2261_s27 }
 0x70c   : > { %1699 = vrot.lane.b32.xlu0 %v3169_v30, %s2261_s27 }
 0x70e   : > { %1693 = vrot.lane.b32.xlu1 %v3173_v55, %s2262_s28 }
 0x710   : > { %1691 = vrot.lane.b32.xlu0 %v3169_v30, %s2262_s28 }
 0x712   : > { %1683 = vrot.lane.b32.xlu1 %v3173_v55, %s2264_s30 }
 0x714   : > { %1681 = vrot.lane.b32.xlu0 %v3169_v30, %s2264_s30 }
 0x716   : > { %1747 = vrot.lane.b32.xlu1 %v3169_v30, %s2256_s22 }
 0x718   : > { %1749 = vrot.lane.b32.xlu0 %v3173_v55, %s2256_s22 }
 0x71c   : > { %1829 = vperm.xlu0 %2241, %v1826_v28  }
 0x76c   : > { %v1740_v26 = vpop.permute.xlu1 %1739 }
 0x76e   : > { %v1742_v10 = vpop.permute.xlu0 %1741 }
 0x76f   : > { %v3217_v47 = vsel %vm599_vm4, %v1740_v26, %v1742_v10  ;;  %v3220_v50 = vsel %vm599_vm4, %v1742_v10, 0.0 }
 0x770   : > { %3550 = vst [vmem:[#allocation12_spill] sm:$0xff] %v3217_v47  ;;  %3551 = vst [vmem:[#allocation13_spill] sm:$0xff] %v3220_v50  ;;  %v1805_v5 = vrot.slane %v3217_v47, 4  ;;  %v1806_v7 = vrot.slane %v3220_v50, 4  ;;  %v1730_v53 = vpop.permute.xlu1 %1729 }
 0x772   : > { %v1732_v29 = vpop.permute.xlu0 %1731  ;;  %v1816_v31 = vsel %vm734_vm0, %v3024_v13, %v1806_v7  ;;  %v1815_v37 = vsel %vm734_vm0, %v3021_v58, %v1805_v5 }
 0x773   : > { %v1733_v28 = vsel %vm588_vm5, %v1730_v53, %v1732_v29  ;;  %v1736_v26 = vsel %vm588_vm5, %v1732_v29, 0.0  ;;  %1836 = vmatprep.subr.mxu0 %v1816_v31 }
 0x774   : > { %v1737_v10 = vsel %vm2433_vm7, %v1733_v28, 0.0  ;;  %v1738_v47 = vsel %vm2424_vm6, %v1736_v26, 0.0  ;;  %1837 = vmatpush1.msra.mxu0 %v1815_v37  ;;  %v1720_v50 = vpop.permute.xlu1 %1719 }
 0x775   : > { %v1800_v48 = vrot.slane %v1737_v10, 4  ;;  %v1801_v62 = vrot.slane %v1738_v47, 4  ;;  %1838 = vmatprep.subr.mxu0 %v2851_v43 }
 0x776   : > { %v1722_v13 = vpop.permute.xlu0 %1721  ;;  %1839 = vmatpush1.msra.mxu0 %v2858_v44 }
 0x777   : > { %v1723_v58 = vsel %vm577_vm8, %v1720_v50, %v1722_v13  ;;  %v1726_v29 = vsel %vm577_vm8, %v1722_v13, 0.0  ;;  %v3240_v31 = vsel %vm734_vm0, %v3047_v56, %v1801_v62  ;;  %v3244_v53 = vsel %vm734_vm0, %v3043_v34, %v1800_v48  ;;  %v3556_v15 = vld [vmem:[#allocation13_spill] sm:$0xff] }
 0x778   : > { %v3248_v7 = vsel %vm2399_vm2, %v1723_v58, 0.0  ;;  %v3252_v43 = vsel %vm2403_vm3, %v1726_v29, 0.0  ;;  %1840 = vmatprep.subr.mxu0 %v3240_v31  ;;  %v1712_v44 = vpop.permute.xlu1 %1711  ;;  %v1789_v34 = vrot.slane %v3173_v55, 4  ;;  %v1788_v55 = vrot.slane %v3169_v30, 4 }
 0x779   : > { %v1794_v47 = vrot.slane %v3248_v7, 4  ;;  %v1795_v56 = vrot.slane %v3252_v43, 4  ;;  %1841 = vmatpush1.msra.mxu0 %v3244_v53 }
 0x77a   : > { %v1710_v62 = vpop.permute.xlu0 %1709  ;;  %1842 = vmatprep.subr.mxu0 %v2869_v14  ;;  %v3283_v13 = vsel %vm734_vm0, %v2971_v33, %v1789_v34  ;;  %v3291_v29 = vsel %vm734_vm0, %v2967_v21, %v1788_v55 }
 0x77b   : > { %v1713_v48 = vsel %vm566_vm9, %v1710_v62, %v1712_v44  ;;  %v1716_v50 = vsel %vm566_vm9, 0.0, %v1710_v62  ;;  %1843 = vmatpush1.msra.mxu0 %v2873_v17  ;;  %v1812_v5 = vsel %vm734_vm0, %v3064_v38, %v1795_v56  ;;  %v1811_v37 = vsel %vm734_vm0, %v3060_v35, %v1794_v47 }
 0x77c   : > { %v3269_v28 = vsel %vm2424_vm6, %v1713_v48, 0.0  ;;  %1844 = vmatprep.subr.mxu0 %v1812_v5  ;;  %v1702_v14 = vpop.permute.xlu1 %1701  ;;  %v3274_v26 = vsel %vm2433_vm7, %v1716_v50, 0.0 }
 0x77d   : > { %1845 = vmatpush1.msra.mxu0 %v1811_v37  ;;  %v1777_v38 = vrot.slane %v3269_v28, 4  ;;  %v1776_v30 = vrot.slane %v3274_v26, 4 }
 0x77e   : > { %v1700_v17 = vpop.permute.xlu0 %1699  ;;  %1846 = vmatprep.subr.mxu0 %v2887_v57 }
 0x77f   : > { %v1703_v35 = vsel %vm551_vm10, %v1700_v17, %v1702_v14  ;;  %v1706_v10 = vsel %vm551_vm10, 0.0, %v1700_v17  ;;  %1847 = vmatpush1.msra.mxu0 %v2893_v25  ;;  %v1787_v47 = vsel %vm734_vm0, %v3086_v2, %v1777_v38  ;;  %v1786_v34 = vsel %vm734_vm0, %v3082_v63, %v1776_v30 }
 0x780   : > { %v1708_v58 = vsel %vm2403_vm3, %v1703_v35, 0.0  ;;  %1848 = vmatprep.subr.mxu0 %v3283_v13  ;;  %v1694_v57 = vpop.permute.xlu1 %1693  ;;  %v1707_v44 = vsel %vm2399_vm2, %v1706_v10, 0.0 }
 0x781   : > { %1849 = vmatpush1.msra.mxu0 %v3291_v29  ;;  %v1771_v33 = vrot.slane %v1708_v58, 4  ;;  %v1770_v56 = vrot.slane %v1707_v44, 4 }
 0x782   : > { %v1692_v25 = vpop.permute.xlu0 %1691  ;;  %1850 = vmatprep.subr.mxu0 %v2899_v27 }
 0x783   : > { %1851 = vmatpush1.msra.mxu0 %v2909_v8  ;;  %v3301_v62 = vsel %vm542_vm11, %v1692_v25, %v1694_v57  ;;  %v3306_v48 = vsel %vm542_vm11, 0.0, %v1692_v25  ;;  %v3315_v14 = vsel %vm734_vm0, %v3102_v18, %v1771_v33 }
 0x784   : > { %v1684_v21 = vpop.permute.xlu1 %1683  ;;  %1852 = vmatprep.subr.mxu0 %v1787_v47  ;;  %v1765_v5 = vrot.slane %v3301_v62, 4  ;;  %v1764_v63 = vrot.slane %v3306_v48, 4 }
 0x785   : > { %1853 = vmatpush1.msra.mxu0 %v1786_v34 }
 0x786   : > { %v1682_v50 = vpop.permute.xlu0 %1681  ;;  %1854 = vmatprep.subr.mxu0 %v2914_v36  ;;  %v3323_v36 = vsel %vm734_vm0, %v3107_v0, %v1770_v56  ;;  %v1783_v0 = vsel %vm734_vm0, %v3120_v9, %v1765_v5  ;;  %v1782_v57 = vsel %vm734_vm0, %v3123_v32, %v1764_v63  ;;  %v3389_v5 = vld [vmem:[%s3515_s12] sm:$0xff] }
 0x787   : > { %v1685_v2 = vsel %vm527_vm12, %v1682_v50, %v1684_v21  ;;  %v1688_v37 = vsel %vm527_vm12, 0.0, %v1682_v50  ;;  %1855 = vmatpush1.msra.mxu0 %v2920_v42 }
 0x788   : > { %v1690_v55 = vsel %vm2424_vm6, %v1685_v2, 0.0  ;;  %1856 = vmatprep.subr.mxu0 %v3315_v14  ;;  %v1689_v17 = vsel %vm2433_vm7, %v1688_v37, 0.0  ;;  %v1748_v42 = vpop.permute.xlu1 %1747  ;;  %v2035_v2 = vcombine.high %v3389_v5, %v3389_v5 }
 0x789   : > { %1857 = vmatpush1.msra.mxu0 %v3323_v36  ;;  %v1760_v18 = vrot.slane %v1690_v55, 4  ;;  %v1759_v30 = vrot.slane %v1689_v17, 4 }
 0x78a   : > { %v1750_v38 = vpop.permute.xlu0 %1749  ;;  %1858 = vmatprep.subr.mxu0 %v2929_v4  ;;  %2217 = vmatprep.mubr.msk.f32.mxu1 %vm2036_vm15, %v2035_v2 }
 0x78b   : > { %v1751_v35 = vsel %vm608_vm1, %v1748_v42, %v1750_v38  ;;  %v1754_v10 = vsel %vm608_vm1, %v1750_v38, 0.0  ;;  %1859 = vmatpush1.msra.mxu0 %v2935_v51  ;;  %v3344_v9 = vsel %vm734_vm0, %v3148_v3, %v1760_v18  ;;  %v3349_v47 = vsel %vm734_vm0, %v3144_v52, %v1759_v30 }
 0x78c   : > { %v1756_v58 = vsel %vm2403_vm3, %v1754_v10, 0.0  ;;  %1860 = vmatprep.subr.mxu0 %v1783_v0  ;;  %v1755_v44 = vsel %vm2399_vm2, %v1751_v35, 0.0 }
 0x78d   : > { %1861 = vmatpush1.msra.mxu0 %v1782_v57  ;;  %v1820_v25 = vrot.slane %v1756_v58, 4  ;;  %v1819_v33 = vrot.slane %v1755_v44, 4 }
 0x78e   : > { %1862 = vmatprep.subr.mxu0 %v2942_v60 }
 0x78f   : > { %1863 = vmatpush1.msra.mxu0 %v2948_v61  ;;  %v3356_v60 = vsel %vm734_vm0, %v3014_v45, %v1820_v25  ;;  %v3361_v61 = vsel %vm734_vm0, %v3010_v40, %v1819_v33 }
 0x790   : > { %1864 = vmatprep.subr.mxu0 %v3344_v9 }
 0x791   : > { %1865 = vmatpush1.msra.mxu0 %v3349_v47 }
 0x792   : > { %1866 = vmatprep.subr.mxu0 %v2955_v1 }
 0x793   : > { %1867 = vmatpush1.msra.mxu0 %v2963_v24 }
 0x794   : > { %1896 = vmatprep.subr.mxu0 %v3356_v60 }
 0x795   : > { %1897 = vmatpush2.msra.mxu0 %v3361_v61 }
 0x796   : > { %1898 = vmatprep.subr.mxu0 %v2835_v41 }
 0x797   : > { %1899 = vmatpush2.msra.mxu0 %v2845_v49  ;;  %v1830_v32 = vpop.permute.xlu0 %1829 }
 0x798   : > { %1901 = vmatmul.mubr.f32.vlgmr.msra.gmra.mxu0 %v3206_v54  ;;  %v2028_v54 = vld [vmem:[%s3516_s13] sm:$0xf] }
 0x858   : > { %v1902_v52 = vpop.f32.mrf.mxu0 }
 0x859   : > { %v1903_v3 = vadd.f32 %v1902_v52, %v1830_v32 }
 0x85a   : > { %v1904_v56 = vpop.f32.mrf.mxu0 }
 0x85b   : > { %vm1907_vm14 = vcmp.ge.f32.partialorder %v1903_v3, 0.0  ;;  %v1909_v45 = vmul.f32 0.2, %v1903_v3  ;;  %v1905_v21 = vadd.f32 %v1904_v56, %v1830_v32 }
 0x85d   : > { %v1911_v34 = vsel %vm1907_vm14, %v1903_v3, %v1909_v45  ;;  %vm1908_vm13 = vcmp.ge.f32.partialorder %v1905_v21, 0.0  ;;  %v1910_v50 = vmul.f32 0.2, %v1905_v21 }
 0x85e   : > { %1952 = vrot.lane.b32.xlu0 %v1911_v34, %s2259_s25 }
 0x85f   : > { %v1912_v40 = vsel %vm1908_vm13, %v1905_v21, %v1910_v50 }
 0x860   : > { %1954 = vrot.lane.b32.xlu1 %v1912_v40, %s2259_s25 }
 0x862   : > { %1944 = vrot.lane.b32.xlu0 %v1912_v40, %s2260_s26 }
 0x864   : > { %1942 = vrot.lane.b32.xlu1 %v1911_v34, %s2260_s26 }
 0x866   : > { %1934 = vrot.lane.b32.xlu0 %v1912_v40, %s2261_s27 }
 0x868   : > { %1932 = vrot.lane.b32.xlu1 %v1911_v34, %s2261_s27 }
 0x86a   : > { %1927 = vrot.lane.b32.xlu0 %v1912_v40, %s2262_s28 }
 0x86c   : > { %1925 = vrot.lane.b32.xlu1 %v1911_v34, %s2262_s28 }
 0x86e   : > { %1917 = vrot.lane.b32.xlu0 %v1912_v40, %s2264_s30 }
 0x870   : > { %1915 = vrot.lane.b32.xlu1 %v1911_v34, %s2264_s30 }
 0x872   : > { %1979 = vrot.lane.b32.xlu0 %v1911_v34, %s2256_s22 }
 0x874   : > { %1981 = vrot.lane.b32.xlu1 %v1912_v40, %s2256_s22 }
 0x876   : > { %1972 = vrot.lane.b32.xlu0 %v1911_v34, %s2257_s23 }
 0x878   : > { %1974 = vrot.lane.b32.xlu1 %v1912_v40, %s2257_s23 }
 0x87a   : > { %1962 = vrot.lane.b32.xlu0 %v1911_v34, %s2258_s24 }
 0x87c   : > { %1964 = vrot.lane.b32.xlu1 %v1912_v40, %s2258_s24  ;;  %s487_s24 = scalar_lea.vmem %s3517_s14, %s2349_s15 }
 0x880   : > { %2031 = vperm.xlu1 %2242, %v2028_v54  }
 0x8d0   : > { %v1953_v37 = vpop.permute.xlu0 %1952 }
 0x8d2   : > { %v1955_v63 = vpop.permute.xlu1 %1954 }
 0x8d3   : > { %v1956_v55 = vsel %vm577_vm8, %v1953_v37, %v1955_v63  ;;  %v1959_v17 = vsel %vm577_vm8, %v1955_v63, 0.0  ;;  %v3552_v63 = vld [vmem:[#allocation10_spill] sm:$0xff] }
 0x8d4   : > { %v1960_v42 = vsel %vm2399_vm2, %v1956_v55, 0.0  ;;  %v1961_v38 = vsel %vm2403_vm3, %v1959_v17, 0.0  ;;  %v1945_v10 = vpop.permute.xlu0 %1944  ;;  %v3555_v17 = vld [vmem:[#allocation6_spill] sm:$0xff] }
 0x8d5   : > { %v2008_v18 = vrot.slane %v1960_v42, 4  ;;  %v2009_v35 = vrot.slane %v1961_v38, 4 }
 0x8d6   : > { %v1943_v0 = vpop.permute.xlu1 %1942 }
 0x8d7   : > { %v1946_v30 = vsel %vm566_vm9, %v1943_v0, %v1945_v10  ;;  %v2017_v58 = vsel %vm734_vm0, %v3252_v43, %v2009_v35  ;;  %v2016_v57 = vsel %vm734_vm0, %v3248_v7, %v2008_v18  ;;  %v1949_v44 = vsel %vm566_vm9, 0.0, %v1943_v0 }
 0x8d8   : > { %2047 = vmatprep.subr.mxu1 %v2017_v58  ;;  %v1951_v25 = vsel %vm2424_vm6, %v1946_v30, 0.0  ;;  %v1950_v32 = vsel %vm2433_vm7, %v1949_v44, 0.0  ;;  %v1935_v52 = vpop.permute.xlu0 %1934  ;;  %v2015_v43 = vsel %vm734_vm0, %v1912_v40, %v2707_v12  ;;  %v2014_v7 = vsel %vm734_vm0, %v1911_v34, %v2704_v11 }
 0x8d9   : > { %2048 = vmatpush1.msra.mxu1 %v2016_v57  ;;  %v2003_v3 = vrot.slane %v1951_v25, 4  ;;  %v2002_v56 = vrot.slane %v1950_v32, 4  ;;  %v3557_v25 = vld [vmem:[#allocation12_spill] sm:$0xff]  ;;  %v3559_v32 = vld [vmem:[#allocation9_spill] sm:$0xff] }
 0x8da   : > { %v1933_v33 = vpop.permute.xlu1 %1932  ;;  %2049 = vmatprep.subr.mxu1 %v3074_v59 }
 0x8db   : > { %2050 = vmatpush1.msra.mxu1 %v3078_v20  ;;  %v1936_v59 = vsel %vm551_vm10, %v1933_v33, %v1935_v52  ;;  %v1939_v21 = vsel %vm551_vm10, 0.0, %v1933_v33  ;;  %v2013_v11 = vsel %vm734_vm0, %v3269_v28, %v2003_v3  ;;  %v3561_v52 = vld [vmem:[#allocation4_spill] sm:$0xff] }
 0x8dc   : > { %2051 = vmatprep.subr.mxu1 %v2015_v43  ;;  %v1928_v20 = vpop.permute.xlu0 %1927  ;;  %v1941_v12 = vsel %vm2403_vm3, %v1936_v59, 0.0 }
 0x8dd   : > { %2052 = vmatpush1.msra.mxu1 %v2014_v7  ;;  %v1999_v28 = vsel %vm734_vm0, %v1941_v12, %v2718_v19 }
 0x8de   : > { %v1926_v45 = vpop.permute.xlu1 %1925  ;;  %2053 = vmatprep.subr.mxu1 %v3283_v13  ;;  %v2012_v13 = vsel %vm734_vm0, %v3274_v26, %v2002_v56 }
 0x8df   : > { %2054 = vmatpush1.msra.mxu1 %v3291_v29  ;;  %v1940_v29 = vsel %vm2399_vm2, %v1939_v21, 0.0  ;;  %v1929_v34 = vsel %vm542_vm11, %v1926_v45, %v1928_v20  ;;  %v3562_v21 = vld [vmem:[#allocation2_spill] sm:$0xff] }
 0x8e0   : > { %2055 = vmatprep.subr.mxu1 %v2899_v27  ;;  %v1998_v26 = vsel %vm734_vm0, %v1940_v29, %v2727_v22  ;;  %v1991_v50 = vrot.slane %v1929_v34, 4  ;;  %v1918_v40 = vpop.permute.xlu0 %1917 }
 0x8e1   : > { %2056 = vmatpush1.msra.mxu1 %v2909_v8  ;;  %v1931_v8 = vsel %vm542_vm11, 0.0, %v1926_v45 }
 0x8e2   : > { %2057 = vmatprep.subr.mxu1 %v2013_v11  ;;  %v1916_v27 = vpop.permute.xlu1 %1915  ;;  %v1990_v54 = vrot.slane %v1931_v8, 4  ;;  %v1997_v19 = vsel %vm734_vm0, %v3301_v62, %v1991_v50  ;;  %v3563_v11 = vld [vmem:[#allocation3_spill] sm:$0xff] }
 0x8e3   : > { %2058 = vmatpush1.msra.mxu1 %v2012_v13  ;;  %v1919_v2 = vsel %vm527_vm12, %v1916_v27, %v1918_v40 }
 0x8e4   : > { %2059 = vmatprep.subr.mxu1 %v3112_v23  ;;  %v1922_v23 = vsel %vm527_vm12, 0.0, %v1916_v27  ;;  %v1924_v22 = vsel %vm2424_vm6, %v1919_v2, 0.0  ;;  %v1980_v37 = vpop.permute.xlu0 %1979 }
 0x8e5   : > { %2060 = vmatpush1.msra.mxu1 %v3117_v6 }
 0x8e6   : > { %2061 = vmatprep.subr.mxu1 %v1999_v28  ;;  %v1982_v6 = vpop.permute.xlu1 %1981 }
 0x8e7   : > { %2062 = vmatpush1.msra.mxu1 %v1998_v26  ;;  %v1983_v38 = vsel %vm608_vm1, %v1980_v37, %v1982_v6 }
 0x8e8   : > { %2063 = vmatprep.subr.mxu1 %v3315_v14  ;;  %v1996_v14 = vsel %vm734_vm0, %v3306_v48, %v1990_v54  ;;  %v1986_v48 = vsel %vm608_vm1, %v1982_v6, 0.0  ;;  %v1973_v18 = vpop.permute.xlu0 %1972  ;;  %v1987_v30 = vsel %vm2399_vm2, %v1983_v38, 0.0 }
 0x8e9   : > { %2064 = vmatpush1.msra.mxu1 %v3323_v36  ;;  %v1923_v36 = vsel %vm2433_vm7, %v1922_v23, 0.0  ;;  %v1988_v10 = vsel %vm2403_vm3, %v1986_v48, 0.0 }
 0x8ea   : > { %2065 = vmatprep.subr.mxu1 %v2929_v4  ;;  %v3553_v4 = vld [vmem:[#allocation11_spill] sm:$0xff]  ;;  %v1975_v62 = vpop.permute.xlu1 %1974  ;;  %v1994_v42 = vsel %vm734_vm0, %v1923_v36, %v3555_v17 }
 0x8eb   : > { %2066 = vmatpush1.msra.mxu1 %v2935_v51  ;;  %v3554_v51 = vld [vmem:[#allocation7_spill] sm:$0xff]  ;;  %v1978_v35 = vsel %vm599_vm4, %v1975_v62, 0.0  ;;  %v1976_v0 = vsel %vm599_vm4, %v1973_v18, %v1975_v62 }
 0x8ec   : > { %2067 = vmatprep.subr.mxu1 %v1997_v19  ;;  %v1995_v55 = vsel %vm734_vm0, %v1924_v22, %v3554_v51  ;;  %v2020_v58 = vrot.slane %v1978_v35, 4 }
 0x8ed   : > { %2068 = vmatpush1.msra.mxu1 %v1996_v14 }
 0x8ee   : > { %2069 = vmatprep.subr.mxu1 %v3552_v63 }
 0x8ef   : > { %2070 = vmatpush1.msra.mxu1 %v3553_v4 }
 0x8f0   : > { %2071 = vmatprep.subr.mxu1 %v1995_v55 }
 0x8f1   : > { %2072 = vmatpush1.msra.mxu1 %v1994_v42 }
 0x8f2   : > { %2073 = vmatprep.subr.mxu1 %v3344_v9  ;;  %v1965_v9 = vpop.permute.xlu1 %1964 }
 0x8f3   : > { %2074 = vmatpush1.msra.mxu1 %v3349_v47  ;;  %v2019_v47 = vrot.slane %v1976_v0, 4  ;;  %v1969_v16 = vsel %vm588_vm5, %v1965_v9, 0.0 }
 0x8f4   : > { %2075 = vmatprep.subr.mxu1 %v2955_v1  ;;  %v1963_v1 = vpop.permute.xlu0 %1962  ;;  %v1971_v44 = vsel %vm2424_vm6, %v1969_v16, 0.0 }
 0x8f5   : > { %2076 = vmatpush1.msra.mxu1 %v2963_v24  ;;  %v1966_v57 = vsel %vm588_vm5, %v1963_v1, %v1965_v9  ;;  %v2026_v24 = vsel %vm734_vm0, %v3556_v15, %v2020_v58 }
 0x8f6   : > { %2215 = vmatprep.subr.msk.mxu1 %vm734_vm0, %v1988_v10  ;;  %v1970_v33 = vsel %vm2433_vm7, %v1966_v57, 0.0 }
 0x8f7   : > { %2216 = vmatpush2.msk.msra.mxu1 %vm734_vm0, %v1987_v30  ;;  %v2023_v39 = vsel %vm734_vm0, %v1970_v33, %v3561_v52 }
 0x8f8   : > { %2097 = vmatprep.subr.mxu1 %v3356_v60  ;;  %v2025_v60 = vsel %vm734_vm0, %v3557_v25, %v2019_v47 }
 0x8f9   : > { %2098 = vmatpush2.msra.mxu1 %v3361_v61  ;;  %v3558_v61 = vld [vmem:[#allocation8_spill] sm:$0xff] }
 0x8fa   : > { %2099 = vmatprep.subr.mxu1 %v2835_v41  ;;  %v3560_v41 = vld [vmem:[#allocation5_spill] sm:$0xff] }
 0x8fb   : > { %2100 = vmatpush2.msra.mxu1 %v2845_v49  ;;  %v2024_v49 = vsel %vm734_vm0, %v1971_v44, %v3560_v41  ;;  %v2032_v46 = vpop.permute.xlu1 %2031 }
 0x8fc   : > { %2101 = vmatprep.subr.mxu1 %v2026_v24 }
 0x8fd   : > { %2102 = vmatpush2.msra.mxu1 %v2025_v60 }
 0x8fe   : > { %2103 = vmatprep.subr.mxu1 %v3558_v61 }
 0x8ff   : > { %2104 = vmatpush2.msra.mxu1 %v3559_v32 }
 0x900   : > { %2105 = vmatprep.subr.mxu1 %v2024_v49 }
 0x901   : > { %2106 = vmatpush2.msra.mxu1 %v2023_v39 }
 0x902   : > { %2107 = vmatprep.subr.mxu1 %v3240_v31 }
 0x903   : > { %2108 = vmatpush2.msra.mxu1 %v3244_v53 }
 0x904   : > { %2110 = vmatmul.mubr.f32.vlgmr.msra.gmra.mxu1 %v3389_v5 }
 0x9c4   : > { %v2111_v43 = vpop.f32.mrf.mxu1 }
 0x9c5   : > { %v2112_v7 = vadd.f32 %v2111_v43, %v2032_v46 }
 0x9c6   : > { %v2113_v3 = vpop.f32.mrf.mxu1 }
 0x9c7   : > { %v2116_v56 = vmul.f32 0.2, %v2112_v7  ;;  %v2114_v45 = vadd.f32 %v2113_v3, %v2032_v46 }
 0x9c9   : > { %v2117_v59 = vmul.f32 0.2, %v2114_v45  ;;  %v2118_v20 = vadd.f32 %v2116_v56, %v3562_v21 }
 0x9cb   : > { %v2119_v12 = vadd.f32 %v2117_v59, %v3563_v11 }
 0x9cd   : > { %v2122_v31 = vcombine.low %v2118_v20, %v2119_v12 }
 0x9cf   : > { %2124 = vst [vmem:[%s487_s24] sm:$0xff] %v2122_v31 }
 0x9d0 PF: > { %s24_s29 = sadd.s32 1, %s2254_s29  }
 0x9d1   : > { %p21_p4 = scmp.ge.s32.totalorder %s24_s29, 4  }
 0x9d3   :  { %23 = sbr.rel (!%p21_p4) target bundleno = 1 (0x1), region = 109 }

</bundles_post_ra>
